<compile_context>
chip_gen: v5e
topology: v5e:2x2
jax: 0.10.0
libtpu: 0.0.40
codegen_flags: <defaults>
</compile_context>

<pallas_src>
import jax
import jax.numpy as jnp
from jax import lax
from jax.experimental import pallas as pl
from jax.experimental.pallas import tpu as pltpu

VMEM_SPEC = pl.BlockSpec(memory_space=pltpu.MemorySpace.VMEM)


# ----------------------------------------------------------------------------
# Fused kernel
# ----------------------------------------------------------------------------
def _make_kernel(*, T, B, K, n_hot, Vtot2, Hf, Htot):
    TB = T * B

    def kernel(ids_ref, w_in_ref, b_in_ref, whh_ref, wout_f_ref, wout_b_ref,
               bias_ref, start_ref, end_ref, trans_ref, out_ref,
               g_scr, hf_scr, hb_scr):
        # ---- prologue: embedding + input projection for ALL blocks/directions ----
        # multi-hot over the concatenated [fwd vocab | time-reversed bwd vocab] space
        ids = ids_ref[...]                                        # (TB, n_hot) int32
        iota_v = lax.broadcasted_iota(jnp.int32, (TB, Vtot2), 1)
        hot = iota_v == ids[:, 0:1]
        for j in range(1, n_hot):
            hot = jnp.logical_or(hot, iota_v == ids[:, j:j + 1])
        hot_bf = hot.astype(jnp.float32).astype(jnp.bfloat16)
        # gate-major layout: [i | f | o | g], each slab Htot wide (fwd segs then bwd segs)
        g_scr[...] = (jnp.dot(hot_bf, w_in_ref[...],
                              preferred_element_type=jnp.float32)
                      + b_in_ref[...])                            # (TB, 4*Htot) f32

        # ---- single fused bidirectional recurrence over all blocks ----
        whh = whh_ref[...]                                        # (Htot, 4*Htot) bf16
        h = jnp.zeros((B, Htot), jnp.float32)                     # [h_fwd_all | h_bwd_all]
        c = jnp.zeros((B, Htot), jnp.float32)
        for k in range(T):                                        # statically unrolled
            rec = jnp.dot(h.astype(jnp.bfloat16), whh,
                          preferred_element_type=jnp.float32)     # (B, 4*Htot)
            g = g_scr[pl.ds(k * B, B), :] + rec
            s = jax.nn.sigmoid(g[:, :3 * Htot])                   # i | f | o (one EUP push)
            gg = jnp.tanh(g[:, 3 * Htot:])                        # g gate
            c = s[:, Htot:2 * Htot] * c + s[:, :Htot] * gg
            h = s[:, 2 * Htot:] * jnp.tanh(c)
            hf_scr[pl.ds(k * B, B), :] = h[:, :Hf]                # fwd output at time k
            hb_scr[pl.ds((T - 1 - k) * B, B), :] = h[:, Hf:]      # bwd output at time T-1-k

        # ---- folded h2out + outs2tag -> emissions (TB, K) ----
        em = (jnp.dot(hf_scr[...].astype(jnp.bfloat16), wout_f_ref[...],
                      preferred_element_type=jnp.float32)
              + jnp.dot(hb_scr[...].astype(jnp.bfloat16), wout_b_ref[...],
                        preferred_element_type=jnp.float32)
              + bias_ref[...])

        # ---- CRF Viterbi forward recursion (history kept in registers) ----
        trans_t = trans_ref[...]                                  # trans_t[cur, prev]
        iota_prev = lax.broadcasted_iota(jnp.int32, (B, K, K), 2)
        score = start_ref[...] + em[0:B, :]
        hist = []
        for t in range(1, T):
            m = score[:, None, :] + trans_t[None, :, :]           # (B, K_cur, K_prev)
            best = jnp.max(m, axis=-1)
            arg = jnp.min(jnp.where(m == best[:, :, None], iota_prev, K), axis=-1)
            hist.append(arg)                                      # hist[t-1]: best prev at time t
            score = best + em[t * B:(t + 1) * B, :]
        final = score + end_ref[...]                              # (B, K)

        # ---- backtrack into a (B, T) register accumulator, single store ----
        iota_k = lax.broadcasted_iota(jnp.int32, (B, K), 1)
        fmax = jnp.max(final, axis=-1, keepdims=True)
        cur = jnp.min(jnp.where(final == fmax, iota_k, K),
                      axis=-1, keepdims=True)                     # (B, 1) int32
        col_t = lax.broadcasted_iota(jnp.int32, (B, T), 1)
        tags = jnp.where(col_t == T - 1, cur.astype(jnp.float32),
                         jnp.zeros((B, T), jnp.float32))
        for t in range(T - 2, -1, -1):
            cur = jnp.sum(jnp.where(iota_k == cur, hist[t], 0),   # hist[t] == history@time t+1
                          axis=-1, keepdims=True)
            tags = jnp.where(col_t == t, cur.astype(jnp.float32), tags)
        out_ref[...] = tags                                       # (B, T) float32

    return kernel


# ----------------------------------------------------------------------------
# Host-side parameter packing / folding
# ----------------------------------------------------------------------------
def _gate_slices(H2):
    # PyTorch LSTM row order (i, f, g, o) -> kernel gate-major order (i, f, o, g)
    return (slice(0, H2), slice(H2, 2 * H2), slice(3 * H2, 4 * H2), slice(2 * H2, 3 * H2))


def pack_model(tbls, raw_blocks, o2t_w, o2t_b, crf_start, crf_end, crf_trans):
    n = len(raw_blocks)
    K = o2t_w.shape[0]
    H2s = [int(rb["w_hh_f"].shape[1]) for rb in raw_blocks]
    Vs = [int(t.shape[0]) for t in tbls]
    Hf = sum(H2s)
    Htot = 2 * Hf
    Vsum = sum(Vs)
    Vtot2 = 2 * Vsum
    hoff = [sum(H2s[:j]) for j in range(n)]
    voff = [sum(Vs[:j]) for j in range(n)]

    w_in = jnp.zeros((Vtot2, 4 * Htot), jnp.float32)   # embedding folded into input proj
    b_in = jnp.zeros((1, 4 * Htot), jnp.float32)
    whh = jnp.zeros((Htot, 4 * Htot), jnp.float32)     # block-diagonal recurrent weight
    wout_f = jnp.zeros((Hf, K), jnp.float32)           # h2out (fwd half) with outs2tag folded
    wout_b = jnp.zeros((Hf, K), jnp.float32)           # h2out (bwd half) with outs2tag folded
    bias_total = o2t_b.reshape(1, -1)
    o2t_wt = o2t_w.T                                   # (n*K, K)

    for j in range(n):
        tbl, rb, H2, V = tbls[j], raw_blocks[j], H2s[j], Vs[j]
        gsl = _gate_slices(H2)
        for d, (wih, whh_raw, b_raw) in enumerate(
                ((rb["w_ih_f"], rb["w_hh_f"], rb["b_f"]),
                 (rb["w_ih_b"], rb["w_hh_b"], rb["b_b"]))):
            P = tbl @ wih.T                            # (V, 4*H2): embedding @ W_ih^T
            Wt = whh_raw.T                             # (H2, 4*H2)
            r0 = d * Vsum + voff[j]                    # vocab rows (bwd region offset by Vsum)
            h0 = d * Hf + hoff[j]                      # hidden cols within each gate slab
            for s in range(4):
                c0 = s * Htot + h0
                w_in = w_in.at[r0:r0 + V, c0:c0 + H2].set(P[:, gsl[s]])
                b_in = b_in.at[0, c0:c0 + H2].set(b_raw[gsl[s]])
                whh = whh.at[h0:h0 + H2, c0:c0 + H2].set(Wt[:, gsl[s]])
        o2t_slice = o2t_wt[j * K:(j + 1) * K, :]       # (K, K)
        fold = rb["h2out_w"].T @ o2t_slice             # (2*H2, K)
        wout_f = wout_f.at[hoff[j]:hoff[j] + H2, :].set(fold[:H2])
        wout_b = wout_b.at[hoff[j]:hoff[j] + H2, :].set(fold[H2:])
        bias_total = bias_total + rb["h2out_b"].reshape(1, -1) @ o2t_slice

    packed = {
        "w_in": w_in.astype(jnp.bfloat16),
        "b_in": b_in,
        "whh": whh.astype(jnp.bfloat16),
        "wout_f": wout_f.astype(jnp.bfloat16),
        "wout_b": wout_b.astype(jnp.bfloat16),
        "bias": bias_total,
        "crf_start": crf_start,
        "crf_end": crf_end,
        "crf_trans_t": crf_trans.T,
    }
    layout = {"Vs": Vs, "H2s": H2s, "Hf": Hf, "Htot": Htot, "Vsum": Vsum,
              "Vtot2": Vtot2, "K": K,
              "voff_f": voff, "voff_b": [Vsum + v for v in voff]}
    return packed, layout


def build_forward(packed, layout, T, B):
    n = len(layout["Vs"])
    TB = T * B
    K, Hf, Htot, Vtot2 = layout["K"], layout["Hf"], layout["Htot"], layout["Vtot2"]
    voff_f, voff_b = layout["voff_f"], layout["voff_b"]

    kernel = _make_kernel(T=T, B=B, K=K, n_hot=2 * n, Vtot2=Vtot2, Hf=Hf, Htot=Htot)
    call = pl.pallas_call(
        kernel,
        out_shape=jax.ShapeDtypeStruct((B, T), jnp.float32),
        in_specs=[VMEM_SPEC] * 10,
        out_specs=VMEM_SPEC,
        scratch_shapes=[pltpu.VMEM((TB, 4 * Htot), jnp.float32),   # gate projections
                        pltpu.VMEM((TB, Hf), jnp.float32),         # h forward
                        pltpu.VMEM((TB, Hf), jnp.float32)],        # h backward
    )

    def forward(p, x_char, x_subs):
        xs = [x_char] + list(x_subs)
        # fwd id columns use time order; bwd columns are time-reversed and offset into the
        # second half of the folded vocab space (bakes the bwd time reversal into the ids).
        cols = [xs[j].reshape(TB) + voff_f[j] for j in range(n)]
        cols += [jnp.flip(xs[j], axis=0).reshape(TB) + voff_b[j] for j in range(n)]
        ids = jnp.stack(cols, axis=1).astype(jnp.int32)            # (TB, 2n)
        return call(ids, p["w_in"], p["b_in"], p["whh"], p["wout_f"], p["wout_b"],
                    p["bias"], p["crf_start"], p["crf_end"], p["crf_trans_t"])

    fwd = jax.jit(forward)
    return lambda x_char, x_subs: fwd(packed, x_char, x_subs)


# ----------------------------------------------------------------------------
# Parameter init (PyTorch-like raw params)
# ----------------------------------------------------------------------------
def init_raw_block(key, embed_dim, hidden_dim, tag_dim):
    H2 = hidden_dim // 2
    ks = jax.random.split(key, 10)
    s = float(1.0 / (H2 ** 0.5))

    def u(k, shape, lim):
        return jax.random.uniform(k, shape, jnp.float32, -lim, lim)

    so = float(1.0 / (hidden_dim ** 0.5))
    return {
        "w_ih_f": u(ks[0], (4 * H2, embed_dim), s),
        "w_hh_f": u(ks[1], (4 * H2, H2), s),
        "b_f": u(ks[2], (4 * H2,), s) + u(ks[3], (4 * H2,), s),   # b_ih + b_hh
        "w_ih_b": u(ks[4], (4 * H2, embed_dim), s),
        "w_hh_b": u(ks[5], (4 * H2, H2), s),
        "b_b": u(ks[6], (4 * H2,), s) + u(ks[7], (4 * H2,), s),
        "h2out_w": u(ks[8], (tag_dim, hidden_dim), so),
        "h2out_b": u(ks[9], (tag_dim,), so),
    }


# ----------------------------------------------------------------------------
if __name__ == "__main__":
    key = jax.random.PRNGKey(0)
    T, B = 8, 2
    char_vocab, char_embed, char_hidden = 20, 16, 32
    sub_vocab_dims = [24, 30]
    sub_embed_dims = [16, 16]
    sub_hidden_dims = [32, 16]
    tag_dim = 8

    keys = jax.random.split(key, 16)
    embed_char = jax.random.normal(keys[0], (char_vocab, char_embed), jnp.float32)
    embed_subs = []
    for i, (v, e) in enumerate(zip(sub_vocab_dims, sub_embed_dims)):
        tbl = jax.random.normal(keys[1 + i], (v, e), jnp.float32)
        # nn.Embedding(vocab_dim, embed_dim, tag_dim) -> padding_idx=tag_dim (row zeroed)
        tbl = tbl.at[tag_dim].set(0.0)
        embed_subs.append(tbl)

    # outs2tag Linear (folded into each block's h2out by pack_model)
    n_cat = tag_dim * (1 + len(sub_hidden_dims))
    so = float(1.0 / (n_cat ** 0.5))
    w_o2t = jax.random.uniform(keys[8], (tag_dim, n_cat), jnp.float32, -so, so)
    b_o2t = jax.random.uniform(keys[9], (tag_dim,), jnp.float32, -so, so)

    raw_char = init_raw_block(keys[4], char_embed, char_hidden, tag_dim)
    raw_subs = [init_raw_block(keys[5 + i], e, h, tag_dim)
                for i, (e, h) in enumerate(zip(sub_embed_dims, sub_hidden_dims))]

    crf_trans = jax.random.uniform(keys[10], (tag_dim, tag_dim), jnp.float32, -0.1, 0.1)
    crf_start = jax.random.uniform(keys[11], (1, tag_dim), jnp.float32, -0.1, 0.1)
    crf_end = jax.random.uniform(keys[12], (1, tag_dim), jnp.float32, -0.1, 0.1)

    packed, layout = pack_model([embed_char] + embed_subs, [raw_char] + raw_subs,
                                w_o2t, b_o2t, crf_start, crf_end, crf_trans)
    forward = build_forward(packed, layout, T, B)

    x_char = jax.random.randint(keys[13], (T, B), 0, char_vocab, dtype=jnp.int32)
    x_subs = [jax.random.randint(keys[14 + i], (T, B), 0, v, dtype=jnp.int32)
              for i, v in enumerate(sub_vocab_dims)]

    out = forward(x_char, x_subs)
    out = jax.block_until_ready(out)
    assert out.shape == (B, T) and out.dtype == jnp.float32, (out.shape, out.dtype)
    print("KERNEL_OK")
</pallas_src>

<mosaic_0001>
module attributes {stable_mosaic.version = 11 : i64} {
  func.func @kernel(%arg0: memref<16x6xi32, #tpu.memory_space<vmem>>, %arg1: memref<148x320xbf16, #tpu.memory_space<vmem>>, %arg2: memref<1x320xf32, #tpu.memory_space<vmem>>, %arg3: memref<80x320xbf16, #tpu.memory_space<vmem>>, %arg4: memref<40x8xbf16, #tpu.memory_space<vmem>>, %arg5: memref<40x8xbf16, #tpu.memory_space<vmem>>, %arg6: memref<1x8xf32, #tpu.memory_space<vmem>>, %arg7: memref<1x8xf32, #tpu.memory_space<vmem>>, %arg8: memref<1x8xf32, #tpu.memory_space<vmem>>, %arg9: memref<8x8xf32, #tpu.memory_space<vmem>>, %arg10: memref<2x8xf32, #tpu.memory_space<vmem>>, %arg11: memref<16x320xf32, #tpu.memory_space<vmem>>, %arg12: memref<16x40xf32, #tpu.memory_space<vmem>>, %arg13: memref<16x40xf32, #tpu.memory_space<vmem>>) attributes {dimension_semantics = [], scalar_prefetch = 0 : i64, scratch_operands = 3 : i64, tpu.core_type = #tpu.core_type<tc>} {
    %c0 = arith.constant 0 : index
    %c0_0 = arith.constant 0 : index
    %0 = vector.load %arg0[%c0, %c0_0] : memref<16x6xi32, #tpu.memory_space<vmem>>, vector<16x6xi32>
    %1 = tpu.iota {dimensions = array<i32: 1>} : vector<16x148xi32>
    %2 = vector.extract_strided_slice %0 {offsets = [0, 0], sizes = [16, 1], strides = [1, 1]} : vector<16x6xi32> to vector<16x1xi32>
    %3 = vector.broadcast %2 : vector<16x1xi32> to vector<16x148xi32>
    %4 = arith.cmpi eq, %1, %3 : vector<16x148xi32>
    %5 = vector.extract_strided_slice %0 {offsets = [0, 1], sizes = [16, 1], strides = [1, 1]} : vector<16x6xi32> to vector<16x1xi32>
    %6 = vector.broadcast %5 : vector<16x1xi32> to vector<16x148xi32>
    %7 = arith.cmpi eq, %1, %6 : vector<16x148xi32>
    %8 = arith.ori %4, %7 : vector<16x148xi1>
    %9 = vector.extract_strided_slice %0 {offsets = [0, 2], sizes = [16, 1], strides = [1, 1]} : vector<16x6xi32> to vector<16x1xi32>
    %10 = vector.broadcast %9 : vector<16x1xi32> to vector<16x148xi32>
    %11 = arith.cmpi eq, %1, %10 : vector<16x148xi32>
    %12 = arith.ori %8, %11 : vector<16x148xi1>
    %13 = vector.extract_strided_slice %0 {offsets = [0, 3], sizes = [16, 1], strides = [1, 1]} : vector<16x6xi32> to vector<16x1xi32>
    %14 = vector.broadcast %13 : vector<16x1xi32> to vector<16x148xi32>
    %15 = arith.cmpi eq, %1, %14 : vector<16x148xi32>
    %16 = arith.ori %12, %15 : vector<16x148xi1>
    %17 = vector.extract_strided_slice %0 {offsets = [0, 4], sizes = [16, 1], strides = [1, 1]} : vector<16x6xi32> to vector<16x1xi32>
    %18 = vector.broadcast %17 : vector<16x1xi32> to vector<16x148xi32>
    %19 = arith.cmpi eq, %1, %18 : vector<16x148xi32>
    %20 = arith.ori %16, %19 : vector<16x148xi1>
    %21 = vector.extract_strided_slice %0 {offsets = [0, 5], sizes = [16, 1], strides = [1, 1]} : vector<16x6xi32> to vector<16x1xi32>
    %22 = vector.broadcast %21 : vector<16x1xi32> to vector<16x148xi32>
    %23 = arith.cmpi eq, %1, %22 : vector<16x148xi32>
    %24 = arith.ori %20, %23 : vector<16x148xi1>
    %25 = arith.extui %24 : vector<16x148xi1> to vector<16x148xi32>
    %26 = arith.sitofp %25 : vector<16x148xi32> to vector<16x148xf32>
    %27 = arith.truncf %26 : vector<16x148xf32> to vector<16x148xbf16>
    %c0_1 = arith.constant 0 : index
    %c0_2 = arith.constant 0 : index
    %28 = vector.load %arg1[%c0_1, %c0_2] : memref<148x320xbf16, #tpu.memory_space<vmem>>, vector<148x320xbf16>
    %cst = arith.constant dense<0.000000e+00> : vector<16x320xf32>
    %29 = tpu.matmul %27, %28, %cst {dimension_numbers = #tpu.dot_dimension_numbers<[1], [0], [0], [1], [0, 0, 1, 1], [], []>} : vector<16x148xbf16>, vector<148x320xbf16>, vector<16x320xf32> -> vector<16x320xf32>
    %c0_3 = arith.constant 0 : index
    %c0_4 = arith.constant 0 : index
    %30 = vector.load %arg2[%c0_3, %c0_4] : memref<1x320xf32, #tpu.memory_space<vmem>>, vector<1x320xf32>
    %31 = vector.broadcast %30 : vector<1x320xf32> to vector<16x320xf32>
    %32 = arith.addf %29, %31 : vector<16x320xf32>
    %c0_5 = arith.constant 0 : index
    %c0_6 = arith.constant 0 : index
    %33 = vector.load %arg11[%c0_5, %c0_6] : memref<16x320xf32, #tpu.memory_space<vmem>>, vector<16x320xf32>
    tpu.vector_store %arg11[%c0_5, %c0_6], %32 {strides = array<i32>} : memref<16x320xf32, #tpu.memory_space<vmem>>, vector<16x320xf32>,
    %c0_7 = arith.constant 0 : index
    %c0_8 = arith.constant 0 : index
    %34 = vector.load %arg3[%c0_7, %c0_8] : memref<80x320xbf16, #tpu.memory_space<vmem>>, vector<80x320xbf16>
    %cst_9 = arith.constant 0.000000e+00 : f32
    %35 = vector.broadcast %cst_9 : f32 to vector<2x80xf32>
    %cst_10 = arith.constant 0.000000e+00 : f32
    %36 = vector.broadcast %cst_10 : f32 to vector<2x80xf32>
    %37 = arith.truncf %35 : vector<2x80xf32> to vector<2x80xbf16>
    %cst_11 = arith.constant dense<0.000000e+00> : vector<2x320xf32>
    %38 = tpu.matmul %37, %34, %cst_11 {dimension_numbers = #tpu.dot_dimension_numbers<[1], [0], [0], [1], [0, 0, 1, 1], [], []>} : vector<2x80xbf16>, vector<80x320xbf16>, vector<2x320xf32> -> vector<2x320xf32>
    %c0_12 = arith.constant 0 : index
    %c0_13 = arith.constant 0 : index
    %39 = vector.load %arg11[%c0_12, %c0_13] : memref<16x320xf32, #tpu.memory_space<vmem>>, vector<2x320xf32>
    %40 = arith.addf %39, %38 : vector<2x320xf32>
    %41 = vector.extract_strided_slice %40 {offsets = [0, 0], sizes = [2, 240], strides = [1, 1]} : vector<2x320xf32> to vector<2x240xf32>
    %42 = arith.negf %41 : vector<2x240xf32>
    %43 = math.exp %42 : vector<2x240xf32>
    %cst_14 = arith.constant 1.000000e+00 : f32
    %44 = vector.broadcast %cst_14 : f32 to vector<2x240xf32>
    %45 = arith.addf %44, %43 : vector<2x240xf32>
    %46 = arith.divf %44, %45 : vector<2x240xf32>
    %47 = vector.extract_strided_slice %40 {offsets = [0, 240], sizes = [2, 80], strides = [1, 1]} : vector<2x320xf32> to vector<2x80xf32>
    %48 = math.tanh %47 : vector<2x80xf32>
    %49 = vector.extract_strided_slice %46 {offsets = [0, 80], sizes = [2, 80], strides = [1, 1]} : vector<2x240xf32> to vector<2x80xf32>
    %50 = arith.mulf %49, %36 : vector<2x80xf32>
    %51 = vector.extract_strided_slice %46 {offsets = [0, 0], sizes = [2, 80], strides = [1, 1]} : vector<2x240xf32> to vector<2x80xf32>
    %52 = arith.mulf %51, %48 : vector<2x80xf32>
    %53 = arith.addf %50, %52 : vector<2x80xf32>
    %54 = vector.extract_strided_slice %46 {offsets = [0, 160], sizes = [2, 80], strides = [1, 1]} : vector<2x240xf32> to vector<2x80xf32>
    %55 = math.tanh %53 : vector<2x80xf32>
    %56 = arith.mulf %54, %55 : vector<2x80xf32>
    %57 = vector.extract_strided_slice %56 {offsets = [0, 0], sizes = [2, 40], strides = [1, 1]} : vector<2x80xf32> to vector<2x40xf32>
    %c0_15 = arith.constant 0 : index
    %c0_16 = arith.constant 0 : index
    %58 = vector.load %arg12[%c0_15, %c0_16] : memref<16x40xf32, #tpu.memory_space<vmem>>, vector<2x40xf32>
    tpu.vector_store %arg12[%c0_15, %c0_16], %57 {strides = array<i32>} : memref<16x40xf32, #tpu.memory_space<vmem>>, vector<2x40xf32>,
    %59 = vector.extract_strided_slice %56 {offsets = [0, 40], sizes = [2, 40], strides = [1, 1]} : vector<2x80xf32> to vector<2x40xf32>
    %c14 = arith.constant 14 : index
    %c0_17 = arith.constant 0 : index
    %60 = vector.load %arg13[%c14, %c0_17] : memref<16x40xf32, #tpu.memory_space<vmem>>, vector<2x40xf32>
    tpu.vector_store %arg13[%c14, %c0_17], %59 {strides = array<i32>} : memref<16x40xf32, #tpu.memory_space<vmem>>, vector<2x40xf32>,
    %61 = arith.truncf %56 : vector<2x80xf32> to vector<2x80xbf16>
    %cst_18 = arith.constant dense<0.000000e+00> : vector<2x320xf32>
    %62 = tpu.matmul %61, %34, %cst_18 {dimension_numbers = #tpu.dot_dimension_numbers<[1], [0], [0], [1], [0, 0, 1, 1], [], []>} : vector<2x80xbf16>, vector<80x320xbf16>, vector<2x320xf32> -> vector<2x320xf32>
    %c2 = arith.constant 2 : index
    %c0_19 = arith.constant 0 : index
    %63 = vector.load %arg11[%c2, %c0_19] : memref<16x320xf32, #tpu.memory_space<vmem>>, vector<2x320xf32>
    %64 = arith.addf %63, %62 : vector<2x320xf32>
    %65 = vector.extract_strided_slice %64 {offsets = [0, 0], sizes = [2, 240], strides = [1, 1]} : vector<2x320xf32> to vector<2x240xf32>
    %66 = arith.negf %65 : vector<2x240xf32>
    %67 = math.exp %66 : vector<2x240xf32>
    %cst_20 = arith.constant 1.000000e+00 : f32
    %68 = vector.broadcast %cst_20 : f32 to vector<2x240xf32>
    %69 = arith.addf %68, %67 : vector<2x240xf32>
    %70 = arith.divf %68, %69 : vector<2x240xf32>
    %71 = vector.extract_strided_slice %64 {offsets = [0, 240], sizes = [2, 80], strides = [1, 1]} : vector<2x320xf32> to vector<2x80xf32>
    %72 = math.tanh %71 : vector<2x80xf32>
    %73 = vector.extract_strided_slice %70 {offsets = [0, 80], sizes = [2, 80], strides = [1, 1]} : vector<2x240xf32> to vector<2x80xf32>
    %74 = arith.mulf %73, %53 : vector<2x80xf32>
    %75 = vector.extract_strided_slice %70 {offsets = [0, 0], sizes = [2, 80], strides = [1, 1]} : vector<2x240xf32> to vector<2x80xf32>
    %76 = arith.mulf %75, %72 : vector<2x80xf32>
    %77 = arith.addf %74, %76 : vector<2x80xf32>
    %78 = vector.extract_strided_slice %70 {offsets = [0, 160], sizes = [2, 80], strides = [1, 1]} : vector<2x240xf32> to vector<2x80xf32>
    %79 = math.tanh %77 : vector<2x80xf32>
    %80 = arith.mulf %78, %79 : vector<2x80xf32>
    %81 = vector.extract_strided_slice %80 {offsets = [0, 0], sizes = [2, 40], strides = [1, 1]} : vector<2x80xf32> to vector<2x40xf32>
    %c2_21 = arith.constant 2 : index
    %c0_22 = arith.constant 0 : index
    %82 = vector.load %arg12[%c2_21, %c0_22] : memref<16x40xf32, #tpu.memory_space<vmem>>, vector<2x40xf32>
    tpu.vector_store %arg12[%c2_21, %c0_22], %81 {strides = array<i32>} : memref<16x40xf32, #tpu.memory_space<vmem>>, vector<2x40xf32>,
    %83 = vector.extract_strided_slice %80 {offsets = [0, 40], sizes = [2, 40], strides = [1, 1]} : vector<2x80xf32> to vector<2x40xf32>
    %c12 = arith.constant 12 : index
    %c0_23 = arith.constant 0 : index
    %84 = vector.load %arg13[%c12, %c0_23] : memref<16x40xf32, #tpu.memory_space<vmem>>, vector<2x40xf32>
    tpu.vector_store %arg13[%c12, %c0_23], %83 {strides = array<i32>} : memref<16x40xf32, #tpu.memory_space<vmem>>, vector<2x40xf32>,
    %85 = arith.truncf %80 : vector<2x80xf32> to vector<2x80xbf16>
    %cst_24 = arith.constant dense<0.000000e+00> : vector<2x320xf32>
    %86 = tpu.matmul %85, %34, %cst_24 {dimension_numbers = #tpu.dot_dimension_numbers<[1], [0], [0], [1], [0, 0, 1, 1], [], []>} : vector<2x80xbf16>, vector<80x320xbf16>, vector<2x320xf32> -> vector<2x320xf32>
    %c4 = arith.constant 4 : index
    %c0_25 = arith.constant 0 : index
    %87 = vector.load %arg11[%c4, %c0_25] : memref<16x320xf32, #tpu.memory_space<vmem>>, vector<2x320xf32>
    %88 = arith.addf %87, %86 : vector<2x320xf32>
    %89 = vector.extract_strided_slice %88 {offsets = [0, 0], sizes = [2, 240], strides = [1, 1]} : vector<2x320xf32> to vector<2x240xf32>
    %90 = arith.negf %89 : vector<2x240xf32>
    %91 = math.exp %90 : vector<2x240xf32>
    %cst_26 = arith.constant 1.000000e+00 : f32
    %92 = vector.broadcast %cst_26 : f32 to vector<2x240xf32>
    %93 = arith.addf %92, %91 : vector<2x240xf32>
    %94 = arith.divf %92, %93 : vector<2x240xf32>
    %95 = vector.extract_strided_slice %88 {offsets = [0, 240], sizes = [2, 80], strides = [1, 1]} : vector<2x320xf32> to vector<2x80xf32>
    %96 = math.tanh %95 : vector<2x80xf32>
    %97 = vector.extract_strided_slice %94 {offsets = [0, 80], sizes = [2, 80], strides = [1, 1]} : vector<2x240xf32> to vector<2x80xf32>
    %98 = arith.mulf %97, %77 : vector<2x80xf32>
    %99 = vector.extract_strided_slice %94 {offsets = [0, 0], sizes = [2, 80], strides = [1, 1]} : vector<2x240xf32> to vector<2x80xf32>
    %100 = arith.mulf %99, %96 : vector<2x80xf32>
    %101 = arith.addf %98, %100 : vector<2x80xf32>
    %102 = vector.extract_strided_slice %94 {offsets = [0, 160], sizes = [2, 80], strides = [1, 1]} : vector<2x240xf32> to vector<2x80xf32>
    %103 = math.tanh %101 : vector<2x80xf32>
    %104 = arith.mulf %102, %103 : vector<2x80xf32>
    %105 = vector.extract_strided_slice %104 {offsets = [0, 0], sizes = [2, 40], strides = [1, 1]} : vector<2x80xf32> to vector<2x40xf32>
    %c4_27 = arith.constant 4 : index
    %c0_28 = arith.constant 0 : index
    %106 = vector.load %arg12[%c4_27, %c0_28] : memref<16x40xf32, #tpu.memory_space<vmem>>, vector<2x40xf32>
    tpu.vector_store %arg12[%c4_27, %c0_28], %105 {strides = array<i32>} : memref<16x40xf32, #tpu.memory_space<vmem>>, vector<2x40xf32>,
    %107 = vector.extract_strided_slice %104 {offsets = [0, 40], sizes = [2, 40], strides = [1, 1]} : vector<2x80xf32> to vector<2x40xf32>
    %c10 = arith.constant 10 : index
    %c0_29 = arith.constant 0 : index
    %108 = vector.load %arg13[%c10, %c0_29] : memref<16x40xf32, #tpu.memory_space<vmem>>, vector<2x40xf32>
    tpu.vector_store %arg13[%c10, %c0_29], %107 {strides = array<i32>} : memref<16x40xf32, #tpu.memory_space<vmem>>, vector<2x40xf32>,
    %109 = arith.truncf %104 : vector<2x80xf32> to vector<2x80xbf16>
    %cst_30 = arith.constant dense<0.000000e+00> : vector<2x320xf32>
    %110 = tpu.matmul %109, %34, %cst_30 {dimension_numbers = #tpu.dot_dimension_numbers<[1], [0], [0], [1], [0, 0, 1, 1], [], []>} : vector<2x80xbf16>, vector<80x320xbf16>, vector<2x320xf32> -> vector<2x320xf32>
    %c6 = arith.constant 6 : index
    %c0_31 = arith.constant 0 : index
    %111 = vector.load %arg11[%c6, %c0_31] : memref<16x320xf32, #tpu.memory_space<vmem>>, vector<2x320xf32>
    %112 = arith.addf %111, %110 : vector<2x320xf32>
    %113 = vector.extract_strided_slice %112 {offsets = [0, 0], sizes = [2, 240], strides = [1, 1]} : vector<2x320xf32> to vector<2x240xf32>
    %114 = arith.negf %113 : vector<2x240xf32>
    %115 = math.exp %114 : vector<2x240xf32>
    %cst_32 = arith.constant 1.000000e+00 : f32
    %116 = vector.broadcast %cst_32 : f32 to vector<2x240xf32>
    %117 = arith.addf %116, %115 : vector<2x240xf32>
    %118 = arith.divf %116, %117 : vector<2x240xf32>
    %119 = vector.extract_strided_slice %112 {offsets = [0, 240], sizes = [2, 80], strides = [1, 1]} : vector<2x320xf32> to vector<2x80xf32>
    %120 = math.tanh %119 : vector<2x80xf32>
    %121 = vector.extract_strided_slice %118 {offsets = [0, 80], sizes = [2, 80], strides = [1, 1]} : vector<2x240xf32> to vector<2x80xf32>
    %122 = arith.mulf %121, %101 : vector<2x80xf32>
    %123 = vector.extract_strided_slice %118 {offsets = [0, 0], sizes = [2, 80], strides = [1, 1]} : vector<2x240xf32> to vector<2x80xf32>
    %124 = arith.mulf %123, %120 : vector<2x80xf32>
    %125 = arith.addf %122, %124 : vector<2x80xf32>
    %126 = vector.extract_strided_slice %118 {offsets = [0, 160], sizes = [2, 80], strides = [1, 1]} : vector<2x240xf32> to vector<2x80xf32>
    %127 = math.tanh %125 : vector<2x80xf32>
    %128 = arith.mulf %126, %127 : vector<2x80xf32>
    %129 = vector.extract_strided_slice %128 {offsets = [0, 0], sizes = [2, 40], strides = [1, 1]} : vector<2x80xf32> to vector<2x40xf32>
    %c6_33 = arith.constant 6 : index
    %c0_34 = arith.constant 0 : index
    %130 = vector.load %arg12[%c6_33, %c0_34] : memref<16x40xf32, #tpu.memory_space<vmem>>, vector<2x40xf32>
    tpu.vector_store %arg12[%c6_33, %c0_34], %129 {strides = array<i32>} : memref<16x40xf32, #tpu.memory_space<vmem>>, vector<2x40xf32>,
    %131 = vector.extract_strided_slice %128 {offsets = [0, 40], sizes = [2, 40], strides = [1, 1]} : vector<2x80xf32> to vector<2x40xf32>
    %c8 = arith.constant 8 : index
    %c0_35 = arith.constant 0 : index
    %132 = vector.load %arg13[%c8, %c0_35] : memref<16x40xf32, #tpu.memory_space<vmem>>, vector<2x40xf32>
    tpu.vector_store %arg13[%c8, %c0_35], %131 {strides = array<i32>} : memref<16x40xf32, #tpu.memory_space<vmem>>, vector<2x40xf32>,
    %133 = arith.truncf %128 : vector<2x80xf32> to vector<2x80xbf16>
    %cst_36 = arith.constant dense<0.000000e+00> : vector<2x320xf32>
    %134 = tpu.matmul %133, %34, %cst_36 {dimension_numbers = #tpu.dot_dimension_numbers<[1], [0], [0], [1], [0, 0, 1, 1], [], []>} : vector<2x80xbf16>, vector<80x320xbf16>, vector<2x320xf32> -> vector<2x320xf32>
    %c8_37 = arith.constant 8 : index
    %c0_38 = arith.constant 0 : index
    %135 = vector.load %arg11[%c8_37, %c0_38] : memref<16x320xf32, #tpu.memory_space<vmem>>, vector<2x320xf32>
    %136 = arith.addf %135, %134 : vector<2x320xf32>
    %137 = vector.extract_strided_slice %136 {offsets = [0, 0], sizes = [2, 240], strides = [1, 1]} : vector<2x320xf32> to vector<2x240xf32>
    %138 = arith.negf %137 : vector<2x240xf32>
    %139 = math.exp %138 : vector<2x240xf32>
    %cst_39 = arith.constant 1.000000e+00 : f32
    %140 = vector.broadcast %cst_39 : f32 to vector<2x240xf32>
    %141 = arith.addf %140, %139 : vector<2x240xf32>
    %142 = arith.divf %140, %141 : vector<2x240xf32>
    %143 = vector.extract_strided_slice %136 {offsets = [0, 240], sizes = [2, 80], strides = [1, 1]} : vector<2x320xf32> to vector<2x80xf32>
    %144 = math.tanh %143 : vector<2x80xf32>
    %145 = vector.extract_strided_slice %142 {offsets = [0, 80], sizes = [2, 80], strides = [1, 1]} : vector<2x240xf32> to vector<2x80xf32>
    %146 = arith.mulf %145, %125 : vector<2x80xf32>
    %147 = vector.extract_strided_slice %142 {offsets = [0, 0], sizes = [2, 80], strides = [1, 1]} : vector<2x240xf32> to vector<2x80xf32>
    %148 = arith.mulf %147, %144 : vector<2x80xf32>
    %149 = arith.addf %146, %148 : vector<2x80xf32>
    %150 = vector.extract_strided_slice %142 {offsets = [0, 160], sizes = [2, 80], strides = [1, 1]} : vector<2x240xf32> to vector<2x80xf32>
    %151 = math.tanh %149 : vector<2x80xf32>
    %152 = arith.mulf %150, %151 : vector<2x80xf32>
    %153 = vector.extract_strided_slice %152 {offsets = [0, 0], sizes = [2, 40], strides = [1, 1]} : vector<2x80xf32> to vector<2x40xf32>
    %c8_40 = arith.constant 8 : index
    %c0_41 = arith.constant 0 : index
    %154 = vector.load %arg12[%c8_40, %c0_41] : memref<16x40xf32, #tpu.memory_space<vmem>>, vector<2x40xf32>
    tpu.vector_store %arg12[%c8_40, %c0_41], %153 {strides = array<i32>} : memref<16x40xf32, #tpu.memory_space<vmem>>, vector<2x40xf32>,
    %155 = vector.extract_strided_slice %152 {offsets = [0, 40], sizes = [2, 40], strides = [1, 1]} : vector<2x80xf32> to vector<2x40xf32>
    %c6_42 = arith.constant 6 : index
    %c0_43 = arith.constant 0 : index
    %156 = vector.load %arg13[%c6_42, %c0_43] : memref<16x40xf32, #tpu.memory_space<vmem>>, vector<2x40xf32>
    tpu.vector_store %arg13[%c6_42, %c0_43], %155 {strides = array<i32>} : memref<16x40xf32, #tpu.memory_space<vmem>>, vector<2x40xf32>,
    %157 = arith.truncf %152 : vector<2x80xf32> to vector<2x80xbf16>
    %cst_44 = arith.constant dense<0.000000e+00> : vector<2x320xf32>
    %158 = tpu.matmul %157, %34, %cst_44 {dimension_numbers = #tpu.dot_dimension_numbers<[1], [0], [0], [1], [0, 0, 1, 1], [], []>} : vector<2x80xbf16>, vector<80x320xbf16>, vector<2x320xf32> -> vector<2x320xf32>
    %c10_45 = arith.constant 10 : index
    %c0_46 = arith.constant 0 : index
    %159 = vector.load %arg11[%c10_45, %c0_46] : memref<16x320xf32, #tpu.memory_space<vmem>>, vector<2x320xf32>
    %160 = arith.addf %159, %158 : vector<2x320xf32>
    %161 = vector.extract_strided_slice %160 {offsets = [0, 0], sizes = [2, 240], strides = [1, 1]} : vector<2x320xf32> to vector<2x240xf32>
    %162 = arith.negf %161 : vector<2x240xf32>
    %163 = math.exp %162 : vector<2x240xf32>
    %cst_47 = arith.constant 1.000000e+00 : f32
    %164 = vector.broadcast %cst_47 : f32 to vector<2x240xf32>
    %165 = arith.addf %164, %163 : vector<2x240xf32>
    %166 = arith.divf %164, %165 : vector<2x240xf32>
    %167 = vector.extract_strided_slice %160 {offsets = [0, 240], sizes = [2, 80], strides = [1, 1]} : vector<2x320xf32> to vector<2x80xf32>
    %168 = math.tanh %167 : vector<2x80xf32>
    %169 = vector.extract_strided_slice %166 {offsets = [0, 80], sizes = [2, 80], strides = [1, 1]} : vector<2x240xf32> to vector<2x80xf32>
    %170 = arith.mulf %169, %149 : vector<2x80xf32>
    %171 = vector.extract_strided_slice %166 {offsets = [0, 0], sizes = [2, 80], strides = [1, 1]} : vector<2x240xf32> to vector<2x80xf32>
    %172 = arith.mulf %171, %168 : vector<2x80xf32>
    %173 = arith.addf %170, %172 : vector<2x80xf32>
    %174 = vector.extract_strided_slice %166 {offsets = [0, 160], sizes = [2, 80], strides = [1, 1]} : vector<2x240xf32> to vector<2x80xf32>
    %175 = math.tanh %173 : vector<2x80xf32>
    %176 = arith.mulf %174, %175 : vector<2x80xf32>
    %177 = vector.extract_strided_slice %176 {offsets = [0, 0], sizes = [2, 40], strides = [1, 1]} : vector<2x80xf32> to vector<2x40xf32>
    %c10_48 = arith.constant 10 : index
    %c0_49 = arith.constant 0 : index
    %178 = vector.load %arg12[%c10_48, %c0_49] : memref<16x40xf32, #tpu.memory_space<vmem>>, vector<2x40xf32>
    tpu.vector_store %arg12[%c10_48, %c0_49], %177 {strides = array<i32>} : memref<16x40xf32, #tpu.memory_space<vmem>>, vector<2x40xf32>,
    %179 = vector.extract_strided_slice %176 {offsets = [0, 40], sizes = [2, 40], strides = [1, 1]} : vector<2x80xf32> to vector<2x40xf32>
    %c4_50 = arith.constant 4 : index
    %c0_51 = arith.constant 0 : index
    %180 = vector.load %arg13[%c4_50, %c0_51] : memref<16x40xf32, #tpu.memory_space<vmem>>, vector<2x40xf32>
    tpu.vector_store %arg13[%c4_50, %c0_51], %179 {strides = array<i32>} : memref<16x40xf32, #tpu.memory_space<vmem>>, vector<2x40xf32>,
    %181 = arith.truncf %176 : vector<2x80xf32> to vector<2x80xbf16>
    %cst_52 = arith.constant dense<0.000000e+00> : vector<2x320xf32>
    %182 = tpu.matmul %181, %34, %cst_52 {dimension_numbers = #tpu.dot_dimension_numbers<[1], [0], [0], [1], [0, 0, 1, 1], [], []>} : vector<2x80xbf16>, vector<80x320xbf16>, vector<2x320xf32> -> vector<2x320xf32>
    %c12_53 = arith.constant 12 : index
    %c0_54 = arith.constant 0 : index
    %183 = vector.load %arg11[%c12_53, %c0_54] : memref<16x320xf32, #tpu.memory_space<vmem>>, vector<2x320xf32>
    %184 = arith.addf %183, %182 : vector<2x320xf32>
    %185 = vector.extract_strided_slice %184 {offsets = [0, 0], sizes = [2, 240], strides = [1, 1]} : vector<2x320xf32> to vector<2x240xf32>
    %186 = arith.negf %185 : vector<2x240xf32>
    %187 = math.exp %186 : vector<2x240xf32>
    %cst_55 = arith.constant 1.000000e+00 : f32
    %188 = vector.broadcast %cst_55 : f32 to vector<2x240xf32>
    %189 = arith.addf %188, %187 : vector<2x240xf32>
    %190 = arith.divf %188, %189 : vector<2x240xf32>
    %191 = vector.extract_strided_slice %184 {offsets = [0, 240], sizes = [2, 80], strides = [1, 1]} : vector<2x320xf32> to vector<2x80xf32>
    %192 = math.tanh %191 : vector<2x80xf32>
    %193 = vector.extract_strided_slice %190 {offsets = [0, 80], sizes = [2, 80], strides = [1, 1]} : vector<2x240xf32> to vector<2x80xf32>
    %194 = arith.mulf %193, %173 : vector<2x80xf32>
    %195 = vector.extract_strided_slice %190 {offsets = [0, 0], sizes = [2, 80], strides = [1, 1]} : vector<2x240xf32> to vector<2x80xf32>
    %196 = arith.mulf %195, %192 : vector<2x80xf32>
    %197 = arith.addf %194, %196 : vector<2x80xf32>
    %198 = vector.extract_strided_slice %190 {offsets = [0, 160], sizes = [2, 80], strides = [1, 1]} : vector<2x240xf32> to vector<2x80xf32>
    %199 = math.tanh %197 : vector<2x80xf32>
    %200 = arith.mulf %198, %199 : vector<2x80xf32>
    %201 = vector.extract_strided_slice %200 {offsets = [0, 0], sizes = [2, 40], strides = [1, 1]} : vector<2x80xf32> to vector<2x40xf32>
    %c12_56 = arith.constant 12 : index
    %c0_57 = arith.constant 0 : index
    %202 = vector.load %arg12[%c12_56, %c0_57] : memref<16x40xf32, #tpu.memory_space<vmem>>, vector<2x40xf32>
    tpu.vector_store %arg12[%c12_56, %c0_57], %201 {strides = array<i32>} : memref<16x40xf32, #tpu.memory_space<vmem>>, vector<2x40xf32>,
    %203 = vector.extract_strided_slice %200 {offsets = [0, 40], sizes = [2, 40], strides = [1, 1]} : vector<2x80xf32> to vector<2x40xf32>
    %c2_58 = arith.constant 2 : index
    %c0_59 = arith.constant 0 : index
    %204 = vector.load %arg13[%c2_58, %c0_59] : memref<16x40xf32, #tpu.memory_space<vmem>>, vector<2x40xf32>
    tpu.vector_store %arg13[%c2_58, %c0_59], %203 {strides = array<i32>} : memref<16x40xf32, #tpu.memory_space<vmem>>, vector<2x40xf32>,
    %205 = arith.truncf %200 : vector<2x80xf32> to vector<2x80xbf16>
    %cst_60 = arith.constant dense<0.000000e+00> : vector<2x320xf32>
    %206 = tpu.matmul %205, %34, %cst_60 {dimension_numbers = #tpu.dot_dimension_numbers<[1], [0], [0], [1], [0, 0, 1, 1], [], []>} : vector<2x80xbf16>, vector<80x320xbf16>, vector<2x320xf32> -> vector<2x320xf32>
    %c14_61 = arith.constant 14 : index
    %c0_62 = arith.constant 0 : index
    %207 = vector.load %arg11[%c14_61, %c0_62] : memref<16x320xf32, #tpu.memory_space<vmem>>, vector<2x320xf32>
    %208 = arith.addf %207, %206 : vector<2x320xf32>
    %209 = vector.extract_strided_slice %208 {offsets = [0, 0], sizes = [2, 240], strides = [1, 1]} : vector<2x320xf32> to vector<2x240xf32>
    %210 = arith.negf %209 : vector<2x240xf32>
    %211 = math.exp %210 : vector<2x240xf32>
    %cst_63 = arith.constant 1.000000e+00 : f32
    %212 = vector.broadcast %cst_63 : f32 to vector<2x240xf32>
    %213 = arith.addf %212, %211 : vector<2x240xf32>
    %214 = arith.divf %212, %213 : vector<2x240xf32>
    %215 = vector.extract_strided_slice %208 {offsets = [0, 240], sizes = [2, 80], strides = [1, 1]} : vector<2x320xf32> to vector<2x80xf32>
    %216 = math.tanh %215 : vector<2x80xf32>
    %217 = vector.extract_strided_slice %214 {offsets = [0, 80], sizes = [2, 80], strides = [1, 1]} : vector<2x240xf32> to vector<2x80xf32>
    %218 = arith.mulf %217, %197 : vector<2x80xf32>
    %219 = vector.extract_strided_slice %214 {offsets = [0, 0], sizes = [2, 80], strides = [1, 1]} : vector<2x240xf32> to vector<2x80xf32>
    %220 = arith.mulf %219, %216 : vector<2x80xf32>
    %221 = arith.addf %218, %220 : vector<2x80xf32>
    %222 = vector.extract_strided_slice %214 {offsets = [0, 160], sizes = [2, 80], strides = [1, 1]} : vector<2x240xf32> to vector<2x80xf32>
    %223 = math.tanh %221 : vector<2x80xf32>
    %224 = arith.mulf %222, %223 : vector<2x80xf32>
    %225 = vector.extract_strided_slice %224 {offsets = [0, 0], sizes = [2, 40], strides = [1, 1]} : vector<2x80xf32> to vector<2x40xf32>
    %c14_64 = arith.constant 14 : index
    %c0_65 = arith.constant 0 : index
    %226 = vector.load %arg12[%c14_64, %c0_65] : memref<16x40xf32, #tpu.memory_space<vmem>>, vector<2x40xf32>
    tpu.vector_store %arg12[%c14_64, %c0_65], %225 {strides = array<i32>} : memref<16x40xf32, #tpu.memory_space<vmem>>, vector<2x40xf32>,
    %227 = vector.extract_strided_slice %224 {offsets = [0, 40], sizes = [2, 40], strides = [1, 1]} : vector<2x80xf32> to vector<2x40xf32>
    %c0_66 = arith.constant 0 : index
    %c0_67 = arith.constant 0 : index
    %228 = vector.load %arg13[%c0_66, %c0_67] : memref<16x40xf32, #tpu.memory_space<vmem>>, vector<2x40xf32>
    tpu.vector_store %arg13[%c0_66, %c0_67], %227 {strides = array<i32>} : memref<16x40xf32, #tpu.memory_space<vmem>>, vector<2x40xf32>,
    %c0_68 = arith.constant 0 : index
    %c0_69 = arith.constant 0 : index
    %229 = vector.load %arg12[%c0_68, %c0_69] : memref<16x40xf32, #tpu.memory_space<vmem>>, vector<16x40xf32>
    %230 = arith.truncf %229 : vector<16x40xf32> to vector<16x40xbf16>
    %c0_70 = arith.constant 0 : index
    %c0_71 = arith.constant 0 : index
    %231 = vector.load %arg4[%c0_70, %c0_71] : memref<40x8xbf16, #tpu.memory_space<vmem>>, vector<40x8xbf16>
    %cst_72 = arith.constant dense<0.000000e+00> : vector<16x8xf32>
    %232 = tpu.matmul %230, %231, %cst_72 {dimension_numbers = #tpu.dot_dimension_numbers<[1], [0], [0], [1], [0, 0, 1, 1], [], []>} : vector<16x40xbf16>, vector<40x8xbf16>, vector<16x8xf32> -> vector<16x8xf32>
    %c0_73 = arith.constant 0 : index
    %c0_74 = arith.constant 0 : index
    %233 = vector.load %arg13[%c0_73, %c0_74] : memref<16x40xf32, #tpu.memory_space<vmem>>, vector<16x40xf32>
    %234 = arith.truncf %233 : vector<16x40xf32> to vector<16x40xbf16>
    %c0_75 = arith.constant 0 : index
    %c0_76 = arith.constant 0 : index
    %235 = vector.load %arg5[%c0_75, %c0_76] : memref<40x8xbf16, #tpu.memory_space<vmem>>, vector<40x8xbf16>
    %cst_77 = arith.constant dense<0.000000e+00> : vector<16x8xf32>
    %236 = tpu.matmul %234, %235, %cst_77 {dimension_numbers = #tpu.dot_dimension_numbers<[1], [0], [0], [1], [0, 0, 1, 1], [], []>} : vector<16x40xbf16>, vector<40x8xbf16>, vector<16x8xf32> -> vector<16x8xf32>
    %237 = arith.addf %232, %236 : vector<16x8xf32>
    %c0_78 = arith.constant 0 : index
    %c0_79 = arith.constant 0 : index
    %238 = vector.load %arg6[%c0_78, %c0_79] : memref<1x8xf32, #tpu.memory_space<vmem>>, vector<1x8xf32>
    %239 = vector.broadcast %238 : vector<1x8xf32> to vector<16x8xf32>
    %240 = arith.addf %237, %239 : vector<16x8xf32>
    %c0_80 = arith.constant 0 : index
    %c0_81 = arith.constant 0 : index
    %241 = vector.load %arg9[%c0_80, %c0_81] : memref<8x8xf32, #tpu.memory_space<vmem>>, vector<8x8xf32>
    %242 = tpu.iota {dimensions = array<i32: 2>} : vector<2x8x8xi32>
    %c0_82 = arith.constant 0 : index
    %c0_83 = arith.constant 0 : index
    %243 = vector.load %arg7[%c0_82, %c0_83] : memref<1x8xf32, #tpu.memory_space<vmem>>, vector<1x8xf32>
    %244 = vector.extract_strided_slice %240 {offsets = [0, 0], sizes = [2, 8], strides = [1, 1]} : vector<16x8xf32> to vector<2x8xf32>
    %245 = vector.broadcast %243 : vector<1x8xf32> to vector<2x8xf32>
    %246 = arith.addf %245, %244 : vector<2x8xf32>
    %247 = vector.shape_cast %246 : vector<2x8xf32> to vector<2x1x8xf32>
    %248 = vector.shape_cast %241 : vector<8x8xf32> to vector<1x8x8xf32>
    %249 = vector.broadcast %247 : vector<2x1x8xf32> to vector<2x8x8xf32>
    %250 = vector.broadcast %248 : vector<1x8x8xf32> to vector<2x8x8xf32>
    %251 = arith.addf %249, %250 : vector<2x8x8xf32>
    %cst_84 = arith.constant dense<0xFF800000> : vector<2x8xf32>
    %252 = vector.multi_reduction <maximumf>, %251, %cst_84 [2] : vector<2x8x8xf32> to vector<2x8xf32>
    %253 = vector.shape_cast %252 : vector<2x8xf32> to vector<2x8x1xf32>
    %254 = vector.broadcast %253 : vector<2x8x1xf32> to vector<2x8x8xf32>
    %255 = arith.cmpf oeq, %251, %254 : vector<2x8x8xf32>
    %c8_i32 = arith.constant 8 : i32
    %256 = vector.broadcast %c8_i32 : i32 to vector<2x8x8xi32>
    %257 = arith.select %255, %242, %256 : vector<2x8x8xi1>, vector<2x8x8xi32>
    %cst_85 = arith.constant dense<2147483647> : vector<2x8xi32>
    %258 = vector.multi_reduction <minsi>, %257, %cst_85 [2] : vector<2x8x8xi32> to vector<2x8xi32>
    %259 = vector.extract_strided_slice %240 {offsets = [2, 0], sizes = [2, 8], strides = [1, 1]} : vector<16x8xf32> to vector<2x8xf32>
    %260 = arith.addf %252, %259 : vector<2x8xf32>
    %261 = vector.shape_cast %260 : vector<2x8xf32> to vector<2x1x8xf32>
    %262 = vector.shape_cast %241 : vector<8x8xf32> to vector<1x8x8xf32>
    %263 = vector.broadcast %261 : vector<2x1x8xf32> to vector<2x8x8xf32>
    %264 = vector.broadcast %262 : vector<1x8x8xf32> to vector<2x8x8xf32>
    %265 = arith.addf %263, %264 : vector<2x8x8xf32>
    %cst_86 = arith.constant dense<0xFF800000> : vector<2x8xf32>
    %266 = vector.multi_reduction <maximumf>, %265, %cst_86 [2] : vector<2x8x8xf32> to vector<2x8xf32>
    %267 = vector.shape_cast %266 : vector<2x8xf32> to vector<2x8x1xf32>
    %268 = vector.broadcast %267 : vector<2x8x1xf32> to vector<2x8x8xf32>
    %269 = arith.cmpf oeq, %265, %268 : vector<2x8x8xf32>
    %c8_i32_87 = arith.constant 8 : i32
    %270 = vector.broadcast %c8_i32_87 : i32 to vector<2x8x8xi32>
    %271 = arith.select %269, %242, %270 : vector<2x8x8xi1>, vector<2x8x8xi32>
    %cst_88 = arith.constant dense<2147483647> : vector<2x8xi32>
    %272 = vector.multi_reduction <minsi>, %271, %cst_88 [2] : vector<2x8x8xi32> to vector<2x8xi32>
    %273 = vector.extract_strided_slice %240 {offsets = [4, 0], sizes = [2, 8], strides = [1, 1]} : vector<16x8xf32> to vector<2x8xf32>
    %274 = arith.addf %266, %273 : vector<2x8xf32>
    %275 = vector.shape_cast %274 : vector<2x8xf32> to vector<2x1x8xf32>
    %276 = vector.shape_cast %241 : vector<8x8xf32> to vector<1x8x8xf32>
    %277 = vector.broadcast %275 : vector<2x1x8xf32> to vector<2x8x8xf32>
    %278 = vector.broadcast %276 : vector<1x8x8xf32> to vector<2x8x8xf32>
    %279 = arith.addf %277, %278 : vector<2x8x8xf32>
    %cst_89 = arith.constant dense<0xFF800000> : vector<2x8xf32>
    %280 = vector.multi_reduction <maximumf>, %279, %cst_89 [2] : vector<2x8x8xf32> to vector<2x8xf32>
    %281 = vector.shape_cast %280 : vector<2x8xf32> to vector<2x8x1xf32>
    %282 = vector.broadcast %281 : vector<2x8x1xf32> to vector<2x8x8xf32>
    %283 = arith.cmpf oeq, %279, %282 : vector<2x8x8xf32>
    %c8_i32_90 = arith.constant 8 : i32
    %284 = vector.broadcast %c8_i32_90 : i32 to vector<2x8x8xi32>
    %285 = arith.select %283, %242, %284 : vector<2x8x8xi1>, vector<2x8x8xi32>
    %cst_91 = arith.constant dense<2147483647> : vector<2x8xi32>
    %286 = vector.multi_reduction <minsi>, %285, %cst_91 [2] : vector<2x8x8xi32> to vector<2x8xi32>
    %287 = vector.extract_strided_slice %240 {offsets = [6, 0], sizes = [2, 8], strides = [1, 1]} : vector<16x8xf32> to vector<2x8xf32>
    %288 = arith.addf %280, %287 : vector<2x8xf32>
    %289 = vector.shape_cast %288 : vector<2x8xf32> to vector<2x1x8xf32>
    %290 = vector.shape_cast %241 : vector<8x8xf32> to vector<1x8x8xf32>
    %291 = vector.broadcast %289 : vector<2x1x8xf32> to vector<2x8x8xf32>
    %292 = vector.broadcast %290 : vector<1x8x8xf32> to vector<2x8x8xf32>
    %293 = arith.addf %291, %292 : vector<2x8x8xf32>
    %cst_92 = arith.constant dense<0xFF800000> : vector<2x8xf32>
    %294 = vector.multi_reduction <maximumf>, %293, %cst_92 [2] : vector<2x8x8xf32> to vector<2x8xf32>
    %295 = vector.shape_cast %294 : vector<2x8xf32> to vector<2x8x1xf32>
    %296 = vector.broadcast %295 : vector<2x8x1xf32> to vector<2x8x8xf32>
    %297 = arith.cmpf oeq, %293, %296 : vector<2x8x8xf32>
    %c8_i32_93 = arith.constant 8 : i32
    %298 = vector.broadcast %c8_i32_93 : i32 to vector<2x8x8xi32>
    %299 = arith.select %297, %242, %298 : vector<2x8x8xi1>, vector<2x8x8xi32>
    %cst_94 = arith.constant dense<2147483647> : vector<2x8xi32>
    %300 = vector.multi_reduction <minsi>, %299, %cst_94 [2] : vector<2x8x8xi32> to vector<2x8xi32>
    %301 = vector.extract_strided_slice %240 {offsets = [8, 0], sizes = [2, 8], strides = [1, 1]} : vector<16x8xf32> to vector<2x8xf32>
    %302 = arith.addf %294, %301 : vector<2x8xf32>
    %303 = vector.shape_cast %302 : vector<2x8xf32> to vector<2x1x8xf32>
    %304 = vector.shape_cast %241 : vector<8x8xf32> to vector<1x8x8xf32>
    %305 = vector.broadcast %303 : vector<2x1x8xf32> to vector<2x8x8xf32>
    %306 = vector.broadcast %304 : vector<1x8x8xf32> to vector<2x8x8xf32>
    %307 = arith.addf %305, %306 : vector<2x8x8xf32>
    %cst_95 = arith.constant dense<0xFF800000> : vector<2x8xf32>
    %308 = vector.multi_reduction <maximumf>, %307, %cst_95 [2] : vector<2x8x8xf32> to vector<2x8xf32>
    %309 = vector.shape_cast %308 : vector<2x8xf32> to vector<2x8x1xf32>
    %310 = vector.broadcast %309 : vector<2x8x1xf32> to vector<2x8x8xf32>
    %311 = arith.cmpf oeq, %307, %310 : vector<2x8x8xf32>
    %c8_i32_96 = arith.constant 8 : i32
    %312 = vector.broadcast %c8_i32_96 : i32 to vector<2x8x8xi32>
    %313 = arith.select %311, %242, %312 : vector<2x8x8xi1>, vector<2x8x8xi32>
    %cst_97 = arith.constant dense<2147483647> : vector<2x8xi32>
    %314 = vector.multi_reduction <minsi>, %313, %cst_97 [2] : vector<2x8x8xi32> to vector<2x8xi32>
    %315 = vector.extract_strided_slice %240 {offsets = [10, 0], sizes = [2, 8], strides = [1, 1]} : vector<16x8xf32> to vector<2x8xf32>
    %316 = arith.addf %308, %315 : vector<2x8xf32>
    %317 = vector.shape_cast %316 : vector<2x8xf32> to vector<2x1x8xf32>
    %318 = vector.shape_cast %241 : vector<8x8xf32> to vector<1x8x8xf32>
    %319 = vector.broadcast %317 : vector<2x1x8xf32> to vector<2x8x8xf32>
    %320 = vector.broadcast %318 : vector<1x8x8xf32> to vector<2x8x8xf32>
    %321 = arith.addf %319, %320 : vector<2x8x8xf32>
    %cst_98 = arith.constant dense<0xFF800000> : vector<2x8xf32>
    %322 = vector.multi_reduction <maximumf>, %321, %cst_98 [2] : vector<2x8x8xf32> to vector<2x8xf32>
    %323 = vector.shape_cast %322 : vector<2x8xf32> to vector<2x8x1xf32>
    %324 = vector.broadcast %323 : vector<2x8x1xf32> to vector<2x8x8xf32>
    %325 = arith.cmpf oeq, %321, %324 : vector<2x8x8xf32>
    %c8_i32_99 = arith.constant 8 : i32
    %326 = vector.broadcast %c8_i32_99 : i32 to vector<2x8x8xi32>
    %327 = arith.select %325, %242, %326 : vector<2x8x8xi1>, vector<2x8x8xi32>
    %cst_100 = arith.constant dense<2147483647> : vector<2x8xi32>
    %328 = vector.multi_reduction <minsi>, %327, %cst_100 [2] : vector<2x8x8xi32> to vector<2x8xi32>
    %329 = vector.extract_strided_slice %240 {offsets = [12, 0], sizes = [2, 8], strides = [1, 1]} : vector<16x8xf32> to vector<2x8xf32>
    %330 = arith.addf %322, %329 : vector<2x8xf32>
    %331 = vector.shape_cast %330 : vector<2x8xf32> to vector<2x1x8xf32>
    %332 = vector.shape_cast %241 : vector<8x8xf32> to vector<1x8x8xf32>
    %333 = vector.broadcast %331 : vector<2x1x8xf32> to vector<2x8x8xf32>
    %334 = vector.broadcast %332 : vector<1x8x8xf32> to vector<2x8x8xf32>
    %335 = arith.addf %333, %334 : vector<2x8x8xf32>
    %cst_101 = arith.constant dense<0xFF800000> : vector<2x8xf32>
    %336 = vector.multi_reduction <maximumf>, %335, %cst_101 [2] : vector<2x8x8xf32> to vector<2x8xf32>
    %337 = vector.shape_cast %336 : vector<2x8xf32> to vector<2x8x1xf32>
    %338 = vector.broadcast %337 : vector<2x8x1xf32> to vector<2x8x8xf32>
    %339 = arith.cmpf oeq, %335, %338 : vector<2x8x8xf32>
    %c8_i32_102 = arith.constant 8 : i32
    %340 = vector.broadcast %c8_i32_102 : i32 to vector<2x8x8xi32>
    %341 = arith.select %339, %242, %340 : vector<2x8x8xi1>, vector<2x8x8xi32>
    %cst_103 = arith.constant dense<2147483647> : vector<2x8xi32>
    %342 = vector.multi_reduction <minsi>, %341, %cst_103 [2] : vector<2x8x8xi32> to vector<2x8xi32>
    %343 = vector.extract_strided_slice %240 {offsets = [14, 0], sizes = [2, 8], strides = [1, 1]} : vector<16x8xf32> to vector<2x8xf32>
    %344 = arith.addf %336, %343 : vector<2x8xf32>
    %c0_104 = arith.constant 0 : index
    %c0_105 = arith.constant 0 : index
    %345 = vector.load %arg8[%c0_104, %c0_105] : memref<1x8xf32, #tpu.memory_space<vmem>>, vector<1x8xf32>
    %346 = vector.broadcast %345 : vector<1x8xf32> to vector<2x8xf32>
    %347 = arith.addf %344, %346 : vector<2x8xf32>
    %348 = tpu.iota {dimensions = array<i32: 1>} : vector<2x8xi32>
    %cst_106 = arith.constant dense<0xFF800000> : vector<2xf32>
    %349 = vector.multi_reduction <maximumf>, %347, %cst_106 [1] : vector<2x8xf32> to vector<2xf32>
    %350 = vector.shape_cast %349 : vector<2xf32> to vector<2x1xf32>
    %351 = vector.broadcast %350 : vector<2x1xf32> to vector<2x8xf32>
    %352 = arith.cmpf oeq, %347, %351 : vector<2x8xf32>
    %c8_i32_107 = arith.constant 8 : i32
    %353 = vector.broadcast %c8_i32_107 : i32 to vector<2x8xi32>
    %354 = arith.select %352, %348, %353 : vector<2x8xi1>, vector<2x8xi32>
    %cst_108 = arith.constant dense<2147483647> : vector<2xi32>
    %355 = vector.multi_reduction <minsi>, %354, %cst_108 [1] : vector<2x8xi32> to vector<2xi32>
    %356 = vector.shape_cast %355 : vector<2xi32> to vector<2x1xi32>
    %357 = tpu.iota {dimensions = array<i32: 1>} : vector<2x8xi32>
    %c7_i32 = arith.constant 7 : i32
    %358 = vector.broadcast %c7_i32 : i32 to vector<2x8xi32>
    %359 = arith.cmpi eq, %357, %358 : vector<2x8xi32>
    %360 = arith.sitofp %356 : vector<2x1xi32> to vector<2x1xf32>
    %cst_109 = arith.constant 0.000000e+00 : f32
    %361 = vector.broadcast %cst_109 : f32 to vector<2x8xf32>
    %362 = vector.shape_cast %360 : vector<2x1xf32> to vector<2x1xf32>
    %363 = vector.broadcast %362 : vector<2x1xf32> to vector<2x8xf32>
    %364 = arith.select %359, %363, %361 : vector<2x8xi1>, vector<2x8xf32>
    %365 = vector.broadcast %356 : vector<2x1xi32> to vector<2x8xi32>
    %366 = arith.cmpi eq, %348, %365 : vector<2x8xi32>
    %c0_i32 = arith.constant 0 : i32
    %367 = vector.broadcast %c0_i32 : i32 to vector<2x8xi32>
    %368 = arith.select %366, %342, %367 : vector<2x8xi1>, vector<2x8xi32>
    %cst_110 = arith.constant dense<0> : vector<2xi32>
    %369 = vector.multi_reduction <add>, %368, %cst_110 [1] : vector<2x8xi32> to vector<2xi32>
    %370 = vector.shape_cast %369 : vector<2xi32> to vector<2x1xi32>
    %c6_i32 = arith.constant 6 : i32
    %371 = vector.broadcast %c6_i32 : i32 to vector<2x8xi32>
    %372 = arith.cmpi eq, %357, %371 : vector<2x8xi32>
    %373 = arith.sitofp %370 : vector<2x1xi32> to vector<2x1xf32>
    %374 = vector.shape_cast %373 : vector<2x1xf32> to vector<2x1xf32>
    %375 = vector.broadcast %374 : vector<2x1xf32> to vector<2x8xf32>
    %376 = arith.select %372, %375, %364 : vector<2x8xi1>, vector<2x8xf32>
    %377 = vector.broadcast %370 : vector<2x1xi32> to vector<2x8xi32>
    %378 = arith.cmpi eq, %348, %377 : vector<2x8xi32>
    %c0_i32_111 = arith.constant 0 : i32
    %379 = vector.broadcast %c0_i32_111 : i32 to vector<2x8xi32>
    %380 = arith.select %378, %328, %379 : vector<2x8xi1>, vector<2x8xi32>
    %cst_112 = arith.constant dense<0> : vector<2xi32>
    %381 = vector.multi_reduction <add>, %380, %cst_112 [1] : vector<2x8xi32> to vector<2xi32>
    %382 = vector.shape_cast %381 : vector<2xi32> to vector<2x1xi32>
    %c5_i32 = arith.constant 5 : i32
    %383 = vector.broadcast %c5_i32 : i32 to vector<2x8xi32>
    %384 = arith.cmpi eq, %357, %383 : vector<2x8xi32>
    %385 = arith.sitofp %382 : vector<2x1xi32> to vector<2x1xf32>
    %386 = vector.shape_cast %385 : vector<2x1xf32> to vector<2x1xf32>
    %387 = vector.broadcast %386 : vector<2x1xf32> to vector<2x8xf32>
    %388 = arith.select %384, %387, %376 : vector<2x8xi1>, vector<2x8xf32>
    %389 = vector.broadcast %382 : vector<2x1xi32> to vector<2x8xi32>
    %390 = arith.cmpi eq, %348, %389 : vector<2x8xi32>
    %c0_i32_113 = arith.constant 0 : i32
    %391 = vector.broadcast %c0_i32_113 : i32 to vector<2x8xi32>
    %392 = arith.select %390, %314, %391 : vector<2x8xi1>, vector<2x8xi32>
    %cst_114 = arith.constant dense<0> : vector<2xi32>
    %393 = vector.multi_reduction <add>, %392, %cst_114 [1] : vector<2x8xi32> to vector<2xi32>
    %394 = vector.shape_cast %393 : vector<2xi32> to vector<2x1xi32>
    %c4_i32 = arith.constant 4 : i32
    %395 = vector.broadcast %c4_i32 : i32 to vector<2x8xi32>
    %396 = arith.cmpi eq, %357, %395 : vector<2x8xi32>
    %397 = arith.sitofp %394 : vector<2x1xi32> to vector<2x1xf32>
    %398 = vector.shape_cast %397 : vector<2x1xf32> to vector<2x1xf32>
    %399 = vector.broadcast %398 : vector<2x1xf32> to vector<2x8xf32>
    %400 = arith.select %396, %399, %388 : vector<2x8xi1>, vector<2x8xf32>
    %401 = vector.broadcast %394 : vector<2x1xi32> to vector<2x8xi32>
    %402 = arith.cmpi eq, %348, %401 : vector<2x8xi32>
    %c0_i32_115 = arith.constant 0 : i32
    %403 = vector.broadcast %c0_i32_115 : i32 to vector<2x8xi32>
    %404 = arith.select %402, %300, %403 : vector<2x8xi1>, vector<2x8xi32>
    %cst_116 = arith.constant dense<0> : vector<2xi32>
    %405 = vector.multi_reduction <add>, %404, %cst_116 [1] : vector<2x8xi32> to vector<2xi32>
    %406 = vector.shape_cast %405 : vector<2xi32> to vector<2x1xi32>
    %c3_i32 = arith.constant 3 : i32
    %407 = vector.broadcast %c3_i32 : i32 to vector<2x8xi32>
    %408 = arith.cmpi eq, %357, %407 : vector<2x8xi32>
    %409 = arith.sitofp %406 : vector<2x1xi32> to vector<2x1xf32>
    %410 = vector.shape_cast %409 : vector<2x1xf32> to vector<2x1xf32>
    %411 = vector.broadcast %410 : vector<2x1xf32> to vector<2x8xf32>
    %412 = arith.select %408, %411, %400 : vector<2x8xi1>, vector<2x8xf32>
    %413 = vector.broadcast %406 : vector<2x1xi32> to vector<2x8xi32>
    %414 = arith.cmpi eq, %348, %413 : vector<2x8xi32>
    %c0_i32_117 = arith.constant 0 : i32
    %415 = vector.broadcast %c0_i32_117 : i32 to vector<2x8xi32>
    %416 = arith.select %414, %286, %415 : vector<2x8xi1>, vector<2x8xi32>
    %cst_118 = arith.constant dense<0> : vector<2xi32>
    %417 = vector.multi_reduction <add>, %416, %cst_118 [1] : vector<2x8xi32> to vector<2xi32>
    %418 = vector.shape_cast %417 : vector<2xi32> to vector<2x1xi32>
    %c2_i32 = arith.constant 2 : i32
    %419 = vector.broadcast %c2_i32 : i32 to vector<2x8xi32>
    %420 = arith.cmpi eq, %357, %419 : vector<2x8xi32>
    %421 = arith.sitofp %418 : vector<2x1xi32> to vector<2x1xf32>
    %422 = vector.shape_cast %421 : vector<2x1xf32> to vector<2x1xf32>
    %423 = vector.broadcast %422 : vector<2x1xf32> to vector<2x8xf32>
    %424 = arith.select %420, %423, %412 : vector<2x8xi1>, vector<2x8xf32>
    %425 = vector.broadcast %418 : vector<2x1xi32> to vector<2x8xi32>
    %426 = arith.cmpi eq, %348, %425 : vector<2x8xi32>
    %c0_i32_119 = arith.constant 0 : i32
    %427 = vector.broadcast %c0_i32_119 : i32 to vector<2x8xi32>
    %428 = arith.select %426, %272, %427 : vector<2x8xi1>, vector<2x8xi32>
    %cst_120 = arith.constant dense<0> : vector<2xi32>
    %429 = vector.multi_reduction <add>, %428, %cst_120 [1] : vector<2x8xi32> to vector<2xi32>
    %430 = vector.shape_cast %429 : vector<2xi32> to vector<2x1xi32>
    %c1_i32 = arith.constant 1 : i32
    %431 = vector.broadcast %c1_i32 : i32 to vector<2x8xi32>
    %432 = arith.cmpi eq, %357, %431 : vector<2x8xi32>
    %433 = arith.sitofp %430 : vector<2x1xi32> to vector<2x1xf32>
    %434 = vector.shape_cast %433 : vector<2x1xf32> to vector<2x1xf32>
    %435 = vector.broadcast %434 : vector<2x1xf32> to vector<2x8xf32>
    %436 = arith.select %432, %435, %424 : vector<2x8xi1>, vector<2x8xf32>
    %437 = vector.broadcast %430 : vector<2x1xi32> to vector<2x8xi32>
    %438 = arith.cmpi eq, %348, %437 : vector<2x8xi32>
    %c0_i32_121 = arith.constant 0 : i32
    %439 = vector.broadcast %c0_i32_121 : i32 to vector<2x8xi32>
    %440 = arith.select %438, %258, %439 : vector<2x8xi1>, vector<2x8xi32>
    %cst_122 = arith.constant dense<0> : vector<2xi32>
    %441 = vector.multi_reduction <add>, %440, %cst_122 [1] : vector<2x8xi32> to vector<2xi32>
    %442 = vector.shape_cast %441 : vector<2xi32> to vector<2x1xi32>
    %c0_i32_123 = arith.constant 0 : i32
    %443 = vector.broadcast %c0_i32_123 : i32 to vector<2x8xi32>
    %444 = arith.cmpi eq, %357, %443 : vector<2x8xi32>
    %445 = arith.sitofp %442 : vector<2x1xi32> to vector<2x1xf32>
    %446 = vector.shape_cast %445 : vector<2x1xf32> to vector<2x1xf32>
    %447 = vector.broadcast %446 : vector<2x1xf32> to vector<2x8xf32>
    %448 = arith.select %444, %447, %436 : vector<2x8xi1>, vector<2x8xf32>
    %c0_124 = arith.constant 0 : index
    %c0_125 = arith.constant 0 : index
    %449 = vector.load %arg10[%c0_124, %c0_125] : memref<2x8xf32, #tpu.memory_space<vmem>>, vector<2x8xf32>
    tpu.vector_store %arg10[%c0_124, %c0_125], %448 {strides = array<i32>} : memref<2x8xf32, #tpu.memory_space<vmem>>, vector<2x8xf32>,
    return
  }
}

</mosaic_0001>

<bundles_post_ra>
// kernel: forward.1
= control target key start
LH: loop header
LB: loop body
LE: loop exit
PB: predicated region body
PF: predicated region fallthrough
CT: control target
= control target key end

     0   :  { %15 = vsyncpa [#allocation6], 0  ;;  %s6586_s0 = inlined_call_operand.vmem [shape: s32[16,6], index: 0, kind: input, shape index: {}]   ;;  %s6587_s1 = inlined_call_operand.vmem [shape: bf16[148,320], index: 1, kind: input, shape index: {}]   ;;  %s6588_s2 = inlined_call_operand.vmem [shape: f32[1,320], index: 2, kind: input, shape index: {}]   ;;  %s6589_s3 = inlined_call_operand.hbm [shape: bf16[80,320], index: 3, kind: input, shape index: {}]   ;;  %s6590_s4 = inlined_call_operand.vmem [shape: bf16[40,8], index: 4, kind: input, shape index: {}]   ;;  %s6591_s5 = inlined_call_operand.vmem [shape: bf16[40,8], index: 5, kind: input, shape index: {}]   ;;  %s6592_s6 = inlined_call_operand.vmem [shape: f32[1,8], index: 6, kind: input, shape index: {}]   ;;  %s6593_s7 = inlined_call_operand.vmem [shape: f32[1,8], index: 7, kind: input, shape index: {}]   ;;  %s6594_s8 = inlined_call_operand.vmem [shape: f32[1,8], index: 8, kind: input, shape index: {}]   ;;  %s6595_s9 = inlined_call_operand.vmem [shape: f32[8,8], index: 9, kind: input, shape index: {}]   ;;  %s6596_s10 = inlined_call_operand.hbm [shape: f32[2,8], index: 10, kind: output, shape index: {}]  }
   0x1   :  { %16 = vsyncpa [#allocation7], 0  ;;  %s27_s15 = sshll.u32 %s6589_s3, 4  ;;  %s4511_s16 = smov [#allocation5]   ;;  %s28_s15 = int_to_ptr.hbm [resolvable:$true] %s27_s15 }
   0x2   :  { %s29_s17 = sshll.u32 %s4511_s16, 4  ;;  %s4512_s18 = smov 192   ;;  %s30_s17 = int_to_ptr.vmem [resolvable:$true] %s29_s17 }
   0x3   :  { %s4513_s19 = smov 12  }
   0x4   :  { %35 = dma.hbm_to_vmem [thread:$0]  %s28_s15, 1920, %s30_s17, [#allocation6], %s4512_s18, %s4512_s18, %s4513_s19  }
   0x5   :  { %4507 = dma.done.wait [#allocation6], 1920  }
   0x6   :  { %4508 = vsyncadd [#allocation6], 4294965376  ;;  %v4514_v0 = vmov 1   ;;  %v4515_v1 = vmov 0   ;;  %v4516_v2 = vmov 2   ;;  %v53_v3 = vld [vmem:[%s6586_s0] sm:$0xff]  ;;  %v55_v57 = vlaneseq }
   0x7   :  { %4314 = vset.pattern.permute.xlu1 %v4514_v0  ;;  %4313 = vset.pattern.permute.xlu0 %v4515_v1  ;;  %v54_v4 = vld [vmem:[%s6586_s0 + $0x8] sm:$0xff]  ;;  %v4517_v5 = vmov 3   ;;  %v4518_v6 = vmov 4   ;;  %v4519_v7 = vmov 5   ;;  %v4274_v9 = vld [vmem:[%s6587_s1 + $0xb0] sm:$0xf0] }
   0x8   :  { %4315 = vset.pattern.permute.xlu2 %v4516_v2  ;;  %69 = vperm.xlu1 %4314, %v53_v3   ;;  %v4112_v8 = vld [vmem:[%s6587_s1 + $0xa8] sm:$0xf]  ;;  %v4273_v11 = vld [vmem:[%s6587_s1 + $0xac] sm:$0xf]  ;;  %v4114_v12 = vld [vmem:[%s6587_s1 + $0xb4] sm:$0xf0] }
   0x9   :  { %59 = vperm.xlu0 %4313, %v53_v3   ;;  %83 = vperm.xlu2 %4315, %v53_v3   ;;  %v4113_v10 = vor.u32 %v4274_v9, %v4112_v8  ;;  %v4117_v13 = vor.u32 %v4273_v11, %v4114_v12  ;;  %v4100_v14 = vld [vmem:[%s6587_s1 + $0x90] sm:$0xf]  ;;  %v4271_v15 = vld [vmem:[%s6587_s1 + $0x98] sm:$0xf0]  ;;  %v4270_v16 = vld [vmem:[%s6587_s1 + $0x94] sm:$0xf] }
   0xa   :  { %v4101_v17 = vor.u32 %v4271_v15, %v4100_v14  ;;  %v4102_v18 = vld [vmem:[%s6587_s1 + $0x9c] sm:$0xf0]  ;;  %v4088_v20 = vld [vmem:[%s6587_s1 + $0x78] sm:$0xf]  ;;  %v4268_v21 = vld [vmem:[%s6587_s1 + $0x80] sm:$0xf0] }
   0xb   :  { %360 = vmatpush.bf16.msra.mxu0 %v4113_v10  ;;  %388 = vmatpush.bf16.msra.mxu2 %v4117_v13  ;;  %v4105_v19 = vor.u32 %v4270_v16, %v4102_v18  ;;  %v4089_v22 = vor.u32 %v4268_v21, %v4088_v20  ;;  %v4267_v23 = vld [vmem:[%s6587_s1 + $0x7c] sm:$0xf]  ;;  %v4090_v24 = vld [vmem:[%s6587_s1 + $0x84] sm:$0xf0]  ;;  %v4076_v28 = vld [vmem:[%s6587_s1 + $0x60] sm:$0xf] }
   0xc   :  { %v184_v25 = vld [vmem:[%s6587_s1 + $0xd8] sm:$0x33]  ;;  %v4093_v26 = vor.u32 %v4267_v23, %v4090_v24  ;;  %v4265_v29 = vld [vmem:[%s6587_s1 + $0x68] sm:$0xf0]  ;;  %vm350_vm0 = vcmask 1041408   ;;  %s4522_s25 = smov 80  }
   0xd   :  { %v286_v27 = vunpack.c.l.b16 %v184_v25  ;;  %v4077_v31 = vor.u32 %v4265_v29, %v4076_v28  ;;  %v4264_v32 = vld [vmem:[%s6587_s1 + $0x64] sm:$0xf]  ;;  %v4078_v33 = vld [vmem:[%s6587_s1 + $0x6c] sm:$0xf0]  ;;  %v4064_v34 = vld [vmem:[%s6587_s1 + $0x48] sm:$0xf]  ;;  %v287_v62 = vunpack.c.h.b16 %v184_v25 }
   0xe   :  { %v4081_v36 = vor.u32 %v4264_v32, %v4078_v33  ;;  %v4262_v37 = vld [vmem:[%s6587_s1 + $0x50] sm:$0xf0]  ;;  %v4124_v38 = vld [vmem:[%s6587_s1 + $0xc0] sm:$0xf]  ;;  %v4277_v40 = vld [vmem:[%s6587_s1 + $0xc8] sm:$0xf0] }
   0xf   :  { %361 = vmatpush.bf16.msra.mxu0 %v4101_v17  ;;  %389 = vmatpush.bf16.msra.mxu2 %v4105_v19  ;;  %v316_v30 = vpack.c.b16 %v286_v27, %v286_v27  ;;  %v4065_v39 = vor.u32 %v4262_v37, %v4064_v34  ;;  %v4125_v41 = vor.u32 %v4277_v40, %v4124_v38  ;;  %v4261_v42 = vld [vmem:[%s6587_s1 + $0x4c] sm:$0xf]  ;;  %v4066_v43 = vld [vmem:[%s6587_s1 + $0x54] sm:$0xf0]  ;;  %v4120_v44 = vld [vmem:[%s6587_s1 + $0xb0] sm:$0xf] }
  0x10   :  { %72 = vperm.xlu1 %4314, %v54_v4   ;;  %v4069_v45 = vor.u32 %v4261_v42, %v4066_v43  ;;  %v4275_v46 = vld [vmem:[%s6587_s1 + $0xb8] sm:$0xf0]  ;;  %v4052_v48 = vld [vmem:[%s6587_s1 + $0x30] sm:$0xf]  ;;  %v4258_v52 = vld [vmem:[%s6587_s1 + $0x34] sm:$0xf] }
  0x11   :  { %62 = vperm.xlu0 %4313, %v54_v4   ;;  %86 = vperm.xlu2 %4315, %v54_v4   ;;  %v352_v35 = vsel %vm350_vm0, %v316_v30, 0  ;;  %v4121_v47 = vor.u32 %v4275_v46, %v4120_v44  ;;  %v4259_v49 = vld [vmem:[%s6587_s1 + $0x38] sm:$0xf0]  ;;  %v4054_v53 = vld [vmem:[%s6587_s1 + $0x3c] sm:$0xf0]  ;;  %s4523_s26 = smov 96  }
  0x12   :  { %380 = vmatpush.bf16.msra.mxu1 %v352_v35  ;;  %v4053_v51 = vor.u32 %v4259_v49, %v4052_v48  ;;  %v4108_v54 = vld [vmem:[%s6587_s1 + $0x98] sm:$0xf]  ;;  %v4057_v55 = vor.u32 %v4258_v52, %v4054_v53  ;;  %v4272_v56 = vld [vmem:[%s6587_s1 + $0xa0] sm:$0xf0]  ;;  %v4255_v61 = vld [vmem:[%s6587_s1 + $0x1c] sm:$0xf] }
  0x13   :  { %362 = vmatpush.bf16.msra.mxu0 %v4089_v22  ;;  %390 = vmatpush.bf16.msra.mxu2 %v4093_v26  ;;  %v4109_v58 = vor.u32 %v4272_v56, %v4108_v54  ;;  %v4040_v59 = vld [vmem:[%s6587_s1 + $0x18] sm:$0xf]  ;;  %v4256_v60 = vld [vmem:[%s6587_s1 + $0x20] sm:$0xf0]  ;;  %v4042_v0 = vld [vmem:[%s6587_s1 + $0x24] sm:$0xf0] }
  0x14   :  { %v4041_v63 = vor.u32 %v4256_v60, %v4040_v59  ;;  %v4096_v2 = vld [vmem:[%s6587_s1 + $0x80] sm:$0xf]  ;;  %v4253_v10 = vld [vmem:[%s6587_s1 + $0x8] sm:$0xf0]  ;;  %v4252_v11 = vld [vmem:[%s6587_s1 + $0x4] sm:$0xf] }
  0x15   :  { %v4028_v9 = vld [vmem:[%s6587_s1] sm:$0xf]  ;;  %v4030_v15 = vld [vmem:[%s6587_s1 + $0xc] sm:$0xf0]  ;;  %v4276_v16 = vld [vmem:[%s6587_s1 + $0xc4] sm:$0xf] }
  0x16   :  { %381 = vmatpush.bf16.msra.mxu1 %v4125_v41  ;;  %v4029_v14 = vor.u32 %v4253_v10, %v4028_v9  ;;  %v4126_v17 = vld [vmem:[%s6587_s1 + $0xcc] sm:$0xf0]  ;;  %v4084_v18 = vld [vmem:[%s6587_s1 + $0x68] sm:$0xf]  ;;  %v4266_v19 = vld [vmem:[%s6587_s1 + $0x70] sm:$0xf0]  ;;  %v4033_v22 = vor.u32 %v4252_v11, %v4030_v15 }
  0x17   :  { %363 = vmatpush.bf16.msra.mxu0 %v4077_v31  ;;  %391 = vmatpush.bf16.msra.mxu2 %v4081_v36  ;;  %v4291_v20 = vld [vmem:[#allocation5 + $0x64] sm:$0xf]  ;;  %v4129_v23 = vor.u32 %v4276_v16, %v4126_v17  ;;  %v4085_v24 = vor.u32 %v4266_v19, %v4084_v18  ;;  %v4189_v25 = vld [vmem:[#allocation5 + $0x6c] sm:$0xf0]  ;;  %v4072_v27 = vld [vmem:[%s6587_s1 + $0x50] sm:$0xf] }
  0x18   :  { %4317 = vset.pattern.permute.xlu1 %v4517_v5  ;;  %v4735_v26 = vor.u32 %v4291_v20, %v4189_v25  ;;  %v4263_v28 = vld [vmem:[%s6587_s1 + $0x58] sm:$0xf0]  ;;  %v4177_v30 = vld [vmem:[#allocation5 + $0x54] sm:$0xf0]  ;;  %v4060_v33 = vld [vmem:[%s6587_s1 + $0x38] sm:$0xf] }
  0x19   :  { %4316 = vset.pattern.permute.xlu0 %v4517_v5  ;;  %100 = vperm.xlu1 %4317, %v54_v4   ;;  %v317_v5 = vpack.c.b16 %v287_v62, %v287_v62  ;;  %v4288_v29 = vld [vmem:[#allocation5 + $0x4c] sm:$0xf]  ;;  %v4073_v32 = vor.u32 %v4263_v28, %v4072_v27  ;;  %v4260_v35 = vld [vmem:[%s6587_s1 + $0x40] sm:$0xf0]  ;;  %v4195_v37 = vld [vmem:[#allocation5 + $0x68] sm:$0xf] }
  0x1a   :  { %97 = vperm.xlu0 %4316, %v53_v3   ;;  %4318 = vset.pattern.permute.xlu2 %v4518_v6  ;;  %v4752_v34 = vor.u32 %v4288_v29, %v4177_v30  ;;  %v4285_v36 = vld [vmem:[#allocation5 + $0x34] sm:$0xf]  ;;  %v4165_v38 = vld [vmem:[#allocation5 + $0x3c] sm:$0xf0]  ;;  %v185_v40 = vld [vmem:[%s6587_s1 + $0xe0] sm:$0x3]  ;;  %v4061_v46 = vor.u32 %v4260_v35, %v4060_v33 }
  0x1b   :  { %111 = vperm.xlu2 %4318, %v53_v3   ;;  %364 = vmatpush.bf16.msra.mxu0 %v4065_v39  ;;  %v355_v8 = vsel %vm350_vm0, %v317_v5, 0  ;;  %v4293_v39 = vld [vmem:[#allocation5 + $0x70] sm:$0xf0]  ;;  %v4183_v48 = vld [vmem:[#allocation5 + $0x50] sm:$0xf]  ;;  %v4776_v52 = vor.u32 %v4285_v36, %v4165_v38  ;;  %v4520_v33 = vmov 0.0  }
  0x1c   :  { %392 = vmatpush.bf16.msra.mxu2 %v4069_v45  ;;  %416 = vmatpush.bf16.msrb.mxu1 %v4121_v47  ;;  %v4764_v44 = vor.u32 %v4293_v39, %v4195_v37  ;;  %v288_v45 = vunpack.c.l.b16 %v185_v40  ;;  %v4048_v47 = vld [vmem:[%s6587_s1 + $0x20] sm:$0xf]  ;;  %v4290_v49 = vld [vmem:[#allocation5 + $0x58] sm:$0xf0]  ;;  %v4278_v56 = vld [vmem:[%s6587_s1 + $0xd0] sm:$0xf0] }
  0x1d   :  { %408 = vmatpush.bf16.msra.mxu3 %v355_v8  ;;  %v4257_v54 = vld [vmem:[%s6587_s1 + $0x28] sm:$0xf0]  ;;  %v4153_v59 = vld [vmem:[#allocation5 + $0x24] sm:$0xf0]  ;;  %v4788_v60 = vor.u32 %v4290_v49, %v4183_v48  ;;  %v4036_v5 = vld [vmem:[%s6587_s1 + $0x8] sm:$0xf] }
  0x1e   :  { %v318_v53 = vpack.c.b16 %v288_v45, %v288_v45  ;;  %v4287_v8 = vld [vmem:[#allocation5 + $0x40] sm:$0xf0]  ;;  %v4141_v9 = vld [vmem:[#allocation5 + $0xc] sm:$0xf0]  ;;  %v4159_v19 = vld [vmem:[#allocation5 + $0x20] sm:$0xf] }
  0x1f   :  { %365 = vmatpush.bf16.msra.mxu0 %v4053_v51  ;;  %v4284_v20 = vld [vmem:[#allocation5 + $0x28] sm:$0xf0]  ;;  %v4187_v30 = vld [vmem:[#allocation5 + $0x60] sm:$0xf]  ;;  %v4163_v45 = vld [vmem:[#allocation5 + $0x30] sm:$0xf] }
  0x20   :  { %393 = vmatpush.bf16.msra.mxu2 %v4057_v55  ;;  %417 = vmatpush.bf16.msrb.mxu1 %v4109_v58  ;;  %v4132_v55 = vld [vmem:[%s6587_s1 + $0xc8] sm:$0xf]  ;;  %v4282_v58 = vld [vmem:[#allocation5 + $0x1c] sm:$0xf]  ;;  %v358_v62 = vsel %vm350_vm0, %v318_v53, 0  ;;  %s4524_s27 = smov 56  }
  0x21   :  { %4319 = vset.pattern.permute.xlu1 %v4518_v6  ;;  %409 = vmatpush.bf16.msra.mxu3 %v4129_v23  ;;  %v4281_v23 = vld [vmem:[#allocation5 + $0x10] sm:$0xf0]  ;;  %v4151_v48 = vld [vmem:[#allocation5 + $0x18] sm:$0xf]  ;;  %v4283_v49 = vld [vmem:[#allocation5 + $0x20] sm:$0xf0] }
  0x22   :  { %4321 = vset.pattern.permute.xlu0 %v4519_v7  ;;  %114 = vperm.xlu1 %4319, %v54_v4   ;;  %v4139_v53 = vld [vmem:[#allocation5] sm:$0xf] }
  0x23   :  { %128 = vperm.xlu0 %4321, %v54_v4   ;;  %4320 = vset.pattern.permute.xlu2 %v4519_v7  ;;  %v4045_v4 = vor.u32 %v4255_v61, %v4042_v0  ;;  %v4706_v7 = vand.u32 127, %v55_v57  ;;  %v4049_v0 = vor.u32 %v4257_v54, %v4048_v47  ;;  %v4280_v54 = vld [vmem:[#allocation5 + $0x8] sm:$0xf0] }
  0x24   :  { %125 = vperm.xlu2 %4320, %v53_v3   ;;  %v4269_v3 = vld [vmem:[%s6587_s1 + $0x88] sm:$0xf0]  ;;  %366 = vmatpush.bf16.msra.mxu0 %v4041_v63 }
  0x25   :  { %v4097_v6 = vor.u32 %v4269_v3, %v4096_v2  ;;  %394 = vmatpush.bf16.msra.mxu2 %v4045_v4  ;;  %v4744_v31 = vadd.s32 128, %v4706_v7  ;;  %436 = vmatpush.bf16.msrb.mxu3 %v358_v62  ;;  %v4133_v2 = vor.u32 %v4278_v56, %v4132_v55  ;;  %v4171_v3 = vld [vmem:[#allocation5 + $0x38] sm:$0xf]  ;;  %v4815_v4 = vor.u32 %v4282_v58, %v4153_v59  ;;  %v186_v56 = vld [vmem:[%s6588_s2] sm:$0x7]  ;;  %s4521_s2 = smov 16  }
  0x26   :  { %v4828_v10 = vor.u32 %v4287_v8, %v4171_v3  ;;  %v4920_v55 = vor.u32 %v4280_v54, %v4139_v53  ;;  %v188_v58 = vperm.slane %v186_v56, 0 }
  0x27   :  { %418 = vmatpush.bf16.msrb.mxu1 %v4097_v6  ;;  %v4254_v6 = vld [vmem:[%s6587_s1 + $0x10] sm:$0xf0]  ;;  %s4012_s1 = sshll.u32 %s6596_s10, 4  ;;  %s4013_s1 = int_to_ptr.hbm [resolvable:$true] %s4012_s1 }
  0x28   :  { %367 = vmatpush.bf16.msra.mxu0 %v4029_v14  ;;  %v4037_v14 = vor.u32 %v4254_v6, %v4036_v5 }
  0x29   :  { %395 = vmatpush.bf16.msra.mxu2 %v4033_v22  ;;  %437 = vmatpush.bf16.msrb.mxu3 %v4133_v2  ;;  %v4147_v22 = vld [vmem:[#allocation5 + $0x8] sm:$0xf] }
  0x2b   :  { %419 = vmatpush.bf16.msrb.mxu1 %v4085_v24  ;;  %v4873_v24 = vor.u32 %v4281_v23, %v4147_v22 }
  0x2c   :  { %571 = vmatpush.bf16.msrb.mxu0 %v4735_v26 }
  0x2d   :  { %584 = vmatpush.bf16.msrb.mxu2 %v4764_v44 }
  0x2f   :  { %420 = vmatpush.bf16.msrb.mxu1 %v4073_v32  ;;  %v4292_v32 = vld [vmem:[#allocation5 + $0x68] sm:$0xf0] }
  0x30   :  { %572 = vmatpush.bf16.msrb.mxu0 %v4752_v34  ;;  %v4897_v40 = vor.u32 %v4292_v32, %v4187_v30 }
  0x31   :  { %585 = vmatpush.bf16.msrb.mxu2 %v4788_v60 }
  0x33   :  { %421 = vmatpush.bf16.msrb.mxu1 %v4061_v46  ;;  %v4286_v46 = vld [vmem:[#allocation5 + $0x38] sm:$0xf0] }
  0x34   :  { %573 = vmatpush.bf16.msrb.mxu0 %v4776_v52  ;;  %v4908_v47 = vor.u32 %v4286_v46, %v4163_v45 }
  0x35   :  { %586 = vmatpush.bf16.msrb.mxu2 %v4828_v10 }
  0x37   :  { %422 = vmatpush.bf16.msrb.mxu1 %v4049_v0  ;;  %v189_v0 = vperm.slane %v186_v56, 1 }
  0x38   :  { %574 = vmatpush.bf16.msrb.mxu0 %v4815_v4 }
  0x3b   :  { %423 = vmatpush.bf16.msrb.mxu1 %v4037_v14 }
  0x63   :  { %v4673_v50 = vpop.permute.xlu2 %83 }
  0x64   :  { %vm88_vm6 = vcmp.eq.s32.totalorder %v4706_v7, %v4673_v50  ;;  %vm89_vm13 = vcmp.eq.s32.totalorder %v4744_v31, %v4673_v50  ;;  %v4279_v50 = vld [vmem:[#allocation5 + $0x4] sm:$0xf] }
  0x65   :  { %v4847_v15 = vor.u32 %v4279_v50, %v4141_v9 }
  0x67   :  { %575 = vmatpush.bf16.msrb.mxu0 %v4847_v15 }
  0x6b   :  { %v4733_v21 = vpop.permute.xlu2 %86 }
  0x6c   :  { %vm90_vm0 = vcmp.eq.s32.totalorder %v4706_v7, %v4733_v21 }
  0x75   :  { %v4773_v51 = vpop.permute.xlu2 %111 }
  0x7a   :  { %v70_v12 = vpop.permute.xlu1 %69 }
  0x7b   :  { %v60_v13 = vpop.permute.xlu0 %59  ;;  %vm74_vm1 = vcmp.eq.s32.totalorder %v4706_v7, %v70_v12  ;;  %vm75_vm4 = vcmp.eq.s32.totalorder %v4744_v31, %v70_v12 }
  0x7c   :  { %vm64_vm2 = vcmp.eq.s32.totalorder %v4706_v7, %v60_v13  ;;  %vm65_vm5 = vcmp.eq.s32.totalorder %v4744_v31, %v60_v13 }
  0x7d   :  { %vm4760_vm3 = vmor %vm64_vm2, %vm74_vm1  ;;  %vm91_vm2 = vcmp.eq.s32.totalorder %v4744_v31, %v4733_v21  ;;  %v4865_v21 = vor.u32 %v4284_v20, %v4159_v19  ;;  %v190_v19 = vperm.slane %v186_v56, 2 }
  0x7e   :  { %vm4794_vm7 = vmor %vm65_vm5, %vm75_vm4  ;;  %v126_v18 = vpop.permute.xlu2 %125 }
  0x7f   :  { %vm4808_vm12 = vmor %vm4760_vm3, %vm88_vm6  ;;  %587 = vmatpush.bf16.msrb.mxu2 %v4865_v21 }
  0x80   :  { %vm4838_vm1 = vmor %vm4794_vm7, %vm89_vm13 }
  0x82   :  { %v73_v42 = vpop.permute.xlu1 %72 }
  0x83   :  { %v63_v43 = vpop.permute.xlu0 %62  ;;  %vm76_vm8 = vcmp.eq.s32.totalorder %v4706_v7, %v73_v42  ;;  %vm77_vm9 = vcmp.eq.s32.totalorder %v4744_v31, %v73_v42  ;;  %588 = vmatpush.bf16.msrb.mxu2 %v4873_v24  ;;  %v4289_v42 = vld [vmem:[#allocation5 + $0x50] sm:$0xf0] }
  0x84   :  { %vm66_vm10 = vcmp.eq.s32.totalorder %v4706_v7, %v63_v43  ;;  %vm67_vm11 = vcmp.eq.s32.totalorder %v4744_v31, %v63_v43 }
  0x85   :  { %vm80_vm14 = vmor %vm66_vm10, %vm76_vm8  ;;  %vm116_vm8 = vcmp.eq.s32.totalorder %v4706_v7, %v4773_v51  ;;  %vm117_vm10 = vcmp.eq.s32.totalorder %v4744_v31, %v4773_v51  ;;  %v4914_v51 = vor.u32 %v4283_v49, %v4151_v48 }
  0x86   :  { %vm81_vm15 = vmor %vm67_vm11, %vm77_vm9 }
  0x87   :  { %vm94_vm3 = vmor %vm80_vm14, %vm90_vm0  ;;  %vm130_vm0 = vcmp.eq.s32.totalorder %v4706_v7, %v126_v18 }
  0x88   :  { %vm4849_vm6 = vmor %vm81_vm15, %vm91_vm2  ;;  %vm131_vm2 = vcmp.eq.s32.totalorder %v4744_v31, %v126_v18 }
  0x8b   :  { %v101_v11 = vpop.permute.xlu1 %100 }
  0x8c   :  { %v98_v13 = vpop.permute.xlu0 %97  ;;  %vm104_vm4 = vcmp.eq.s32.totalorder %v4706_v7, %v101_v11  ;;  %vm105_vm13 = vcmp.eq.s32.totalorder %v4744_v31, %v101_v11 }
  0x8d   :  { %vm102_vm5 = vcmp.eq.s32.totalorder %v4706_v7, %v98_v13  ;;  %vm103_vm7 = vcmp.eq.s32.totalorder %v4744_v31, %v98_v13  ;;  %vm4857_vm9 = vmor %vm94_vm3, %vm104_vm4 }
  0x8e   :  { %vm106_vm11 = vmor %vm4808_vm12, %vm102_vm5 }
  0x8f   :  { %vm107_vm14 = vmor %vm4838_vm1, %vm103_vm7 }
  0x90   :  { %vm120_vm15 = vmor %vm106_vm11, %vm116_vm8 }
  0x91   :  { %vm121_vm12 = vmor %vm107_vm14, %vm117_vm10 }
  0x92   :  { %vm109_vm3 = vmor %vm4849_vm6, %vm105_vm13 }
  0x93   :  { %vm4878_vm4 = vmor %vm120_vm15, %vm130_vm0  ;;  %vm346_vm15 = vcmask 162816  }
  0x94   :  { %v115_v27 = vpop.permute.xlu1 %114  ;;  %vm4882_vm1 = vmor %vm121_vm12, %vm131_vm2  ;;  %v4022_v35 = vsel %vm4878_vm4, 1.0, %v4520_v33 }
  0x95   :  { %v129_v28 = vpop.permute.xlu0 %128  ;;  %vm118_vm5 = vcmp.eq.s32.totalorder %v4706_v7, %v115_v27  ;;  %vm119_vm7 = vcmp.eq.s32.totalorder %v4744_v31, %v115_v27  ;;  %v4023_v38 = vsel %vm4882_vm1, 1.0, %v4520_v33 }
  0x96   :  { %vm132_vm8 = vcmp.eq.s32.totalorder %v4706_v7, %v129_v28  ;;  %vm122_vm6 = vmor %vm4857_vm9, %vm118_vm5  ;;  %vm133_vm10 = vcmp.eq.s32.totalorder %v4744_v31, %v129_v28  ;;  %v4175_v31 = vld [vmem:[#allocation5 + $0x48] sm:$0xf]  ;;  %vm446_vm9 = vcmask 523264  }
  0x97   :  { %vm123_vm11 = vmor %vm109_vm3, %vm119_vm7  ;;  %v4902_v43 = vor.u32 %v4289_v42, %v4175_v31  ;;  %vm648_vm3 = vcmask 130048  }
  0x98   :  { %vm136_vm13 = vmor %vm122_vm6, %vm132_vm8  ;;  %vm551_vm6 = vcmask 654336  }
  0x99   :  { %vm137_vm14 = vmor %vm123_vm11, %vm133_vm10  ;;  %v4024_v36 = vsel %vm136_vm13, 1.0, %v4520_v33 }
  0x9a   :  { %v146_v37 = vpack.c.bf16 %v4024_v36, %v4022_v35  ;;  %v4025_v39 = vsel %vm137_vm14, 1.0, %v4520_v33 }
  0x9b   :  { %v147_v41 = vpack.c.bf16 %v4025_v39, %v4023_v38 }
  0x9c   :  { %368 = vmatmul.bf16.vlgmr.msra.gmra.mxu0 %v146_v37  ;;  %396 = vmatmul.bf16.vlgmr.msra.gmra.mxu2 %v146_v37 }
  0x9d   :  { %4134 = vmatmul.msk.bf16.vlgmr.msra.gmra.mxu1 %vm346_vm15, %v147_v41  ;;  %4135 = vmatmul.msk.bf16.vlgmr.msra.gmra.mxu3 %vm346_vm15, %v147_v41 }
  0x9e   :  { %558 = vmatpush.bf16.msra.mxu3 %v4897_v40  ;;  %689 = vmatpush.bf16.msra.mxu1 %v4897_v40 }
  0x9f   :  { %715 = vmatpush.bf16.msra.mxu0 %v4764_v44  ;;  %835 = vmatpush.bf16.msra.mxu2 %v4897_v40 }
  0xa2   :  { %559 = vmatpush.bf16.msra.mxu3 %v4902_v43  ;;  %690 = vmatpush.bf16.msra.mxu1 %v4902_v43 }
  0xa3   :  { %716 = vmatpush.bf16.msra.mxu0 %v4788_v60  ;;  %836 = vmatpush.bf16.msra.mxu2 %v4902_v43 }
  0xa6   :  { %560 = vmatpush.bf16.msra.mxu3 %v4908_v47  ;;  %691 = vmatpush.bf16.msra.mxu1 %v4908_v47 }
  0xa7   :  { %717 = vmatpush.bf16.msra.mxu0 %v4828_v10  ;;  %837 = vmatpush.bf16.msra.mxu2 %v4908_v47 }
  0xaa   :  { %561 = vmatpush.bf16.msra.mxu3 %v4914_v51  ;;  %692 = vmatpush.bf16.msra.mxu1 %v4914_v51 }
  0xab   :  { %718 = vmatpush.bf16.msra.mxu0 %v4865_v21  ;;  %838 = vmatpush.bf16.msra.mxu2 %v4914_v51 }
  0xac   :  { %576 = vmatmul.bf16.vlgmr.msrb.gmra.mxu0 %v4515_v1  ;;  %589 = vmatmul.bf16.vlgmr.msrb.gmra.mxu2 %v4515_v1 }
  0xad   :  { %424 = vmatmul.bf16.vlgmr.msrb.gmra.mxu1 %v146_v37  ;;  %4136 = vmatmul.msk.bf16.vlgmr.msrb.gmra.mxu3 %vm346_vm15, %v147_v41 }
  0xae   :  { %562 = vmatpush.bf16.msra.mxu3 %v4920_v55  ;;  %693 = vmatpush.bf16.msra.mxu1 %v4920_v55 }
  0xaf   :  { %719 = vmatpush.bf16.msra.mxu0 %v4873_v24  ;;  %839 = vmatpush.bf16.msra.mxu2 %v4920_v55 }
  0xb2   :  { %702 = vmatpush.bf16.msrb.mxu3 %v4735_v26  ;;  %848 = vmatpush.bf16.msrb.mxu1 %v4735_v26 }
  0xb3   :  { %981 = vmatpush.bf16.msrb.mxu0 %v4897_v40  ;;  %994 = vmatpush.bf16.msrb.mxu2 %v4735_v26 }
  0xb6   :  { %703 = vmatpush.bf16.msrb.mxu3 %v4752_v34  ;;  %849 = vmatpush.bf16.msrb.mxu1 %v4752_v34 }
  0xb7   :  { %982 = vmatpush.bf16.msrb.mxu0 %v4902_v43  ;;  %995 = vmatpush.bf16.msrb.mxu2 %v4752_v34 }
  0xba   :  { %704 = vmatpush.bf16.msrb.mxu3 %v4776_v52  ;;  %850 = vmatpush.bf16.msrb.mxu1 %v4776_v52 }
  0xbb   :  { %983 = vmatpush.bf16.msrb.mxu0 %v4908_v47  ;;  %996 = vmatpush.bf16.msrb.mxu2 %v4776_v52 }
  0xbd   :  { %563 = vmatmul.bf16.vlgmr.msra.gmra.mxu3 %v4515_v1 }
  0xbe   :  { %705 = vmatpush.bf16.msrb.mxu3 %v4815_v4  ;;  %851 = vmatpush.bf16.msrb.mxu1 %v4815_v4 }
  0xbf   :  { %984 = vmatpush.bf16.msrb.mxu0 %v4914_v51  ;;  %997 = vmatpush.bf16.msrb.mxu2 %v4815_v4 }
  0xc2   :  { %706 = vmatpush.bf16.msrb.mxu3 %v4847_v15  ;;  %852 = vmatpush.bf16.msrb.mxu1 %v4847_v15 }
  0xc3   :  { %985 = vmatpush.bf16.msrb.mxu0 %v4920_v55  ;;  %998 = vmatpush.bf16.msrb.mxu2 %v4847_v15 }
  0xc6   :  { %861 = vmatpush.bf16.msra.mxu3 %v4764_v44 }
  0xca   :  { %862 = vmatpush.bf16.msra.mxu3 %v4788_v60 }
  0xce   :  { %863 = vmatpush.bf16.msra.mxu3 %v4828_v10 }
  0xd2   :  { %864 = vmatpush.bf16.msra.mxu3 %v4865_v21 }
  0xd6   :  { %865 = vmatpush.bf16.msra.mxu3 %v4873_v24 }
 0x119   :  { %v369_v59 = vpop.f32.mrf.mxu0 }
 0x11a   :  { %v370_v61 = vadd.f32 %v369_v59, %v188_v58  ;;  %v383_v62 = vpop.f32.mrf.mxu1 }
 0x11c   :  { %v384_v63 = vadd.f32 %v383_v62, %v370_v61 }
 0x11e   :  { %444 = vst [vmem:[#allocation2] sm:$0xff] %v384_v63 }
 0x11f   :  { %v397_v2 = vpop.f32.mrf.mxu2 }
 0x120   :  { %v398_v3 = vadd.f32 %v397_v2, %v189_v0  ;;  %v411_v5 = vpop.f32.mrf.mxu3 }
 0x121   :  { %v371_v6 = vpop.f32.mrf.mxu0 }
 0x122   :  { %v412_v8 = vadd.f32 %v411_v5, %v398_v3  ;;  %v372_v50 = vadd.f32 %v371_v6, %v188_v58  ;;  %v385_v9 = vpop.f32.mrf.mxu1 }
 0x124   :  { %445 = vst [vmem:[#allocation2 + $0x8] sm:$0xff] %v412_v8  ;;  %v386_v11 = vadd.f32 %v385_v9, %v372_v50 }
 0x125   :  { %v594_v45 = vld [vmem:[#allocation2] sm:$0x3] }
 0x126   :  { %448 = vst [vmem:[#allocation2 + $0x18] sm:$0xff] %v386_v11 }
 0x127   :  { %v399_v12 = vpop.f32.mrf.mxu2 }
 0x128   :  { %v400_v13 = vadd.f32 %v399_v12, %v189_v0  ;;  %v413_v14 = vpop.f32.mrf.mxu3 }
 0x129   :  { %v577_v16 = vpop.f32.mrf.mxu0 }
 0x12a   :  { %v414_v17 = vadd.f32 %v413_v14, %v400_v13  ;;  %v425_v18 = vpop.f32.mrf.mxu1 }
 0x12b   :  { %v595_v20 = vld [vmem:[#allocation2 + $0x8] sm:$0x3]  ;;  %v426_v23 = vadd.f32 %v425_v18, %v190_v19 }
 0x12c   :  { %449 = vst [vmem:[#allocation2 + $0x20] sm:$0xff] %v414_v17  ;;  %v598_v22 = vadd.f32 %v595_v20, %v577_v16 }
 0x12e   :  { %4331 = vtanh.f32 %v598_v22  ;;  %v4198_v9 = vmul.f32 -1.442695, %v598_v22 }
 0x12f   :  { %v590_v25 = vpop.f32.mrf.mxu2 }
 0x130   :  { %v439_v27 = vpop.f32.mrf.mxu3 }
 0x131   :  { %v440_v28 = vadd.f32 %v439_v27, %v426_v23  ;;  %v579_v29 = vpop.f32.mrf.mxu0 }
 0x132   :  { %v427_v32 = vpop.f32.mrf.mxu1 }
 0x133   :  { %447 = vst.msk [vmem:[#allocation2 + $0x10] sm:$0xff] %vm446_vm9, %v440_v28  ;;  %v428_v33 = vadd.f32 %v427_v32, %v190_v19 }
 0x134   :  { %v4332_v30 = vpop.eup %4331 }
 0x135   :  { %644 = vrot.lane.b32.xlu1 %v4332_v30, %s4521_s2 }
 0x137   :  { %v592_v35 = vpop.f32.mrf.mxu2 }
 0x138   :  { %v441_v36 = vpop.f32.mrf.mxu3 }
 0x139   :  { %v442_v37 = vadd.f32 %v441_v36, %v428_v33 }
 0x13a   :  { %v596_v38 = vld [vmem:[#allocation2 + $0x10] sm:$0x3] }
 0x13b   :  { %450 = vst.msk [vmem:[#allocation2 + $0x28] sm:$0xff] %vm446_vm9, %v442_v37  ;;  %v599_v39 = vadd.f32 %v596_v38, %v590_v25 }
 0x13d   :  { %4333 = vtanh.f32 %v599_v39 }
 0x140   :  { %v564_v41 = vpop.f32.mrf.mxu3 }
 0x141   :  { %v597_v46 = vadd.f32 %v594_v45, %v564_v41 }
 0x143   :  { %v4334_v31 = vpop.eup %4333  ;;  %v4197_v48 = vmul.f32 -1.442695, %v597_v46 }
 0x144   :  { %646 = vrot.lane.b32.xlu2 %v4334_v31, %s4521_s2 }
 0x145   :  { %4335 = vpow2.f32 %v4197_v48  ;;  %v727_v48 = vld [vmem:[#allocation2 + $0x10] sm:$0xc] }
 0x148   :  { %v566_v42 = vpop.f32.mrf.mxu3 }
 0x14b   :  { %v4336_v49 = vpop.eup %4335 }
 0x14c   :  { %v606_v53 = vadd.f32 1.0, %v4336_v49 }
 0x14e   :  { %4337 = vrcp.f32 %v606_v53  ;;  %v619_v62 = vand.u32 2147483648, %v606_v53  ;;  %vm613_vm12 = vweird.f32 %v606_v53  ;;  %v617_v63 = vand.u32 2147483647, %v606_v53 }
 0x14f   :  { %4339 = vpow2.f32 %v4198_v9 }
 0x150   :  { %v620_v2 = vor.u32 1.1754944e-38, %v619_v62  ;;  %vm618_vm4 = vcmp.eq.f32.partialorder %v617_v63, 8.507059e+37 }
 0x154   :  { %v4338_v54 = vpop.eup %4337 }
 0x155   :  { %v609_v56 = vmul.f32 %v4338_v54, %v606_v53  ;;  %vm614_vm0 = vweird.f32 %v4338_v54  ;;  %v4340_v11 = vpop.eup %4339 }
 0x156   :  { %vm615_vm2 = vmor %vm613_vm12, %vm614_vm0  ;;  %v607_v12 = vadd.f32 1.0, %v4340_v11 }
 0x157   :  { %v610_v58 = vsub.f32 1.0, %v609_v56  ;;  %v726_v56 = vld [vmem:[#allocation2 + $0x8] sm:$0xc] }
 0x158   :  { %4341 = vrcp.f32 %v607_v12  ;;  %v634_v19 = vand.u32 2147483648, %v607_v12  ;;  %vm628_vm5 = vweird.f32 %v607_v12  ;;  %v632_v20 = vand.u32 2147483647, %v607_v12 }
 0x159   :  { %v611_v59 = vmul.f32 %v4338_v54, %v610_v58 }
 0x15a   :  { %v635_v25 = vor.u32 1.1754944e-38, %v634_v19  ;;  %vm633_vm8 = vcmp.eq.f32.partialorder %v632_v20, 8.507059e+37 }
 0x15b   :  { %v612_v61 = vadd.f32 %v4338_v54, %v611_v59 }
 0x15d   :  { %v616_v0 = vsel %vm615_vm2, %v4338_v54, %v612_v61 }
 0x15e   :  { %v621_v6 = vsel %vm618_vm4, %v620_v2, %v616_v0  ;;  %v4342_v13 = vpop.eup %4341 }
 0x15f   :  { %v624_v14 = vmul.f32 %v4342_v13, %v607_v12  ;;  %vm629_vm1 = vweird.f32 %v4342_v13  ;;  %v640_v28 = vmul.f32 0.0, %v621_v6 }
 0x160   :  { %vm630_vm7 = vmor %vm628_vm5, %vm629_vm1 }
 0x161   :  { %v625_v16 = vsub.f32 1.0, %v624_v14 }
 0x163   :  { %v626_v17 = vmul.f32 %v4342_v13, %v625_v16 }
 0x165   :  { %v627_v18 = vadd.f32 %v4342_v13, %v626_v17 }
 0x167   :  { %v631_v23 = vsel %vm630_vm7, %v4342_v13, %v627_v18 }
 0x168   :  { %v636_v27 = vsel %vm633_vm8, %v635_v25, %v631_v23 }
 0x169   :  { %v641_v22 = vmul.f32 0.0, %v636_v27 }
 0x19e   :  { %v647_v3 = vpop.permute.xlu2 %646 }
 0x1a7   :  { %v645_v5 = vpop.permute.xlu1 %644 }
 0x1a8   :  { %v649_v8 = vsel %vm648_vm3, %v645_v5, %v647_v3  ;;  %v725_v3 = vld [vmem:[#allocation2] sm:$0xc] }
 0x1a9   :  { %v651_v50 = vmul.f32 %v649_v8, %v621_v6 }
 0x1ab   :  { %653 = vrot.lane.b32.xlu1 %v651_v50, %s4522_s25 }
 0x21d   :  { %v654_v29 = vpop.permute.xlu1 %653 }
 0x21e   :  { %v4965_v30 = vadd.f32 %v654_v29, %v640_v28  ;;  %v4967_v32 = vadd.f32 %v654_v29, %v641_v22 }
 0x220   :  { %4343 = vtanh.f32 %v4965_v30 }
 0x221   :  { %4345 = vtanh.f32 %v4967_v32 }
 0x226   :  { %v4344_v33 = vpop.eup %4343 }
 0x227   :  { %v4346_v35 = vpop.eup %4345  ;;  %662 = vrot.lane.b32.xlu2 %v4344_v33, %s4522_s25 }
 0x228   :  { %664 = vrot.lane.b32.xlu0 %v4346_v35, %s4522_s25 }
 0x281   :  { %v663_v36 = vpop.permute.xlu2 %662 }
 0x29a   :  { %v665_v37 = vpop.permute.xlu0 %664 }
 0x29b   :  { %v666_v38 = vsel %vm551_vm6, %v663_v36, %v665_v37 }
 0x29c   :  { %v4974_v39 = vmul.f32 %v666_v38, %v636_v27 }
 0x29e   :  { %v679_v41 = vpack.c.bf16 %v4974_v39, %v4974_v39 }
 0x2a0   :  { %681 = vrot.lane.b32.xlu1 %v679_v41, %s4523_s26 }
 0x312   :  { %v682_v31 = vpop.permute.xlu1 %681 }
 0x313   :  { %4199 = vmatmul.msk.bf16.vlgmr.msra.gmra.mxu1 %vm551_vm6, %v682_v31  ;;  %4200 = vmatmul.msk.bf16.vlgmr.msrb.gmra.mxu3 %vm551_vm6, %v682_v31 }
 0x314   :  { %4201 = vmatmul.msk.bf16.vlgmr.msra.gmra.mxu0 %vm551_vm6, %v682_v31  ;;  %1007 = vmatpush.bf16.msra.mxu1 %v4764_v44 }
 0x315   :  { %1127 = vmatpush.bf16.msrb.mxu3 %v4897_v40  ;;  %1140 = vmatpush.bf16.msra.mxu0 %v4735_v26 }
 0x318   :  { %1008 = vmatpush.bf16.msra.mxu1 %v4788_v60 }
 0x319   :  { %1128 = vmatpush.bf16.msrb.mxu3 %v4902_v43  ;;  %1141 = vmatpush.bf16.msra.mxu0 %v4752_v34 }
 0x31c   :  { %1009 = vmatpush.bf16.msra.mxu1 %v4828_v10 }
 0x31d   :  { %1129 = vmatpush.bf16.msrb.mxu3 %v4908_v47  ;;  %1142 = vmatpush.bf16.msra.mxu0 %v4776_v52 }
 0x320   :  { %1010 = vmatpush.bf16.msra.mxu1 %v4865_v21 }
 0x321   :  { %1130 = vmatpush.bf16.msrb.mxu3 %v4914_v51  ;;  %1143 = vmatpush.bf16.msra.mxu0 %v4815_v4 }
 0x324   :  { %1011 = vmatpush.bf16.msra.mxu1 %v4873_v24 }
 0x325   :  { %1131 = vmatpush.bf16.msrb.mxu3 %v4920_v55  ;;  %1144 = vmatpush.bf16.msra.mxu0 %v4847_v15 }
 0x390   :  { %v695_v42 = vpop.f32.mrf.mxu1 }
 0x391   :  { %v721_v45 = vpop.f32.mrf.mxu0  ;;  %v731_v2 = vrot.slane %v695_v42, 6 }
 0x392   :  { %v733_v46 = vrot.slane %v721_v45, 6 }
 0x393   :  { %v737_v5 = vadd.f32 %v731_v2, %v725_v3 }
 0x394   :  { %v739_v49 = vadd.f32 %v733_v46, %v727_v48 }
 0x395   :  { %v4202_v6 = vmul.f32 -1.442695, %v737_v5 }
 0x396   :  { %4347 = vtanh.f32 %v739_v49  ;;  %v708_v53 = vpop.f32.mrf.mxu3  ;;  %v782_v49 = vrot.slane %v4965_v30, 6 }
 0x397   :  { %v732_v54 = vrot.slane %v708_v53, 6  ;;  %v783_v53 = vrot.slane %v4967_v32, 6 }
 0x398   :  { %v697_v58 = vpop.f32.mrf.mxu1 }
 0x399   :  { %v738_v59 = vadd.f32 %v732_v54, %v726_v56  ;;  %v723_v61 = vpop.f32.mrf.mxu0 }
 0x39b   :  { %4349 = vtanh.f32 %v738_v59  ;;  %v4203_v22 = vmul.f32 -1.442695, %v738_v59 }
 0x39c   :  { %v4348_v62 = vpop.eup %4347  ;;  %4351 = vpow2.f32 %v4202_v6 }
 0x39d   :  { %792 = vrot.lane.b32.xlu0 %v4348_v62, %s4521_s2 }
 0x39e   :  { %v710_v63 = vpop.f32.mrf.mxu3 }
 0x3a1   :  { %v4350_v0 = vpop.eup %4349 }
 0x3a2   :  { %790 = vrot.lane.b32.xlu2 %v4350_v0, %s4521_s2  ;;  %v4352_v8 = vpop.eup %4351 }
 0x3a3   :  { %v746_v50 = vadd.f32 1.0, %v4352_v8 }
 0x3a5   :  { %4353 = vrcp.f32 %v746_v50  ;;  %v759_v16 = vand.u32 2147483648, %v746_v50  ;;  %vm753_vm11 = vweird.f32 %v746_v50  ;;  %v757_v17 = vand.u32 2147483647, %v746_v50 }
 0x3a6   :  { %4355 = vpow2.f32 %v4203_v22 }
 0x3a7   :  { %v760_v19 = vor.u32 1.1754944e-38, %v759_v16  ;;  %vm758_vm14 = vcmp.eq.f32.partialorder %v757_v17, 8.507059e+37  ;;  %v873_v17 = vld [vmem:[#allocation2 + $0x10] sm:$0x30] }
 0x3ab   :  { %v4354_v9 = vpop.eup %4353 }
 0x3ac   :  { %v749_v11 = vmul.f32 %v4354_v9, %v746_v50  ;;  %vm754_vm10 = vweird.f32 %v4354_v9  ;;  %v4356_v29 = vpop.eup %4355 }
 0x3ad   :  { %vm755_vm13 = vmor %vm753_vm11, %vm754_vm10  ;;  %v747_v33 = vadd.f32 1.0, %v4356_v29 }
 0x3ae   :  { %v750_v12 = vsub.f32 1.0, %v749_v11 }
 0x3af   :  { %4357 = vrcp.f32 %v747_v33  ;;  %v774_v31 = vand.u32 2147483648, %v747_v33  ;;  %vm768_vm9 = vweird.f32 %v747_v33  ;;  %v772_v42 = vand.u32 2147483647, %v747_v33 }
 0x3b0   :  { %v751_v13 = vmul.f32 %v4354_v9, %v750_v12 }
 0x3b1   :  { %v775_v46 = vor.u32 1.1754944e-38, %v774_v31  ;;  %vm773_vm12 = vcmp.eq.f32.partialorder %v772_v42, 8.507059e+37 }
 0x3b2   :  { %v752_v14 = vadd.f32 %v4354_v9, %v751_v13 }
 0x3b4   :  { %v756_v18 = vsel %vm755_vm13, %v4354_v9, %v752_v14  ;;  %v872_v9 = vld [vmem:[#allocation2 + $0x8] sm:$0x30] }
 0x3b5   :  { %v761_v25 = vsel %vm758_vm14, %v760_v19, %v756_v18  ;;  %v4358_v35 = vpop.eup %4357 }
 0x3b6   :  { %v764_v36 = vmul.f32 %v4358_v35, %v747_v33  ;;  %vm769_vm15 = vweird.f32 %v4358_v35  ;;  %v786_v54 = vmul.f32 %v782_v49, %v761_v25 }
 0x3b7   :  { %vm770_vm0 = vmor %vm768_vm9, %vm769_vm15 }
 0x3b8   :  { %v765_v37 = vsub.f32 1.0, %v764_v36 }
 0x3ba   :  { %v766_v38 = vmul.f32 %v4358_v35, %v765_v37 }
 0x3bc   :  { %v767_v41 = vadd.f32 %v4358_v35, %v766_v38 }
 0x3be   :  { %v771_v45 = vsel %vm770_vm0, %v4358_v35, %v767_v41 }
 0x3bf   :  { %v776_v48 = vsel %vm773_vm12, %v775_v46, %v771_v45 }
 0x3c0   :  { %v787_v56 = vmul.f32 %v783_v53, %v776_v48 }
 0x3fc   :  { %v791_v20 = vpop.permute.xlu2 %790 }
 0x40f   :  { %v793_v23 = vpop.permute.xlu0 %792 }
 0x410   :  { %v794_v27 = vsel %vm648_vm3, %v791_v20, %v793_v23 }
 0x411   :  { %v796_v28 = vmul.f32 %v794_v27, %v761_v25 }
 0x413   :  { %798 = vrot.lane.b32.xlu1 %v796_v28, %s4522_s25  ;;  %v871_v28 = vld [vmem:[#allocation2] sm:$0x30] }
 0x485   :  { %v799_v58 = vpop.permute.xlu1 %798 }
 0x486   :  { %v5003_v59 = vadd.f32 %v799_v58, %v786_v54  ;;  %v5005_v61 = vadd.f32 %v799_v58, %v787_v56 }
 0x488   :  { %4359 = vtanh.f32 %v5003_v59 }
 0x489   :  { %4361 = vtanh.f32 %v5005_v61 }
 0x48e   :  { %v4360_v62 = vpop.eup %4359 }
 0x48f   :  { %v4362_v63 = vpop.eup %4361  ;;  %807 = vrot.lane.b32.xlu2 %v4360_v62, %s4522_s25 }
 0x490   :  { %809 = vrot.lane.b32.xlu0 %v4362_v63, %s4522_s25 }
 0x4e9   :  { %v808_v30 = vpop.permute.xlu2 %807 }
 0x502   :  { %v810_v0 = vpop.permute.xlu0 %809 }
 0x503   :  { %v811_v32 = vsel %vm551_vm6, %v808_v30, %v810_v0 }
 0x504   :  { %v5012_v2 = vmul.f32 %v811_v32, %v776_v48 }
 0x506   :  { %v824_v3 = vpack.c.bf16 %v5012_v2, %v5012_v2 }
 0x508   :  { %v826_v5 = vrot.slane %v824_v3, 1 }
 0x50a   :  { %827 = vrot.lane.b32.xlu1 %v826_v5, %s4523_s26 }
 0x57c   :  { %v828_v6 = vpop.permute.xlu1 %827 }
 0x57d   :  { %4204 = vmatmul.msk.bf16.vlgmr.msra.gmra.mxu2 %vm551_vm6, %v828_v6  ;;  %4205 = vmatmul.msk.bf16.vlgmr.msrb.gmra.mxu1 %vm551_vm6, %v828_v6 }
 0x57e   :  { %4206 = vmatmul.msk.bf16.vlgmr.msra.gmra.mxu3 %vm551_vm6, %v828_v6  ;;  %1153 = vmatpush.bf16.msra.mxu2 %v4764_v44 }
 0x57f   :  { %1262 = vmatpush.bf16.msrb.mxu1 %v4897_v40  ;;  %1275 = vmatpush.bf16.msra.mxu3 %v4735_v26 }
 0x582   :  { %1154 = vmatpush.bf16.msra.mxu2 %v4788_v60 }
 0x583   :  { %1263 = vmatpush.bf16.msrb.mxu1 %v4902_v43  ;;  %1276 = vmatpush.bf16.msra.mxu3 %v4752_v34 }
 0x586   :  { %1155 = vmatpush.bf16.msra.mxu2 %v4828_v10 }
 0x587   :  { %1264 = vmatpush.bf16.msrb.mxu1 %v4908_v47  ;;  %1277 = vmatpush.bf16.msra.mxu3 %v4776_v52 }
 0x58a   :  { %1156 = vmatpush.bf16.msra.mxu2 %v4865_v21 }
 0x58b   :  { %1265 = vmatpush.bf16.msrb.mxu1 %v4914_v51  ;;  %1278 = vmatpush.bf16.msra.mxu3 %v4815_v4 }
 0x58e   :  { %1157 = vmatpush.bf16.msra.mxu2 %v4873_v24 }
 0x58f   :  { %1266 = vmatpush.bf16.msrb.mxu1 %v4920_v55  ;;  %1279 = vmatpush.bf16.msra.mxu3 %v4847_v15 }
 0x5fa   :  { %v854_v8 = vpop.f32.mrf.mxu1 }
 0x5fb   :  { %v878_v50 = vrot.slane %v854_v8, 4 }
 0x5fd   :  { %v884_v11 = vadd.f32 %v878_v50, %v872_v9 }
 0x5ff   :  { %4363 = vtanh.f32 %v884_v11  ;;  %v4208_v62 = vmul.f32 -1.442695, %v884_v11  ;;  %v928_v11 = vrot.slane %v5003_v59, 6 }
 0x600   :  { %v841_v12 = vpop.f32.mrf.mxu2 }
 0x601   :  { %v867_v13 = vpop.f32.mrf.mxu3  ;;  %v877_v27 = vrot.slane %v841_v12, 4 }
 0x602   :  { %v879_v14 = vrot.slane %v867_v13, 4  ;;  %v856_v16 = vpop.f32.mrf.mxu1 }
 0x603   :  { %v883_v22 = vadd.f32 %v877_v27, %v871_v28 }
 0x604   :  { %v885_v18 = vadd.f32 %v879_v14, %v873_v17  ;;  %v929_v14 = vrot.slane %v5005_v61, 6 }
 0x605   :  { %v4364_v19 = vpop.eup %4363  ;;  %v4207_v29 = vmul.f32 -1.442695, %v883_v22 }
 0x606   :  { %4365 = vtanh.f32 %v885_v18  ;;  %936 = vrot.lane.b32.xlu2 %v4364_v19, %s4521_s2 }
 0x607   :  { %4367 = vpow2.f32 %v4207_v29 }
 0x608   :  { %v843_v20 = vpop.f32.mrf.mxu2 }
 0x609   :  { %v869_v23 = vpop.f32.mrf.mxu3 }
 0x60c   :  { %v4366_v25 = vpop.eup %4365 }
 0x60d   :  { %938 = vrot.lane.b32.xlu0 %v4366_v25, %s4521_s2  ;;  %v4368_v33 = vpop.eup %4367 }
 0x60e   :  { %v892_v35 = vadd.f32 1.0, %v4368_v33 }
 0x610   :  { %4369 = vrcp.f32 %v892_v35  ;;  %v905_v42 = vand.u32 2147483648, %v892_v35  ;;  %vm899_vm4 = vweird.f32 %v892_v35  ;;  %v903_v45 = vand.u32 2147483647, %v892_v35 }
 0x611   :  { %4371 = vpow2.f32 %v4208_v62  ;;  %v1017_v62 = vld [vmem:[#allocation2] sm:$0xc0] }
 0x612   :  { %v906_v48 = vor.u32 1.1754944e-38, %v905_v42  ;;  %vm904_vm5 = vcmp.eq.f32.partialorder %v903_v45, 8.507059e+37  ;;  %v1018_v45 = vld [vmem:[#allocation2 + $0x8] sm:$0xc0] }
 0x616   :  { %v4370_v36 = vpop.eup %4369 }
 0x617   :  { %v895_v37 = vmul.f32 %v4370_v36, %v892_v35  ;;  %vm900_vm2 = vweird.f32 %v4370_v36  ;;  %v4372_v63 = vpop.eup %4371 }
 0x618   :  { %vm901_vm1 = vmor %vm899_vm4, %vm900_vm2  ;;  %v893_v30 = vadd.f32 1.0, %v4372_v63 }
 0x619   :  { %v896_v38 = vsub.f32 1.0, %v895_v37 }
 0x61a   :  { %4373 = vrcp.f32 %v893_v30  ;;  %v920_v8 = vand.u32 2147483648, %v893_v30  ;;  %vm914_vm8 = vweird.f32 %v893_v30  ;;  %v918_v50 = vand.u32 2147483647, %v893_v30 }
 0x61b   :  { %v897_v41 = vmul.f32 %v4370_v36, %v896_v38  ;;  %v1019_v38 = vld [vmem:[#allocation2 + $0x10] sm:$0xc0] }
 0x61c   :  { %v921_v12 = vor.u32 1.1754944e-38, %v920_v8  ;;  %vm919_vm11 = vcmp.eq.f32.partialorder %v918_v50, 8.507059e+37 }
 0x61d   :  { %v898_v31 = vadd.f32 %v4370_v36, %v897_v41 }
 0x61f   :  { %v902_v46 = vsel %vm901_vm1, %v4370_v36, %v898_v31 }
 0x620   :  { %v907_v54 = vsel %vm904_vm5, %v906_v48, %v902_v46  ;;  %v4374_v0 = vpop.eup %4373 }
 0x621   :  { %v910_v32 = vmul.f32 %v4374_v0, %v893_v30  ;;  %vm915_vm7 = vweird.f32 %v4374_v0  ;;  %v932_v16 = vmul.f32 %v928_v11, %v907_v54 }
 0x622   :  { %vm916_vm10 = vmor %vm914_vm8, %vm915_vm7 }
 0x623   :  { %v911_v3 = vsub.f32 1.0, %v910_v32 }
 0x625   :  { %v912_v5 = vmul.f32 %v4374_v0, %v911_v3 }
 0x627   :  { %v913_v6 = vadd.f32 %v4374_v0, %v912_v5 }
 0x629   :  { %v917_v9 = vsel %vm916_vm10, %v4374_v0, %v913_v6 }
 0x62a   :  { %v922_v13 = vsel %vm919_vm11, %v921_v12, %v917_v9 }
 0x62b   :  { %v933_v17 = vmul.f32 %v929_v14, %v922_v13 }
 0x660   :  { %v937_v49 = vpop.permute.xlu2 %936 }
 0x67f   :  { %v939_v53 = vpop.permute.xlu0 %938 }
 0x680   :  { %v940_v56 = vsel %vm648_vm3, %v937_v49, %v939_v53 }
 0x681   :  { %v942_v58 = vmul.f32 %v940_v56, %v907_v54 }
 0x683   :  { %944 = vrot.lane.b32.xlu1 %v942_v58, %s4522_s25 }
 0x6f5   :  { %v945_v18 = vpop.permute.xlu1 %944 }
 0x6f6   :  { %v5041_v19 = vadd.f32 %v945_v18, %v932_v16  ;;  %v5043_v20 = vadd.f32 %v945_v18, %v933_v17 }
 0x6f8   :  { %4375 = vtanh.f32 %v5041_v19 }
 0x6f9   :  { %4377 = vtanh.f32 %v5043_v20 }
 0x6fe   :  { %v4376_v23 = vpop.eup %4375 }
 0x6ff   :  { %v4378_v25 = vpop.eup %4377  ;;  %953 = vrot.lane.b32.xlu2 %v4376_v23, %s4522_s25 }
 0x700   :  { %955 = vrot.lane.b32.xlu0 %v4378_v25, %s4522_s25 }
 0x759   :  { %v954_v59 = vpop.permute.xlu2 %953 }
 0x772   :  { %v956_v27 = vpop.permute.xlu0 %955 }
 0x773   :  { %v957_v61 = vsel %vm551_vm6, %v954_v59, %v956_v27 }
 0x774   :  { %v5050_v28 = vmul.f32 %v957_v61, %v922_v13 }
 0x776   :  { %v970_v22 = vpack.c.bf16 %v5050_v28, %v5050_v28 }
 0x778   :  { %v972_v29 = vrot.slane %v970_v22, 2 }
 0x77a   :  { %973 = vrot.lane.b32.xlu1 %v972_v29, %s4523_s26 }
 0x7ec   :  { %v974_v33 = vpop.permute.xlu1 %973 }
 0x7ed   :  { %4209 = vmatmul.msk.bf16.vlgmr.msrb.gmra.mxu0 %vm551_vm6, %v974_v33  ;;  %4210 = vmatmul.msk.bf16.vlgmr.msrb.gmra.mxu2 %vm551_vm6, %v974_v33 }
 0x7ee   :  { %4211 = vmatmul.msk.bf16.vlgmr.msra.gmra.mxu1 %vm551_vm6, %v974_v33  ;;  %1288 = vmatpush.bf16.msrb.mxu0 %v4764_v44 }
 0x7ef   :  { %1407 = vmatpush.bf16.msrb.mxu2 %v4897_v40  ;;  %1420 = vmatpush.bf16.msra.mxu1 %v4735_v26 }
 0x7f2   :  { %1289 = vmatpush.bf16.msrb.mxu0 %v4788_v60 }
 0x7f3   :  { %1408 = vmatpush.bf16.msrb.mxu2 %v4902_v43  ;;  %1421 = vmatpush.bf16.msra.mxu1 %v4752_v34 }
 0x7f6   :  { %1290 = vmatpush.bf16.msrb.mxu0 %v4828_v10 }
 0x7f7   :  { %1409 = vmatpush.bf16.msrb.mxu2 %v4908_v47  ;;  %1422 = vmatpush.bf16.msra.mxu1 %v4776_v52 }
 0x7fa   :  { %1291 = vmatpush.bf16.msrb.mxu0 %v4865_v21 }
 0x7fb   :  { %1410 = vmatpush.bf16.msrb.mxu2 %v4914_v51  ;;  %1423 = vmatpush.bf16.msra.mxu1 %v4815_v4 }
 0x7fe   :  { %1292 = vmatpush.bf16.msrb.mxu0 %v4873_v24 }
 0x7ff   :  { %1411 = vmatpush.bf16.msrb.mxu2 %v4920_v55  ;;  %1424 = vmatpush.bf16.msra.mxu1 %v4847_v15 }
 0x86a   :  { %v987_v35 = vpop.f32.mrf.mxu0 }
 0x86b   :  { %v1013_v36 = vpop.f32.mrf.mxu1  ;;  %v1023_v58 = vrot.slane %v987_v35, 2 }
 0x86c   :  { %v1025_v37 = vrot.slane %v1013_v36, 2 }
 0x86d   :  { %v1029_v63 = vadd.f32 %v1023_v58, %v1017_v62 }
 0x86e   :  { %v1031_v41 = vadd.f32 %v1025_v37, %v1019_v38 }
 0x86f   :  { %v4212_v30 = vmul.f32 -1.442695, %v1029_v63 }
 0x870   :  { %4379 = vtanh.f32 %v1031_v41  ;;  %v1000_v31 = vpop.f32.mrf.mxu2 }
 0x871   :  { %v1024_v42 = vrot.slane %v1000_v31, 2 }
 0x872   :  { %v989_v46 = vpop.f32.mrf.mxu0 }
 0x873   :  { %v1030_v48 = vadd.f32 %v1024_v42, %v1018_v45  ;;  %v1015_v49 = vpop.f32.mrf.mxu1  ;;  %v1074_v42 = vrot.slane %v5041_v19, 6  ;;  %v1075_v45 = vrot.slane %v5043_v20, 6 }
 0x875   :  { %4381 = vtanh.f32 %v1030_v48  ;;  %v4213_v25 = vmul.f32 -1.442695, %v1030_v48 }
 0x876   :  { %v4380_v53 = vpop.eup %4379  ;;  %4383 = vpow2.f32 %v4212_v30 }
 0x877   :  { %1084 = vrot.lane.b32.xlu0 %v4380_v53, %s4521_s2 }
 0x878   :  { %v1002_v54 = vpop.f32.mrf.mxu2 }
 0x87b   :  { %v4382_v56 = vpop.eup %4381 }
 0x87c   :  { %1082 = vrot.lane.b32.xlu2 %v4382_v56, %s4521_s2  ;;  %v4384_v0 = vpop.eup %4383 }
 0x87d   :  { %v1038_v32 = vadd.f32 1.0, %v4384_v0 }
 0x87f   :  { %4385 = vrcp.f32 %v1038_v32  ;;  %v1051_v9 = vand.u32 2147483648, %v1038_v32  ;;  %vm1045_vm14 = vweird.f32 %v1038_v32  ;;  %v1049_v12 = vand.u32 2147483647, %v1038_v32 }
 0x880   :  { %4387 = vpow2.f32 %v4213_v25 }
 0x881   :  { %v1052_v11 = vor.u32 1.1754944e-38, %v1051_v9  ;;  %vm1050_vm9 = vcmp.eq.f32.partialorder %v1049_v12, 8.507059e+37 }
 0x885   :  { %v4386_v3 = vpop.eup %4385 }
 0x886   :  { %v1041_v5 = vmul.f32 %v4386_v3, %v1038_v32  ;;  %vm1046_vm13 = vweird.f32 %v4386_v3  ;;  %v4388_v59 = vpop.eup %4387 }
 0x887   :  { %vm1047_vm15 = vmor %vm1045_vm14, %vm1046_vm13  ;;  %v1039_v27 = vadd.f32 1.0, %v4388_v59 }
 0x888   :  { %v1042_v6 = vsub.f32 1.0, %v1041_v5 }
 0x889   :  { %4389 = vrcp.f32 %v1039_v27  ;;  %v1066_v36 = vand.u32 2147483648, %v1039_v27  ;;  %vm1060_vm12 = vweird.f32 %v1039_v27  ;;  %v1064_v37 = vand.u32 2147483647, %v1039_v27 }
 0x88a   :  { %v1043_v8 = vmul.f32 %v4386_v3, %v1042_v6 }
 0x88b   :  { %v1067_v41 = vor.u32 1.1754944e-38, %v1066_v36  ;;  %vm1065_vm4 = vcmp.eq.f32.partialorder %v1064_v37, 8.507059e+37 }
 0x88c   :  { %v1044_v50 = vadd.f32 %v4386_v3, %v1043_v8 }
 0x88e   :  { %v1048_v13 = vsel %vm1047_vm15, %v4386_v3, %v1044_v50  ;;  %v1165_v3 = vld [vmem:[#allocation2 + $0x28] sm:$0x3] }
 0x88f   :  { %v1053_v17 = vsel %vm1050_vm9, %v1052_v11, %v1048_v13  ;;  %v4390_v61 = vpop.eup %4389 }
 0x890   :  { %v1056_v22 = vmul.f32 %v4390_v61, %v1039_v27  ;;  %vm1061_vm0 = vweird.f32 %v4390_v61  ;;  %v1078_v46 = vmul.f32 %v1074_v42, %v1053_v17 }
 0x891   :  { %vm1062_vm2 = vmor %vm1060_vm12, %vm1061_vm0 }
 0x892   :  { %v1057_v29 = vsub.f32 1.0, %v1056_v22 }
 0x894   :  { %v1058_v33 = vmul.f32 %v4390_v61, %v1057_v29 }
 0x896   :  { %v1059_v35 = vadd.f32 %v4390_v61, %v1058_v33 }
 0x898   :  { %v1063_v38 = vsel %vm1062_vm2, %v4390_v61, %v1059_v35 }
 0x899   :  { %v1068_v31 = vsel %vm1065_vm4, %v1067_v41, %v1063_v38 }
 0x89a   :  { %v1079_v48 = vmul.f32 %v1075_v45, %v1068_v31 }
 0x8d6   :  { %v1083_v14 = vpop.permute.xlu2 %1082 }
 0x8e9   :  { %v1085_v16 = vpop.permute.xlu0 %1084 }
 0x8ea   :  { %v1086_v18 = vsel %vm648_vm3, %v1083_v14, %v1085_v16 }
 0x8eb   :  { %v1088_v23 = vmul.f32 %v1086_v18, %v1053_v17 }
 0x8ed   :  { %1090 = vrot.lane.b32.xlu1 %v1088_v23, %s4522_s25 }
 0x95f   :  { %v1091_v49 = vpop.permute.xlu1 %1090 }
 0x960   :  { %v5079_v53 = vadd.f32 %v1091_v49, %v1078_v46  ;;  %v5081_v54 = vadd.f32 %v1091_v49, %v1079_v48 }
 0x962   :  { %4391 = vtanh.f32 %v5079_v53 }
 0x963   :  { %4393 = vtanh.f32 %v5081_v54 }
 0x968   :  { %v4392_v56 = vpop.eup %4391 }
 0x969   :  { %v4394_v58 = vpop.eup %4393  ;;  %1099 = vrot.lane.b32.xlu2 %v4392_v56, %s4522_s25 }
 0x96a   :  { %1101 = vrot.lane.b32.xlu0 %v4394_v58, %s4522_s25 }
 0x9c3   :  { %v1100_v19 = vpop.permute.xlu2 %1099 }
 0x9dc   :  { %v1102_v62 = vpop.permute.xlu0 %1101 }
 0x9dd   :  { %v1103_v20 = vsel %vm551_vm6, %v1100_v19, %v1102_v62  ;;  %v1211_v19 = vrot.slane %v5079_v53, 6  ;;  %v1212_v62 = vrot.slane %v5081_v54, 6 }
 0x9de   :  { %v5088_v63 = vmul.f32 %v1103_v20, %v1068_v31 }
 0x9e0   :  { %v1116_v30 = vpack.c.bf16 %v5088_v63, %v5088_v63 }
 0x9e2   :  { %v1118_v0 = vrot.slane %v1116_v30, 3 }
 0x9e4   :  { %1119 = vrot.lane.b32.xlu1 %v1118_v0, %s4523_s26 }
 0xa56   :  { %v1120_v32 = vpop.permute.xlu1 %1119 }
 0xa57   :  { %4214 = vmatmul.msk.bf16.vlgmr.msrb.gmra.mxu3 %vm551_vm6, %v1120_v32  ;;  %4215 = vmatmul.msk.bf16.vlgmr.msra.gmra.mxu0 %vm551_vm6, %v1120_v32 }
 0xa58   :  { %4216 = vmatmul.msk.bf16.vlgmr.msra.gmra.mxu2 %vm551_vm6, %v1120_v32  ;;  %1433 = vmatpush.bf16.msrb.mxu3 %v4764_v44 }
 0xa59   :  { %1552 = vmatpush.bf16.msra.mxu0 %v4897_v40  ;;  %1565 = vmatpush.bf16.msra.mxu2 %v4735_v26 }
 0xa5c   :  { %1434 = vmatpush.bf16.msrb.mxu3 %v4788_v60 }
 0xa5d   :  { %1553 = vmatpush.bf16.msra.mxu0 %v4902_v43  ;;  %1566 = vmatpush.bf16.msra.mxu2 %v4752_v34  ;;  %v1164_v34 = vld [vmem:[#allocation2 + $0x20] sm:$0x3] }
 0xa60   :  { %1435 = vmatpush.bf16.msrb.mxu3 %v4828_v10 }
 0xa61   :  { %1554 = vmatpush.bf16.msra.mxu0 %v4908_v47  ;;  %1567 = vmatpush.bf16.msra.mxu2 %v4776_v52 }
 0xa64   :  { %1436 = vmatpush.bf16.msrb.mxu3 %v4865_v21 }
 0xa65   :  { %1555 = vmatpush.bf16.msra.mxu0 %v4914_v51  ;;  %1568 = vmatpush.bf16.msra.mxu2 %v4815_v4 }
 0xa68   :  { %1437 = vmatpush.bf16.msrb.mxu3 %v4873_v24 }
 0xa69   :  { %1556 = vmatpush.bf16.msra.mxu0 %v4920_v55  ;;  %1569 = vmatpush.bf16.msra.mxu2 %v4847_v15  ;;  %v1163_v55 = vld [vmem:[#allocation2 + $0x18] sm:$0x3] }
 0xad4   :  { %v1146_v26 = vpop.f32.mrf.mxu0 }
 0xad5   :  { %v1167_v40 = vadd.f32 %v1164_v34, %v1146_v26 }
 0xad7   :  { %4395 = vtanh.f32 %v1167_v40  ;;  %v4218_v35 = vmul.f32 -1.442695, %v1167_v40 }
 0xada   :  { %v1133_v43 = vpop.f32.mrf.mxu3 }
 0xadb   :  { %v1159_v47 = vpop.f32.mrf.mxu2  ;;  %v1166_v15 = vadd.f32 %v1163_v55, %v1133_v43 }
 0xadc   :  { %v1168_v52 = vadd.f32 %v1165_v3, %v1159_v47  ;;  %v1148_v5 = vpop.f32.mrf.mxu0 }
 0xadd   :  { %v4396_v6 = vpop.eup %4395  ;;  %v4217_v50 = vmul.f32 -1.442695, %v1166_v15 }
 0xade   :  { %4397 = vtanh.f32 %v1168_v52  ;;  %1219 = vrot.lane.b32.xlu2 %v4396_v6, %s4521_s2 }
 0xadf   :  { %4399 = vpow2.f32 %v4217_v50  ;;  %v1299_v50 = vld [vmem:[#allocation2 + $0x20] sm:$0xc] }
 0xae2   :  { %v1135_v4 = vpop.f32.mrf.mxu3 }
 0xae3   :  { %v1161_v51 = vpop.f32.mrf.mxu2 }
 0xae4   :  { %v4398_v8 = vpop.eup %4397  ;;  %v1300_v51 = vld [vmem:[#allocation2 + $0x28] sm:$0xc] }
 0xae5   :  { %1221 = vrot.lane.b32.xlu0 %v4398_v8, %s4521_s2  ;;  %v4400_v9 = vpop.eup %4399 }
 0xae6   :  { %v1175_v12 = vadd.f32 1.0, %v4400_v9 }
 0xae8   :  { %4401 = vrcp.f32 %v1175_v12  ;;  %v1188_v18 = vand.u32 2147483648, %v1175_v12  ;;  %vm1182_vm5 = vweird.f32 %v1175_v12  ;;  %v1186_v23 = vand.u32 2147483647, %v1175_v12 }
 0xae9   :  { %4403 = vpow2.f32 %v4218_v35 }
 0xaea   :  { %v1189_v59 = vor.u32 1.1754944e-38, %v1188_v18  ;;  %vm1187_vm8 = vcmp.eq.f32.partialorder %v1186_v23, 8.507059e+37 }
 0xaee   :  { %v4402_v13 = vpop.eup %4401 }
 0xaef   :  { %v1178_v11 = vmul.f32 %v4402_v13, %v1175_v12  ;;  %vm1183_vm1 = vweird.f32 %v4402_v13  ;;  %v4404_v36 = vpop.eup %4403 }
 0xaf0   :  { %vm1184_vm7 = vmor %vm1182_vm5, %vm1183_vm1  ;;  %v1176_v37 = vadd.f32 1.0, %v4404_v36 }
 0xaf1   :  { %v1179_v14 = vsub.f32 1.0, %v1178_v11 }
 0xaf2   :  { %4405 = vrcp.f32 %v1176_v37  ;;  %v1203_v46 = vand.u32 2147483648, %v1176_v37  ;;  %vm1197_vm11 = vweird.f32 %v1176_v37  ;;  %v1201_v48 = vand.u32 2147483647, %v1176_v37 }
 0xaf3   :  { %v1180_v16 = vmul.f32 %v4402_v13, %v1179_v14 }
 0xaf4   :  { %v1204_v56 = vor.u32 1.1754944e-38, %v1203_v46  ;;  %vm1202_vm14 = vcmp.eq.f32.partialorder %v1201_v48, 8.507059e+37 }
 0xaf5   :  { %v1181_v17 = vadd.f32 %v4402_v13, %v1180_v16 }
 0xaf7   :  { %v1185_v25 = vsel %vm1184_vm7, %v4402_v13, %v1181_v17  ;;  %v1298_v13 = vld [vmem:[#allocation2 + $0x18] sm:$0xc]  ;;  %vm673_vm7 = vcmask 320512  }
 0xaf8   :  { %v1190_v22 = vsel %vm1187_vm8, %v1189_v59, %v1185_v25  ;;  %v4406_v38 = vpop.eup %4405  ;;  %vm818_vm8 = vcmask 322562  }
 0xaf9   :  { %v1193_v41 = vmul.f32 %v4406_v38, %v1176_v37  ;;  %vm1198_vm10 = vweird.f32 %v4406_v38  ;;  %v1215_v20 = vmul.f32 %v1211_v19, %v1190_v22 }
 0xafa   :  { %vm1199_vm13 = vmor %vm1197_vm11, %vm1198_vm10  ;;  %vm964_vm10 = vcmask 324612   ;;  %vm1110_vm11 = vcmask 326662  }
 0xafb   :  { %v1194_v31 = vsub.f32 1.0, %v1193_v41 }
 0xafd   :  { %v1195_v42 = vmul.f32 %v4406_v38, %v1194_v31 }
 0xaff   :  { %v1196_v45 = vadd.f32 %v4406_v38, %v1195_v42 }
 0xb01   :  { %v1200_v49 = vsel %vm1199_vm13, %v4406_v38, %v1196_v45 }
 0xb02   :  { %v1205_v58 = vsel %vm1202_vm14, %v1204_v56, %v1200_v49 }
 0xb03   :  { %v1216_v30 = vmul.f32 %v1212_v62, %v1205_v58 }
 0xb38   :  { %v1220_v27 = vpop.permute.xlu2 %1219 }
 0xb57   :  { %v1222_v61 = vpop.permute.xlu0 %1221 }
 0xb58   :  { %v1223_v29 = vsel %vm648_vm3, %v1220_v27, %v1222_v61 }
 0xb59   :  { %v1225_v33 = vmul.f32 %v1223_v29, %v1190_v22 }
 0xb5b   :  { %1227 = vrot.lane.b32.xlu1 %v1225_v33, %s4522_s25 }
 0xbcd   :  { %v1228_v0 = vpop.permute.xlu1 %1227 }
 0xbce   :  { %v5117_v32 = vadd.f32 %v1228_v0, %v1215_v20  ;;  %v5119_v26 = vadd.f32 %v1228_v0, %v1216_v30 }
 0xbd0   :  { %4407 = vtanh.f32 %v5117_v32 }
 0xbd1   :  { %4409 = vtanh.f32 %v5119_v26 }
 0xbd6   :  { %v4408_v34 = vpop.eup %4407 }
 0xbd7   :  { %v4410_v40 = vpop.eup %4409  ;;  %1236 = vrot.lane.b32.xlu2 %v4408_v34, %s4522_s25  ;;  %v1355_v34 = vrot.slane %v5117_v32, 6 }
 0xbd8   :  { %1238 = vrot.lane.b32.xlu0 %v4410_v40, %s4522_s25  ;;  %v1356_v40 = vrot.slane %v5119_v26, 6 }
 0xc31   :  { %v1237_v53 = vpop.permute.xlu2 %1236 }
 0xc4a   :  { %v1239_v43 = vpop.permute.xlu0 %1238 }
 0xc4b   :  { %v1240_v54 = vsel %vm551_vm6, %v1237_v53, %v1239_v43 }
 0xc4c   :  { %v5126_v47 = vmul.f32 %v1240_v54, %v1205_v58 }
 0xc4e   :  { %v1252_v3 = vpack.c.bf16 %v5126_v47, %v5126_v47 }
 0xc50   :  { %1254 = vrot.lane.b32.xlu1 %v1252_v3, %s4523_s26 }
 0xcc2   :  { %v1255_v52 = vpop.permute.xlu1 %1254 }
 0xcc3   :  { %4219 = vmatmul.msk.bf16.vlgmr.msrb.gmra.mxu1 %vm551_vm6, %v1255_v52  ;;  %4220 = vmatmul.msk.bf16.vlgmr.msra.gmra.mxu3 %vm551_vm6, %v1255_v52 }
 0xcc4   :  { %4221 = vmatmul.msk.bf16.vlgmr.msrb.gmra.mxu0 %vm551_vm6, %v1255_v52  ;;  %1578 = vmatpush.bf16.msrb.mxu1 %v4764_v44 }
 0xcc8   :  { %1579 = vmatpush.bf16.msrb.mxu1 %v4788_v60 }
 0xccc   :  { %1580 = vmatpush.bf16.msrb.mxu1 %v4828_v10 }
 0xcd0   :  { %1581 = vmatpush.bf16.msrb.mxu1 %v4865_v21 }
 0xcd4   :  { %1582 = vmatpush.bf16.msrb.mxu1 %v4873_v24 }
 0xd40   :  { %v1268_v5 = vpop.f32.mrf.mxu1 }
 0xd41   :  { %v1294_v6 = vpop.f32.mrf.mxu0  ;;  %v1304_v24 = vrot.slane %v1268_v5, 6 }
 0xd42   :  { %v1306_v4 = vrot.slane %v1294_v6, 6 }
 0xd43   :  { %v1310_v11 = vadd.f32 %v1304_v24, %v1298_v13  ;;  %v1444_v24 = vld [vmem:[#allocation2 + $0x20] sm:$0x30] }
 0xd44   :  { %v1312_v8 = vadd.f32 %v1306_v4, %v1300_v51 }
 0xd45   :  { %v4222_v14 = vmul.f32 -1.442695, %v1310_v11 }
 0xd46   :  { %4411 = vtanh.f32 %v1312_v8  ;;  %v1281_v55 = vpop.f32.mrf.mxu3 }
 0xd47   :  { %v1305_v15 = vrot.slane %v1281_v55, 6 }
 0xd48   :  { %v1270_v9 = vpop.f32.mrf.mxu1 }
 0xd49   :  { %v1311_v12 = vadd.f32 %v1305_v15, %v1299_v50  ;;  %v1296_v44 = vpop.f32.mrf.mxu0 }
 0xd4b   :  { %4413 = vtanh.f32 %v1311_v12  ;;  %v4223_v31 = vmul.f32 -1.442695, %v1311_v12 }
 0xd4c   :  { %v4412_v60 = vpop.eup %4411  ;;  %4415 = vpow2.f32 %v4222_v14 }
 0xd4d   :  { %1365 = vrot.lane.b32.xlu0 %v4412_v60, %s4521_s2 }
 0xd4e   :  { %v1283_v10 = vpop.f32.mrf.mxu3 }
 0xd51   :  { %v4414_v21 = vpop.eup %4413 }
 0xd52   :  { %1363 = vrot.lane.b32.xlu2 %v4414_v21, %s4521_s2  ;;  %v4416_v16 = vpop.eup %4415 }
 0xd53   :  { %v1319_v17 = vadd.f32 1.0, %v4416_v16 }
 0xd55   :  { %4417 = vrcp.f32 %v1319_v17  ;;  %v1332_v61 = vand.u32 2147483648, %v1319_v17  ;;  %vm1326_vm9 = vweird.f32 %v1319_v17  ;;  %v1330_v22 = vand.u32 2147483647, %v1319_v17 }
 0xd56   :  { %4419 = vpow2.f32 %v4223_v31 }
 0xd57   :  { %v1333_v33 = vor.u32 1.1754944e-38, %v1332_v61  ;;  %vm1331_vm12 = vcmp.eq.f32.partialorder %v1330_v22, 8.507059e+37 }
 0xd5b   :  { %v4418_v18 = vpop.eup %4417 }
 0xd5c   :  { %v1322_v23 = vmul.f32 %v4418_v18, %v1319_v17  ;;  %vm1327_vm15 = vweird.f32 %v4418_v18  ;;  %v4420_v42 = vpop.eup %4419 }
 0xd5d   :  { %vm1328_vm0 = vmor %vm1326_vm9, %vm1327_vm15  ;;  %v1320_v45 = vadd.f32 1.0, %v4420_v42 }
 0xd5e   :  { %v1323_v25 = vsub.f32 1.0, %v1322_v23 }
 0xd5f   :  { %4421 = vrcp.f32 %v1320_v45  ;;  %v1347_v19 = vand.u32 2147483648, %v1320_v45  ;;  %vm1341_vm4 = vweird.f32 %v1320_v45  ;;  %v1345_v62 = vand.u32 2147483647, %v1320_v45 }
 0xd60   :  { %v1324_v59 = vmul.f32 %v4418_v18, %v1323_v25 }
 0xd61   :  { %v1348_v30 = vor.u32 1.1754944e-38, %v1347_v19  ;;  %vm1346_vm5 = vcmp.eq.f32.partialorder %v1345_v62, 8.507059e+37 }
 0xd62   :  { %v1325_v27 = vadd.f32 %v4418_v18, %v1324_v59 }
 0xd64   :  { %v1329_v29 = vsel %vm1328_vm0, %v4418_v18, %v1325_v27  ;;  %v1445_v18 = vld [vmem:[#allocation2 + $0x28] sm:$0x30] }
 0xd65   :  { %v1334_v37 = vsel %vm1331_vm12, %v1333_v33, %v1329_v29  ;;  %v4422_v46 = vpop.eup %4421  ;;  %v1443_v29 = vld [vmem:[#allocation2 + $0x18] sm:$0x30] }
 0xd66   :  { %v1337_v48 = vmul.f32 %v4422_v46, %v1320_v45  ;;  %vm1342_vm2 = vweird.f32 %v4422_v46  ;;  %v1359_v53 = vmul.f32 %v1355_v34, %v1334_v37 }
 0xd67   :  { %vm1343_vm1 = vmor %vm1341_vm4, %vm1342_vm2 }
 0xd68   :  { %v1338_v49 = vsub.f32 1.0, %v1337_v48 }
 0xd6a   :  { %v1339_v56 = vmul.f32 %v4422_v46, %v1338_v49 }
 0xd6c   :  { %v1340_v58 = vadd.f32 %v4422_v46, %v1339_v56 }
 0xd6e   :  { %v1344_v20 = vsel %vm1343_vm1, %v4422_v46, %v1340_v58 }
 0xd6f   :  { %v1349_v0 = vsel %vm1346_vm5, %v1348_v30, %v1344_v20 }
 0xd70   :  { %v1360_v43 = vmul.f32 %v1356_v40, %v1349_v0 }
 0xdac   :  { %v1364_v35 = vpop.permute.xlu2 %1363 }
 0xdbf   :  { %v1366_v36 = vpop.permute.xlu0 %1365 }
 0xdc0   :  { %v1367_v38 = vsel %vm648_vm3, %v1364_v35, %v1366_v36 }
 0xdc1   :  { %v1369_v41 = vmul.f32 %v1367_v38, %v1334_v37 }
 0xdc3   :  { %1371 = vrot.lane.b32.xlu1 %v1369_v41, %s4522_s25 }
 0xe35   :  { %v1372_v54 = vpop.permute.xlu1 %1371 }
 0xe36   :  { %v5145_v3 = vadd.f32 %v1372_v54, %v1359_v53  ;;  %v5147_v52 = vadd.f32 %v1372_v54, %v1360_v43 }
 0xe38   :  { %4423 = vtanh.f32 %v5145_v3 }
 0xe39   :  { %4425 = vtanh.f32 %v5147_v52 }
 0xe3e   :  { %v4424_v5 = vpop.eup %4423 }
 0xe3f   :  { %v4426_v6 = vpop.eup %4425  ;;  %1380 = vrot.lane.b32.xlu2 %v4424_v5, %s4522_s25 }
 0xe40   :  { %1382 = vrot.lane.b32.xlu0 %v4426_v6, %s4522_s25 }
 0xe47   :  { %670 = vrot.lane.b32.xlu2 %v4974_v39, %s4523_s26 }
 0xe48   :  { %675 = vrot.lane.b32.xlu0 %v4974_v39, %s4524_s27 }
 0xe4f   :  { %820 = vrot.lane.b32.xlu2 %v5012_v2, %s4524_s27 }
 0xe50   :  { %961 = vrot.lane.b32.xlu0 %v5050_v28, %s4523_s26 }
 0xe58   :  { %966 = vrot.lane.b32.xlu0 %v5050_v28, %s4524_s27 }
 0xe60   :  { %1244 = vrot.lane.b32.xlu0 %v5126_v47, %s4523_s26 }
 0xe99   :  { %v1381_v32 = vpop.permute.xlu2 %1380 }
 0xea1   :  { %v671_v26 = vpop.permute.xlu2 %670 }
 0xea2   :  { %674 = vst.msk [vmem:[#allocation3] sm:$0x3] %vm673_vm7, %v671_v26 }
 0xea9   :  { %v821_v4 = vpop.permute.xlu2 %820 }
 0xeaa   :  { %823 = vst.msk [vmem:[#allocation4 + $0xa] sm:$0xc] %vm818_vm8, %v821_v4 }
 0xeb2   :  { %v1383_v39 = vpop.permute.xlu0 %1382 }
 0xeb3   :  { %v1384_v51 = vsel %vm551_vm6, %v1381_v32, %v1383_v39 }
 0xeb4   :  { %v1386_v8 = vmul.f32 %v1384_v51, %v1349_v0 }
 0xeb6   :  { %1392 = vrot.lane.b32.xlu0 %v1386_v8, %s4524_s27  ;;  %v1396_v55 = vpack.c.bf16 %v1386_v8, %v1386_v8 }
 0xeb8   :  { %v1398_v28 = vrot.slane %v1396_v55, 1 }
 0xeba   :  { %v676_v15 = vpop.permute.xlu0 %675  ;;  %1399 = vrot.lane.b32.xlu1 %v1398_v28, %s4523_s26  ;;  %v1500_v28 = vrot.slane %v5145_v3, 6 }
 0xebb   :  { %678 = vst.msk [vmem:[#allocation4 + $0xe] sm:$0x3] %vm673_vm7, %v676_v15  ;;  %v1501_v15 = vrot.slane %v5147_v52, 6 }
 0xec2   :  { %v962_v50 = vpop.permute.xlu0 %961  ;;  %815 = vrot.lane.b32.xlu1 %v5012_v2, %s4523_s26 }
 0xec3   :  { %965 = vst.msk [vmem:[#allocation3] sm:$0x30] %vm964_vm10, %v962_v50 }
 0xeca   :  { %v967_v9 = vpop.permute.xlu0 %966 }
 0xecb   :  { %969 = vst.msk [vmem:[#allocation4 + $0x6] sm:$0x30] %vm964_vm10, %v967_v9 }
 0xed2   :  { %v1245_v12 = vpop.permute.xlu0 %1244 }
 0xed3   :  { %1247 = vst.msk [vmem:[#allocation3 + $0x8] sm:$0x3] %vm673_vm7, %v1245_v12 }
 0xf28   :  { %v1393_v44 = vpop.permute.xlu0 %1392 }
 0xf29   :  { %1395 = vst.msk [vmem:[#allocation4 + $0x2] sm:$0xc] %vm818_vm8, %v1393_v44 }
 0xf2c   :  { %v1400_v60 = vpop.permute.xlu1 %1399 }
 0xf2d   :  { %4224 = vmatmul.msk.bf16.vlgmr.msrb.gmra.mxu2 %vm551_vm6, %v1400_v60  ;;  %4225 = vmatmul.msk.bf16.vlgmr.msra.gmra.mxu1 %vm551_vm6, %v1400_v60 }
 0xf2e   :  { %4226 = vmatmul.msk.bf16.vlgmr.msrb.gmra.mxu3 %vm551_vm6, %v1400_v60 }
 0xf34   :  { %v816_v10 = vpop.permute.xlu1 %815 }
 0xf35   :  { %819 = vst.msk [vmem:[#allocation3] sm:$0xc] %vm818_vm8, %v816_v10 }
 0xfaa   :  { %v1426_v2 = vpop.f32.mrf.mxu1 }
 0xfab   :  { %v1450_v21 = vrot.slane %v1426_v2, 4 }
 0xfad   :  { %v1456_v13 = vadd.f32 %v1450_v21, %v1444_v24 }
 0xfaf   :  { %4427 = vtanh.f32 %v1456_v13  ;;  %v4228_v40 = vmul.f32 -1.442695, %v1456_v13 }
 0xfb0   :  { %v1413_v11 = vpop.f32.mrf.mxu2 }
 0xfb1   :  { %v1439_v14 = vpop.f32.mrf.mxu3  ;;  %v1449_v22 = vrot.slane %v1413_v11, 4 }
 0xfb2   :  { %v1451_v16 = vrot.slane %v1439_v14, 4  ;;  %v1428_v17 = vpop.f32.mrf.mxu1  ;;  %v1838_v14 = vshrl.u32 %v55_v57, 7 }
 0xfb3   :  { %v1455_v33 = vadd.f32 %v1449_v22, %v1443_v29  ;;  %v5215_v17 = vld [vmem:[%s6595_s9] sm:$0xff] }
 0xfb4   :  { %v1457_v23 = vadd.f32 %v1451_v16, %v1445_v18  ;;  %4324 = vset.pattern.permute.xlu2 %v1838_v14  ;;  %4323 = vset.pattern.permute.xlu1 %v1838_v14  ;;  %v1869_v18 = vperm.slane %v5215_v17, 2  ;;  %v1876_v57 = vperm.slane %v5215_v17, 3  ;;  %v4328_v29 = vld [vmem:[%s6594_s8] ss:$0 sm:$0xff] }
 0xfb5   :  { %v4428_v25 = vpop.eup %4427  ;;  %v4227_v35 = vmul.f32 -1.442695, %v1455_v33  ;;  %4322 = vset.pattern.permute.xlu0 %v1838_v14 }
 0xfb6   :  { %4429 = vtanh.f32 %v1457_v23  ;;  %1508 = vrot.lane.b32.xlu1 %v4428_v25, %s4521_s2  ;;  %v1862_v23 = vperm.slane %v5215_v17, 1  ;;  %v1883_v25 = vperm.slane %v5215_v17, 4 }
 0xfb7   :  { %4431 = vpow2.f32 %v4227_v35 }
 0xfb8   :  { %v1415_v59 = vpop.f32.mrf.mxu2 }
 0xfb9   :  { %v1441_v27 = vpop.f32.mrf.mxu3  ;;  %v1897_v59 = vperm.slane %v5215_v17, 6 }
 0xfba   :  { %v1890_v27 = vperm.slane %v5215_v17, 5 }
 0xfbc   :  { %v4430_v61 = vpop.eup %4429 }
 0xfbd   :  { %1510 = vrot.lane.b32.xlu2 %v4430_v61, %s4521_s2  ;;  %v4432_v36 = vpop.eup %4431 }
 0xfbe   :  { %1107 = vrot.lane.b32.xlu1 %v5088_v63, %s4523_s26  ;;  %v1464_v37 = vadd.f32 1.0, %v4432_v36 }
 0xfc0   :  { %4433 = vrcp.f32 %v1464_v37  ;;  %v1477_v46 = vand.u32 2147483648, %v1464_v37  ;;  %vm1471_vm14 = vweird.f32 %v1464_v37  ;;  %v1475_v48 = vand.u32 2147483647, %v1464_v37 }
 0xfc1   :  { %4435 = vpow2.f32 %v4228_v40 }
 0xfc2   :  { %v1478_v58 = vor.u32 1.1754944e-38, %v1477_v46  ;;  %vm1476_vm9 = vcmp.eq.f32.partialorder %v1475_v48, 8.507059e+37 }
 0xfc5   :  { %1112 = vrot.lane.b32.xlu2 %v5088_v63, %s4524_s27 }
 0xfc6   :  { %1248 = vrot.lane.b32.xlu1 %v5126_v47, %s4524_s27  ;;  %v4434_v38 = vpop.eup %4433 }
 0xfc7   :  { %v1467_v41 = vmul.f32 %v4434_v38, %v1464_v37  ;;  %vm1472_vm13 = vweird.f32 %v4434_v38  ;;  %v4436_v53 = vpop.eup %4435  ;;  %v1590_v37 = vld [vmem:[#allocation2 + $0x28] sm:$0xc0] }
 0xfc8   :  { %vm1473_vm15 = vmor %vm1471_vm14, %vm1472_vm13  ;;  %v1465_v43 = vadd.f32 1.0, %v4436_v53 }
 0xfc9   :  { %v1468_v42 = vsub.f32 1.0, %v1467_v41 }
 0xfca   :  { %4437 = vrcp.f32 %v1465_v43  ;;  %v1492_v4 = vand.u32 2147483648, %v1465_v43  ;;  %vm1486_vm12 = vweird.f32 %v1465_v43  ;;  %v1490_v39 = vand.u32 2147483647, %v1465_v43 }
 0xfcb   :  { %v1469_v45 = vmul.f32 %v4434_v38, %v1468_v42  ;;  %v1589_v42 = vld [vmem:[#allocation2 + $0x20] sm:$0xc0] }
 0xfcc   :  { %vm1491_vm4 = vcmp.eq.f32.partialorder %v1490_v39, 8.507059e+37 }
 0xfcd   :  { %1388 = vrot.lane.b32.xlu2 %v1386_v8, %s4523_s26  ;;  %v1470_v47 = vadd.f32 %v4434_v38, %v1469_v45  ;;  %v1493_v8 = vor.u32 1.1754944e-38, %v1492_v4 }
 0xfcf   :  { %v1474_v49 = vsel %vm1473_vm15, %v4434_v38, %v1470_v47  ;;  %vm1721_vm15 = vcmask 1043456  }
 0xfd0   :  { %v1479_v62 = vsel %vm1476_vm9, %v1478_v58, %v1474_v49  ;;  %v4438_v54 = vpop.eup %4437  ;;  %v1904_v58 = vperm.slane %v5215_v17, 7 }
 0xfd1   :  { %v1482_v5 = vmul.f32 %v4438_v54, %v1465_v43  ;;  %vm1487_vm0 = vweird.f32 %v4438_v54  ;;  %v1504_v50 = vmul.f32 %v1500_v28, %v1479_v62 }
 0xfd2   :  { %vm1488_vm2 = vmor %vm1486_vm12, %vm1487_vm0  ;;  %vm2015_vm12 = vcmask 1041409  }
 0xfd3   :  { %v1483_v6 = vsub.f32 1.0, %v1482_v5 }
 0xfd5   :  { %v1484_v32 = vmul.f32 %v4438_v54, %v1483_v6 }
 0xfd7   :  { %v1485_v26 = vadd.f32 %v4438_v54, %v1484_v32 }
 0xfd9   :  { %v1489_v51 = vsel %vm1488_vm2, %v4438_v54, %v1485_v26  ;;  %vm2017_vm2 = vcmask 1042434  }
 0xfda   :  { %v1494_v55 = vsel %vm1491_vm4, %v1493_v8, %v1489_v51  ;;  %vm2019_vm4 = vcmask 1043459  }
 0xfdb   :  { %v1505_v9 = vmul.f32 %v1501_v15, %v1494_v55 }
0x1017   :  { %v1511_v31 = vpop.permute.xlu2 %1510 }
0x101f   :  { %v1113_v63 = vpop.permute.xlu2 %1112 }
0x1020   :  { %1115 = vst.msk [vmem:[#allocation4 + $0x2] sm:$0xc0] %vm1110_vm11, %v1113_v63 }
0x1027   :  { %v1389_v56 = vpop.permute.xlu2 %1388 }
0x1028   :  { %1391 = vst.msk [vmem:[#allocation3 + $0x8] sm:$0xc] %vm818_vm8, %v1389_v56  ;;  %v1509_v19 = vpop.permute.xlu1 %1508  ;;  %v1855_v56 = vperm.slane %v5215_v17, 0 }
0x1029   :  { %v1512_v20 = vsel %vm648_vm3, %v1509_v19, %v1511_v31 }
0x102a   :  { %v1514_v30 = vmul.f32 %v1512_v20, %v1479_v62  ;;  %v1588_v62 = vld [vmem:[#allocation2 + $0x18] sm:$0xc0] }
0x102c   :  { %1516 = vrot.lane.b32.xlu1 %v1514_v30, %s4522_s25 }
0x1030   :  { %v1108_v0 = vpop.permute.xlu1 %1107 }
0x1031   :  { %1111 = vst.msk [vmem:[#allocation3] sm:$0xc0] %vm1110_vm11, %v1108_v0 }
0x1038   :  { %v1249_v34 = vpop.permute.xlu1 %1248 }
0x1039   :  { %1251 = vst.msk [vmem:[#allocation4 + $0x6] sm:$0x3] %vm673_vm7, %v1249_v34 }
0x109e   :  { %v1517_v12 = vpop.permute.xlu1 %1516 }
0x109f   :  { %v5198_v44 = vadd.f32 %v1517_v12, %v1504_v50  ;;  %v5200_v60 = vadd.f32 %v1517_v12, %v1505_v9 }
0x10a1   :  { %4439 = vtanh.f32 %v5198_v44 }
0x10a2   :  { %4441 = vtanh.f32 %v5200_v60 }
0x10a7   :  { %v4440_v10 = vpop.eup %4439 }
0x10a8   :  { %v4442_v2 = vpop.eup %4441  ;;  %1525 = vrot.lane.b32.xlu2 %v4440_v10, %s4522_s25 }
0x10a9   :  { %1527 = vrot.lane.b32.xlu0 %v4442_v2, %s4522_s25 }
0x1102   :  { %v1526_v3 = vpop.permute.xlu2 %1525 }
0x111b   :  { %v1528_v21 = vpop.permute.xlu0 %1527 }
0x111c   :  { %v1529_v52 = vsel %vm551_vm6, %v1526_v3, %v1528_v21 }
0x111d   :  { %v1531_v24 = vmul.f32 %v1529_v52, %v1494_v55 }
0x111f   :  { %1537 = vrot.lane.b32.xlu2 %v1531_v24, %s4524_s27  ;;  %1533 = vrot.lane.b32.xlu1 %v1531_v24, %s4523_s26  ;;  %v1541_v13 = vpack.c.bf16 %v1531_v24, %v1531_v24 }
0x1121   :  { %v1543_v11 = vrot.slane %v1541_v13, 2 }
0x1123   :  { %1544 = vrot.lane.b32.xlu0 %v1543_v11, %s4523_s26 }
0x1127   :  { %1874 = vperm.xlu2 %4324, %v1869_v18   ;;  %1867 = vperm.xlu1 %4323, %v1862_v23  }
0x112b   :  { %1860 = vperm.xlu0 %4322, %v1855_v56  }
0x112f   :  { %1888 = vperm.xlu2 %4324, %v1883_v25   ;;  %1881 = vperm.xlu1 %4323, %v1876_v57  }
0x1133   :  { %1909 = vperm.xlu0 %4322, %v1904_v58  }
0x1137   :  { %1902 = vperm.xlu2 %4324, %v1897_v59   ;;  %1895 = vperm.xlu1 %4323, %v1890_v27  }
0x113f   :  { %2098 = vperm.xlu2 %4324, %v4706_v7  }
0x1147   :  { %3800 = vperm.xlu2 %4324, %v4328_v29  }
0x1179   :  { %v1538_v16 = vpop.permute.xlu2 %1537 }
0x117a   :  { %1540 = vst.msk [vmem:[#allocation4 - $0x2] sm:$0x30] %vm964_vm10, %v1538_v16 }
0x1181   :  { %v5235_v30 = vpop.permute.xlu2 %1874 }
0x1189   :  { %v5237_v34 = vpop.permute.xlu2 %1888 }
0x1191   :  { %v1534_v61 = vpop.permute.xlu1 %1533  ;;  %v5239_v43 = vpop.permute.xlu2 %1902 }
0x1192   :  { %1536 = vst.msk [vmem:[#allocation3 + $0x8] sm:$0x30] %vm964_vm10, %v1534_v61 }
0x1195   :  { %v1545_v22 = vpop.permute.xlu0 %1544 }
0x1196   :  { %4229 = vmatmul.msk.bf16.vlgmr.msra.gmra.mxu0 %vm551_vm6, %v1545_v22  ;;  %4230 = vmatmul.msk.bf16.vlgmr.msra.gmra.mxu2 %vm551_vm6, %v1545_v22 }
0x1197   :  { %4231 = vmatmul.msk.bf16.vlgmr.msrb.gmra.mxu1 %vm551_vm6, %v1545_v22 }
0x1199   :  { %v5241_v54 = vpop.permute.xlu1 %1867  ;;  %v5243_v6 = vpop.permute.xlu2 %2098 }
0x119d   :  { %v5253_v18 = vpop.permute.xlu0 %1860 }
0x11a1   :  { %v5245_v32 = vpop.permute.xlu1 %1881  ;;  %v5247_v51 = vpop.permute.xlu2 %3800 }
0x11a5   :  { %v5255_v27 = vpop.permute.xlu0 %1909 }
0x11a9   :  { %v5249_v8 = vpop.permute.xlu1 %1895 }
0x1213   :  { %v1558_v33 = vpop.f32.mrf.mxu0 }
0x1214   :  { %v1584_v35 = vpop.f32.mrf.mxu1  ;;  %v1594_v19 = vrot.slane %v1558_v33, 2  ;;  %v1645_v33 = vrot.slane %v5198_v44, 6  ;;  %v1693_v44 = vld [vmem:[%s6590_s4 + $0x10] sm:$0xf] }
0x1215   :  { %v1596_v36 = vrot.slane %v1584_v35, 2  ;;  %v1646_v35 = vrot.slane %v5200_v60, 6 }
0x1216   :  { %v1600_v20 = vadd.f32 %v1594_v19, %v1588_v62 }
0x1217   :  { %v1602_v38 = vadd.f32 %v1596_v36, %v1590_v37 }
0x1218   :  { %v4232_v0 = vmul.f32 -1.442695, %v1600_v20 }
0x1219   :  { %4443 = vtanh.f32 %v1602_v38  ;;  %v1571_v41 = vpop.f32.mrf.mxu2 }
0x121a   :  { %v1595_v31 = vrot.slane %v1571_v41, 2 }
0x121b   :  { %v1560_v45 = vpop.f32.mrf.mxu0 }
0x121c   :  { %v1601_v63 = vadd.f32 %v1595_v31, %v1589_v42  ;;  %v1586_v47 = vpop.f32.mrf.mxu1 }
0x121d   :  { %v1748_v47 = vunpack.c.l.b16 %v1693_v44 }
0x121e   :  { %4445 = vtanh.f32 %v1601_v63  ;;  %v4233_v52 = vmul.f32 -1.442695, %v1601_v63  ;;  %v1701_v63 = vld [vmem:[%s6591_s5 + $0x10] sm:$0xf] }
0x121f   :  { %v4444_v46 = vpop.eup %4443  ;;  %4447 = vpow2.f32 %v4232_v0  ;;  %v1711_v60 = vunpack.c.l.b16 %v1701_v63  ;;  %v4297_v0 = vld [vmem:[%s6591_s5 + $0x8] sm:$0xff] }
0x1220   :  { %1655 = vrot.lane.b32.xlu2 %v4444_v46, %s4521_s2 }
0x1221   :  { %v1573_v48 = vpop.f32.mrf.mxu2  ;;  %v1714_v46 = vpack.c.b16 %v1711_v60, %v1711_v60 }
0x1222   :  { %v1751_v48 = vpack.c.b16 %v1748_v47, %v1748_v47 }
0x1224   :  { %v4446_v49 = vpop.eup %4445  ;;  %v1758_v56 = vsel %vm1721_vm15, %v1751_v48, 0 }
0x1225   :  { %1653 = vrot.lane.b32.xlu1 %v4446_v49, %s4521_s2  ;;  %v4448_v40 = vpop.eup %4447  ;;  %v1723_v49 = vsel %vm1721_vm15, %v1714_v46, 0  ;;  %1765 = vmatpush.bf16.msrb.mxu0 %v1758_v56 }
0x1226   :  { %v1609_v53 = vadd.f32 1.0, %v4448_v40  ;;  %1730 = vmatpush.bf16.msra.mxu3 %v1723_v49  ;;  %v4295_v40 = vld [vmem:[%s6590_s4 + $0x8] sm:$0xff] }
0x1228   :  { %4449 = vrcp.f32 %v1609_v53  ;;  %v1622_v28 = vand.u32 2147483648, %v1609_v53  ;;  %vm1616_vm5 = vweird.f32 %v1609_v53  ;;  %v1620_v15 = vand.u32 2147483647, %v1609_v53 }
0x1229   :  { %4451 = vpow2.f32 %v4233_v52  ;;  %1766 = vmatpush.bf16.msrb.mxu0 %v4295_v40 }
0x122a   :  { %v1623_v9 = vor.u32 1.1754944e-38, %v1622_v28  ;;  %vm1621_vm8 = vcmp.eq.f32.partialorder %v1620_v15, 8.507059e+37  ;;  %1731 = vmatpush.bf16.msra.mxu3 %v4297_v0  ;;  %v1686_v15 = vld [vmem:[#allocation3] sm:$0xff] }
0x122e   :  { %v4450_v5 = vpop.eup %4449 }
0x122f   :  { %v1612_v26 = vmul.f32 %v4450_v5, %v1609_v53  ;;  %vm1617_vm1 = vweird.f32 %v4450_v5  ;;  %v4452_v24 = vpop.eup %4451  ;;  %v4296_v53 = vld [vmem:[%s6591_s5] sm:$0xff] }
0x1230   :  { %vm1618_vm7 = vmor %vm1616_vm5, %vm1617_vm1  ;;  %v1610_v13 = vadd.f32 1.0, %v4452_v24  ;;  %1732 = vmatpush.bf16.msra.mxu3 %v4296_v53  ;;  %vm2021_vm1 = vcmask 1044484   ;;  %vm2023_vm5 = vcmask 1045509  }
0x1231   :  { %v1613_v4 = vsub.f32 1.0, %v1612_v26 }
0x1232   :  { %4453 = vrcp.f32 %v1610_v13  ;;  %v1637_v57 = vand.u32 2147483648, %v1610_v13  ;;  %vm1631_vm13 = vweird.f32 %v1610_v13  ;;  %v1635_v59 = vand.u32 2147483647, %v1610_v13 }
0x1233   :  { %v1614_v39 = vmul.f32 %v4450_v5, %v1613_v4 }
0x1234   :  { %v1638_v22 = vor.u32 1.1754944e-38, %v1637_v57  ;;  %vm1636_vm14 = vcmp.eq.f32.partialorder %v1635_v59, 8.507059e+37 }
0x1235   :  { %v1615_v55 = vadd.f32 %v4450_v5, %v1614_v39 }
0x1237   :  { %v1619_v50 = vsel %vm1618_vm7, %v4450_v5, %v1615_v55  ;;  %v4294_v5 = vld [vmem:[%s6590_s4] sm:$0xff]  ;;  %v1695_v55 = vld [vmem:[#allocation4 + $0x8] sm:$0xff]  ;;  %vm2025_vm7 = vcmask 1046534  }
0x1238   :  { %v1624_v2 = vsel %vm1621_vm8, %v1623_v9, %v1619_v50  ;;  %v4454_v11 = vpop.eup %4453  ;;  %1767 = vmatpush.bf16.msrb.mxu0 %v4294_v5  ;;  %vm2027_vm8 = vcmask 1047559  }
0x1239   :  { %v1627_v14 = vmul.f32 %v4454_v11, %v1610_v13  ;;  %vm1632_vm10 = vweird.f32 %v4454_v11  ;;  %v1649_v36 = vmul.f32 %v1645_v33, %v1624_v2 }
0x123b   :  { %v1628_v16 = vsub.f32 1.0, %v1627_v14 }
0x123d   :  { %v1629_v23 = vmul.f32 %v4454_v11, %v1628_v16 }
0x123f   :  { %v1630_v25 = vadd.f32 %v4454_v11, %v1629_v23 }
0x127a   :  { %v1656_v12 = vpop.permute.xlu2 %1655 }
0x1297   :  { %v1654_v10 = vpop.permute.xlu1 %1653 }
0x1298   :  { %v1657_v3 = vsel %vm648_vm3, %v1654_v10, %v1656_v12  ;;  %vm1633_vm3 = vmor %vm1631_vm13, %vm1632_vm10  ;;  %v4329_v10 = vld [vmem:[%s6592_s6] ss:$0 sm:$0xff] }
0x1299   :  { %v1659_v21 = vmul.f32 %v1657_v3, %v1624_v2  ;;  %v1634_v61 = vsel %vm1633_vm3, %v4454_v11, %v1630_v25 }
0x129a   :  { %v1639_v29 = vsel %vm1636_vm14, %v1638_v22, %v1634_v61 }
0x129b   :  { %1661 = vrot.lane.b32.xlu0 %v1659_v21, %s4522_s25  ;;  %v1650_v37 = vmul.f32 %v1646_v35, %v1639_v29 }
0x130d   :  { %v1662_v38 = vpop.permute.xlu0 %1661 }
0x130e   :  { %v1664_v41 = vadd.f32 %v1662_v38, %v1649_v36  ;;  %v1665_v31 = vadd.f32 %v1662_v38, %v1650_v37 }
0x1310   :  { %4455 = vtanh.f32 %v1664_v41 }
0x1311   :  { %4457 = vtanh.f32 %v1665_v31 }
0x1316   :  { %v4456_v42 = vpop.eup %4455 }
0x1317   :  { %v4458_v45 = vpop.eup %4457  ;;  %1670 = vrot.lane.b32.xlu1 %v4456_v42, %s4522_s25 }
0x1318   :  { %1672 = vrot.lane.b32.xlu2 %v4458_v45, %s4522_s25 }
0x1372   :  { %v1673_v58 = vpop.permute.xlu2 %1672 }
0x1389   :  { %v1671_v19 = vpop.permute.xlu1 %1670 }
0x138a   :  { %v1674_v62 = vsel %vm551_vm6, %v1671_v19, %v1673_v58  ;;  %vm1717_vm6 = vcmask 326656  }
0x138b   :  { %v1676_v20 = vmul.f32 %v1674_v62, %v1639_v29  ;;  %v4330_v29 = vld [vmem:[%s6593_s7] ss:$0 sm:$0xff]  ;;  %s4525_s7 = smov [#allocation8]  }
0x138c   :  { %s4010_s22 = sshll.u32 %s4525_s7, 4  ;;  %s4011_s22 = int_to_ptr.vmem [resolvable:$true] %s4010_s22 }
0x138d   :  { %1682 = vrot.lane.b32.xlu1 %v1676_v20, %s4524_s27  ;;  %1678 = vrot.lane.b32.xlu0 %v1676_v20, %s4523_s26 }
0x13ff   :  { %v1683_v26 = vpop.permute.xlu1 %1682  ;;  %v1679_v4 = vpop.permute.xlu0 %1678 }
0x1400   :  { %1685 = vst.msk [vmem:[#allocation4 - $0x6] sm:$0xc0] %vm1110_vm11, %v1683_v26 }
0x1401   :  { %1681 = vst.msk [vmem:[#allocation3 + $0x8] sm:$0xc0] %vm1110_vm11, %v1679_v4  ;;  %vm1794_vm11 = vcmask 64512  }
0x1407   :  { %v1694_v39 = vld [vmem:[#allocation4] sm:$0xff] }
0x1408   :  { %v1696_v28 = vpack.c.bf16 %v1695_v55, %v1694_v39  ;;  %v1687_v50 = vld [vmem:[#allocation3 + $0x8] sm:$0xff] }
0x1409   :  { %v1688_v9 = vpack.c.bf16 %v1687_v50, %v1686_v15 }
0x140a   :  { %4242 = vmatmul.msk.bf16.vlgmr.msra.gmra.mxu3 %vm1717_vm6, %v1696_v28 }
0x140b   :  { %4251 = vmatmul.msk.bf16.vlgmr.msrb.gmra.mxu0 %vm1717_vm6, %v1688_v9 }
0x1488   :  { %v1769_v12 = vpop.f32.mrf.mxu0 }
0x148d   :  { %v1734_v2 = vpop.f32.mrf.mxu3 }
0x148e   :  { %v1770_v3 = vadd.f32 %v1769_v12, %v1734_v2 }
0x1490   :  { %v1778_v21 = vadd.f32 %v4329_v10, %v1770_v3  ;;  %v1771_v11 = vpop.f32.mrf.mxu0 }
0x1492   :  { %v2224_v52 = vperm.slane %v1778_v21, 4  ;;  %v1843_v24 = vperm.slane %v1778_v21, 3  ;;  %v1836_v13 = vperm.slane %v1778_v21, 2  ;;  %v2541_v25 = vperm.slane %v1778_v21, 7 }
0x1493   :  { %v2231_v57 = vperm.slane %v1778_v21, 5  ;;  %v2534_v61 = vperm.slane %v1778_v21, 6  ;;  %v1785_v33 = vadd.f32 %v4330_v29, %v1778_v21 }
0x1494   :  { %2229 = vperm.xlu0 %4322, %v2224_v52   ;;  %1848 = vperm.xlu2 %4324, %v1843_v24  }
0x1495   :  { %1841 = vperm.xlu1 %4323, %v1836_v13   ;;  %v1736_v14 = vpop.f32.mrf.mxu3  ;;  %v1787_v35 = vrot.slane %v1785_v33, 1  ;;  %v1788_v38 = vperm.slane %v1785_v33, 0 }
0x1496   :  { %v1772_v16 = vadd.f32 %v1771_v11, %v1736_v14 }
0x1497   :  { %v1789_v36 = vperm.slane %v1787_v35, 0  ;;  %v5297_v31 = vadd.f32 %v1788_v38, %v5215_v17 }
0x1498   :  { %v1779_v23 = vadd.f32 %v4329_v10, %v1772_v16 }
0x1499   :  { %v5292_v37 = vadd.f32 %v1789_v36, %v5215_v17  ;;  %v1795_v42 = vsel %vm1794_vm11, %v5297_v31, -inf }
0x149a   :  { %v2845_v59 = vperm.slane %v1779_v23, 0  ;;  %v2852_v22 = vperm.slane %v1779_v23, 1  ;;  %v3465_v45 = vperm.slane %v1779_v23, 4  ;;  %v3472_v63 = vperm.slane %v1779_v23, 5 }
0x149b   :  { %v1798_v41 = vsel %vm1794_vm11, %v5292_v37, -inf  ;;  %v3155_v44 = vperm.slane %v1779_v23, 2  ;;  %v3162_v60 = vperm.slane %v1779_v23, 3  ;;  %v3775_v47 = vperm.slane %v1779_v23, 6 }
0x149c   :  { %2546 = vperm.xlu0 %4322, %v2541_v25   ;;  %2236 = vperm.xlu2 %4324, %v2231_v57   ;;  %v3782_v46 = vperm.slane %v1779_v23, 7 }
0x149d   :  { %2850 = vperm.xlu1 %4323, %v2845_v59  }
0x14a4   :  { %2539 = vperm.xlu2 %4324, %v2534_v61  }
0x14a5   :  { %2857 = vperm.xlu1 %4323, %v2852_v22  }
0x14ad   :  { %4325 = vset.pattern.permute.xlu1 %v4515_v1 }
0x14c6   :  { %1799 = vmax.xlane.f32.xlu0 %v1798_v41 }
0x14cd   :  { %1796 = vmax.xlane.f32.xlu2 %v1795_v42 }
0x14da   :  { %3470 = vperm.xlu0 %4322, %v3465_v45  }
0x14e2   :  { %3477 = vperm.xlu0 %4322, %v3472_v63  }
0x14e5   :  { %3160 = vperm.xlu2 %4324, %v3155_v44  }
0x14ea   :  { %4327 = vset.pattern.permute.xlu0 %v4515_v1 }
0x14ed   :  { %3167 = vperm.xlu2 %4324, %v3162_v60  }
0x14ee   :  { %v1849_v17 = vpop.permute.xlu2 %1848 }
0x14f5   :  { %3780 = vperm.xlu2 %4324, %v3775_v47  }
0x14f6   :  { %v5303_v48 = vpop.permute.xlu2 %2236 }
0x14fd   :  { %3787 = vperm.xlu2 %4324, %v3782_v46  }
0x14fe   :  { %v5305_v49 = vpop.permute.xlu2 %2539 }
0x1505   :  { %4326 = vset.pattern.permute.xlu2 %v4515_v1 }
0x1506   :  { %v5307_v56 = vpop.permute.xlu0 %2229 }
0x1507   :  { %v1842_v58 = vpop.permute.xlu1 %1841 }
0x150e   :  { %v5318_v1 = vpop.permute.xlu0 %2546 }
0x150f   :  { %v5401_v29 = vpop.permute.xlu1 %2850 }
0x1517   :  { %v5405_v36 = vpop.permute.xlu1 %2857 }
0x1539   :  { %v1800_v4 = vpop.xlane.xlu0 %1799 }
0x153a   :  { %v1853_v39 = vadd.f32 %v1849_v17, %v1800_v4  ;;  %vm1802_vm9 = vcmp.eq.f32.partialorder %v5292_v37, %v1800_v4 }
0x153b   :  { %v1804_v24 = vsel %vm1802_vm9, %v4706_v7, 8 }
0x153c   :  { %v5342_v15 = vadd.f32 %v5235_v30, %v1853_v39  ;;  %v5348_v50 = vadd.f32 %v5241_v54, %v1853_v39  ;;  %v5351_v9 = vadd.f32 %v5253_v18, %v1853_v39  ;;  %v5354_v12 = vadd.f32 %v5249_v8, %v1853_v39 }
0x153d   :  { %v5360_v10 = vadd.f32 %v5237_v34, %v1853_v39  ;;  %v5363_v2 = vadd.f32 %v5245_v32, %v1853_v39  ;;  %v5368_v3 = vadd.f32 %v5255_v27, %v1853_v39  ;;  %v5371_v21 = vadd.f32 %v5239_v43, %v1853_v39 }
0x153e   :  { %v5382_v11 = vsel %vm1794_vm11, %v1804_v24, 2147483647 }
0x153f   :  { %v1822_v23 = vshra.s32 %v5382_v11, 16 }
0x1540   :  { %v1797_v19 = vpop.xlane.xlu2 %1796 }
0x1541   :  { %v1852_v62 = vadd.f32 %v1842_v58, %v1797_v19  ;;  %vm1801_vm0 = vcmp.eq.f32.partialorder %v5297_v31, %v1797_v19  ;;  %v5391_v57 = vcvt.s32.f32 %v1822_v23 }
0x1542   :  { %v1803_v13 = vsel %vm1801_vm0, %v4706_v7, 8 }
0x1543   :  { %v5310_v20 = vadd.f32 %v5241_v54, %v1852_v62  ;;  %v5313_v0 = vadd.f32 %v5253_v18, %v1852_v62  ;;  %v5316_v40 = vadd.f32 %v5235_v30, %v1852_v62  ;;  %v5324_v53 = vadd.f32 %v5237_v34, %v1852_v62 }
0x1544   :  { %v5327_v5 = vadd.f32 %v5245_v32, %v1852_v62  ;;  %v5330_v26 = vadd.f32 %v5255_v27, %v1852_v62  ;;  %v5336_v55 = vadd.f32 %v5239_v43, %v1852_v62  ;;  %v5339_v28 = vadd.f32 %v5249_v8, %v1852_v62 }
0x1545   :  { %1955 = vperm.xlu2 %4326, %v5310_v20   ;;  %1952 = vperm.xlu1 %4325, %v5313_v0   ;;  %v5385_v14 = vsel %vm1794_vm11, %v1803_v13, 2147483647 }
0x1546   :  { %1958 = vperm.xlu0 %4327, %v5316_v40   ;;  %v1807_v25 = vshra.s32 %v5385_v14, 16 }
0x1548   :  { %v5375_v52 = vpop.permute.xlu2 %3160  ;;  %v5393_v59 = vcvt.s32.f32 %v1807_v25 }
0x154c   :  { %v5403_v33 = vpop.permute.xlu0 %3470 }
0x154d   :  { %1964 = vperm.xlu2 %4326, %v5324_v53   ;;  %1961 = vperm.xlu1 %4325, %v5327_v5  }
0x154e   :  { %1973 = vperm.xlu0 %4327, %v5330_v26  }
0x1550   :  { %v5387_v16 = vpop.permute.xlu2 %3167 }
0x1554   :  { %v5407_v37 = vpop.permute.xlu0 %3477 }
0x1555   :  { %1970 = vperm.xlu2 %4326, %v5336_v55   ;;  %1967 = vperm.xlu1 %4325, %v5339_v28  }
0x1556   :  { %1982 = vperm.xlu0 %4327, %v5342_v15  }
0x1558   :  { %v5397_v61 = vpop.permute.xlu2 %3780 }
0x155d   :  { %1979 = vperm.xlu2 %4326, %v5348_v50   ;;  %1976 = vperm.xlu1 %4325, %v5351_v9  }
0x155e   :  { %1991 = vperm.xlu0 %4327, %v5354_v12  }
0x1560   :  { %v5399_v22 = vpop.permute.xlu2 %3787 }
0x1561   :  { %6622 = vst [vmem:[#allocation11_spill] sm:$0xff] %v5399_v22 }
0x1565   :  { %1988 = vperm.xlu2 %4326, %v5360_v10   ;;  %1985 = vperm.xlu1 %4325, %v5363_v2  }
0x156d   :  { %1997 = vperm.xlu2 %4326, %v5368_v3   ;;  %1994 = vperm.xlu1 %4325, %v5371_v21  }
0x1596   :  { %1825 = vmin.xlane.f32.xlu2 %v5391_v57 }
0x1597   :  { %1810 = vmin.xlane.f32.xlu1 %v5393_v59 }
0x159f   :  { %v1956_v35 = vpop.permute.xlu2 %1955 }
0x15a7   :  { %v1965_v38 = vpop.permute.xlu2 %1964 }
0x15af   :  { %v1971_v45 = vpop.permute.xlu2 %1970 }
0x15b7   :  { %v1953_v41 = vpop.permute.xlu1 %1952  ;;  %v1980_v60 = vpop.permute.xlu2 %1979 }
0x15b8   :  { %v1959_v31 = vpop.permute.xlu0 %1958  ;;  %v2008_v19 = vperm.slane %v1980_v60, %v4706_v7 }
0x15bf   :  { %v1962_v42 = vpop.permute.xlu1 %1961  ;;  %v1989_v58 = vpop.permute.xlu2 %1988 }
0x15c0   :  { %v1974_v44 = vpop.permute.xlu0 %1973  ;;  %v2011_v25 = vperm.slane %v1989_v58, %v4706_v7 }
0x15c7   :  { %v1968_v63 = vpop.permute.xlu1 %1967  ;;  %v1998_v22 = vpop.permute.xlu2 %1997 }
0x15c8   :  { %v1983_v46 = vpop.permute.xlu0 %1982 }
0x15c9   :  { %v2009_v39 = vperm.slane %v1983_v46, %v4706_v7 }
0x15cf   :  { %v1977_v47 = vpop.permute.xlu1 %1976 }
0x15d0   :  { %v2007_v17 = vperm.slane %v1977_v47, %v4706_v7  ;;  %v1992_v47 = vpop.permute.xlu0 %1991 }
0x15d2   :  { %v2029_v62 = vsel %vm2015_vm12, %v2008_v19, %v2007_v17  ;;  %v2012_v17 = vperm.slane %v1992_v47, %v4706_v7 }
0x15d3   :  { %v2030_v13 = vsel %vm2017_vm2, %v2009_v39, %v2029_v62 }
0x15d7   :  { %v1986_v4 = vpop.permute.xlu1 %1985 }
0x15d8   :  { %v2010_v24 = vperm.slane %v1986_v4, %v4706_v7  ;;  %v2014_v4 = vperm.slane %v1998_v22, %v4706_v7  ;;  %v2002_v22 = vperm.slane %v1962_v42, %v4706_v7 }
0x15da   :  { %v2031_v23 = vsel %vm2019_vm4, %v2010_v24, %v2030_v13  ;;  %v1999_v13 = vperm.slane %v1953_v41, %v4706_v7  ;;  %v2003_v41 = vperm.slane %v1965_v38, %v4706_v7 }
0x15db   :  { %v2032_v60 = vsel %vm2021_vm1, %v2011_v25, %v2031_v23  ;;  %v2000_v23 = vperm.slane %v1956_v35, %v4706_v7  ;;  %v2001_v25 = vperm.slane %v1959_v31, %v4706_v7 }
0x15dc   :  { %v2033_v62 = vsel %vm2023_vm5, %v2012_v17, %v2032_v60  ;;  %v1821_v17 = vand.u32 65535, %v5382_v11 }
0x15dd   :  { %v2016_v47 = vsel %vm2015_vm12, %v2000_v23, %v1999_v13 }
0x15de   :  { %v2018_v60 = vsel %vm2017_vm2, %v2001_v25, %v2016_v47  ;;  %v1823_v35 = vcvt.s32.f32 %v1821_v17 }
0x15df   :  { %v1995_v19 = vpop.permute.xlu1 %1994 }
0x15e0   :  { %v2013_v46 = vperm.slane %v1995_v19, %v4706_v7  ;;  %v2020_v19 = vsel %vm2019_vm4, %v2002_v22, %v2018_v60 }
0x15e1   :  { %v2022_v31 = vsel %vm2021_vm1, %v2003_v41, %v2020_v19 }
0x15e2   :  { %v2034_v39 = vsel %vm2025_vm7, %v2013_v46, %v2033_v62  ;;  %v2004_v46 = vperm.slane %v1968_v63, %v4706_v7 }
0x15e3   :  { %v2035_v58 = vsel %vm2027_vm8, %v2014_v4, %v2034_v39  ;;  %v1806_v4 = vand.u32 65535, %v5385_v14 }
0x15e4   :  { %v2041_v24 = vsel %vm1794_vm11, %v2035_v58, -inf  ;;  %v2024_v11 = vsel %vm2023_vm5, %v2004_v46, %v2022_v31  ;;  %v2005_v58 = vperm.slane %v1971_v45, %v4706_v7 }
0x15e5   :  { %2042 = vmax.xlane.f32.xlu1 %v2041_v24  ;;  %v1808_v42 = vcvt.s32.f32 %v1806_v4  ;;  %v2006_v24 = vperm.slane %v1974_v44, %v4706_v7 }
0x15e6   :  { %v2026_v38 = vsel %vm2025_vm7, %v2005_v58, %v2024_v11 }
0x15e7   :  { %v2028_v13 = vsel %vm2027_vm8, %v2006_v24, %v2026_v38 }
0x1609   :  { %v5436_v62 = vpop.xlane.xlu2 %1825 }
0x160a   :  { %6623 = vst [vmem:[#allocation12_spill] sm:$0xff] %v5436_v62  ;;  %v5439_v39 = vpop.xlane.xlu1 %1810  ;;  %vm1827_vm10 = vcmp.eq.f32.partialorder %v5391_v57, %v5436_v62  ;;  %v2038_v57 = vsel %vm1794_vm11, %v2028_v13, -inf }
0x160b   :  { %6624 = vst [vmem:[#allocation13_spill] sm:$0xff] %v5439_v39  ;;  %v1828_v63 = vsel %vm1827_vm10, %v1823_v35, inf  ;;  %vm1812_vm13 = vcmp.eq.f32.partialorder %v5393_v59, %v5439_v39 }
0x160c   :  { %1829 = vmin.xlane.f32.xlu0 %v1828_v63  ;;  %v1813_v14 = vsel %vm1812_vm13, %v1808_v42, inf }
0x160d   :  { %1814 = vmin.xlane.f32.xlu2 %v1813_v14 }
0x1614   :  { %2039 = vmax.xlane.f32.xlu0 %v2038_v57 }
0x1658   :  { %v5462_v46 = vpop.xlane.xlu1 %2042 }
0x1659   :  { %v2057_v31 = vperm.slane %v5462_v46, 3  ;;  %v2060_v58 = vperm.slane %v5462_v46, 6  ;;  %v2056_v38 = vperm.slane %v5462_v46, 2 }
0x165b   :  { %vm2089_vm10 = vcmp.eq.f32.partialorder %v5363_v2, %v2057_v31 }
0x167f   :  { %v5451_v23 = vpop.xlane.xlu0 %1829 }
0x1680   :  { %6625 = vst [vmem:[#allocation14_spill] sm:$0xff] %v5451_v23 }
0x1687   :  { %v2040_v25 = vpop.xlane.xlu0 %2039 }
0x1688   :  { %v2051_v45 = vperm.slane %v2040_v25, 5  ;;  %v2050_v47 = vperm.slane %v2040_v25, 4  ;;  %v2046_v22 = vperm.slane %v2040_v25, 0  ;;  %v2047_v17 = vperm.slane %v2040_v25, 1 }
0x1689   :  { %v5460_v19 = vadd.f32 %v5307_v56, %v2040_v25  ;;  %v2054_v56 = vperm.slane %v5462_v46, 0  ;;  %v2048_v4 = vperm.slane %v2040_v25, 2  ;;  %v2049_v42 = vperm.slane %v2040_v25, 3 }
0x168a   :  { %vm2083_vm3 = vcmp.eq.f32.partialorder %v5339_v28, %v2051_v45  ;;  %vm2082_vm14 = vcmp.eq.f32.partialorder %v5324_v53, %v2050_v47  ;;  %vm2078_vm15 = vcmp.eq.f32.partialorder %v5313_v0, %v2046_v22  ;;  %vm2079_vm6 = vcmp.eq.f32.partialorder %v5310_v20, %v2047_v17 }
0x168b   :  { %v2105_v59 = vsel %vm2083_vm3, %v5243_v6, 8  ;;  %v2104_v44 = vsel %vm2082_vm14, %v5243_v6, 8  ;;  %v2100_v60 = vsel %vm2078_vm15, %v5243_v6, 8  ;;  %v5467_v0 = vadd.f32 %v5460_v19, %v5253_v18 }
0x168c   :  { %2132 = vperm.xlu1 %4325, %v2105_v59   ;;  %2129 = vperm.xlu0 %4327, %v2104_v44   ;;  %v5471_v53 = vadd.f32 %v5460_v19, %v5249_v8  ;;  %v2101_v28 = vsel %vm2079_vm6, %v5243_v6, 8  ;;  %vm2086_vm9 = vcmp.eq.f32.partialorder %v5351_v9, %v2054_v56  ;;  %vm2080_vm0 = vcmp.eq.f32.partialorder %v5316_v40, %v2048_v4  ;;  %v5558_v56 = vpop.xlane.xlu2 %1814 }
0x168d   :  { %2117 = vperm.xlu2 %4326, %v2100_v60   ;;  %v5481_v20 = vadd.f32 %v5460_v19, %v5235_v30  ;;  %v2108_v41 = vsel %vm2086_vm9, %v5243_v6, 8  ;;  %v2102_v35 = vsel %vm2080_vm0, %v5243_v6, 8  ;;  %vm2081_vm13 = vcmp.eq.f32.partialorder %v5327_v5, %v2049_v42  ;;  %6626 = vst [vmem:[#allocation15_spill] sm:$0xff] %v5558_v56 }
0x168e   :  { %v5491_v40 = vadd.f32 %v5460_v19, %v5237_v34  ;;  %v2111_v9 = vsel %vm2089_vm10, %v5243_v6, 8  ;;  %v2103_v11 = vsel %vm2081_vm13, %v5243_v6, 8  ;;  %v2052_v63 = vperm.slane %v2040_v25, 6 }
0x168f   :  { %vm2092_vm3 = vcmp.eq.f32.partialorder %v5371_v21, %v2060_v58  ;;  %v5501_v5 = vadd.f32 %v5460_v19, %v5255_v27  ;;  %v2053_v24 = vperm.slane %v2040_v25, 7  ;;  %v2241_v21 = vadd.f32 %v5303_v48, %v5462_v46 }
0x1690   :  { %vm2084_vm14 = vcmp.eq.f32.partialorder %v5336_v55, %v2052_v63  ;;  %v2114_v2 = vsel %vm2092_vm3, %v5243_v6, 8  ;;  %vm2088_vm15 = vcmp.eq.f32.partialorder %v5342_v15, %v2056_v38  ;;  %v2059_v45 = vperm.slane %v5462_v46, 5 }
0x1691   :  { %v2106_v14 = vsel %vm2084_vm14, %v5243_v6, 8  ;;  %vm2085_vm6 = vcmp.eq.f32.partialorder %v5330_v26, %v2053_v24  ;;  %v5512_v55 = vadd.f32 %v2241_v21, %v5235_v30  ;;  %v2110_v13 = vsel %vm2088_vm15, %v5243_v6, 8 }
0x1692   :  { %v2107_v57 = vsel %vm2085_vm6, %v5243_v6, 8  ;;  %vm2091_vm9 = vcmp.eq.f32.partialorder %v5354_v12, %v2059_v45  ;;  %v5520_v48 = vadd.f32 %v2241_v21, %v5249_v8  ;;  %v5525_v15 = vadd.f32 %v5460_v19, %v5241_v54 }
0x1693   :  { %v2113_v26 = vsel %vm2091_vm9, %v5243_v6, 8  ;;  %v5530_v25 = vadd.f32 %v2241_v21, %v5241_v54  ;;  %v5534_v12 = vadd.f32 %v5460_v19, %v5245_v32  ;;  %v5539_v47 = vadd.f32 %v2241_v21, %v5237_v34 }
0x1694   :  { %2275 = vperm.xlu1 %4325, %v5467_v0   ;;  %2290 = vperm.xlu0 %4327, %v5471_v53   ;;  %v5543_v22 = vadd.f32 %v5460_v19, %v5239_v43  ;;  %v2055_v59 = vperm.slane %v5462_v46, 1  ;;  %v5550_v44 = vadd.f32 %v2241_v21, %v5255_v27  ;;  %v2058_v17 = vperm.slane %v5462_v46, 4 }
0x1695   :  { %2120 = vperm.xlu2 %4326, %v2101_v28   ;;  %v2061_v28 = vperm.slane %v5462_v46, 7  ;;  %v5571_v31 = vadd.f32 %v2241_v21, %v5239_v43 }
0x1696   :  { %vm2087_vm0 = vcmp.eq.f32.partialorder %v5348_v50, %v2055_v59  ;;  %vm2090_vm10 = vcmp.eq.f32.partialorder %v5360_v10, %v2058_v17  ;;  %v5567_v10 = vadd.f32 %v2241_v21, %v5245_v32 }
0x1697   :  { %v2109_v60 = vsel %vm2087_vm0, %v5243_v6, 8  ;;  %v2112_v19 = vsel %vm2090_vm10, %v5243_v6, 8  ;;  %vm2093_vm13 = vcmp.eq.f32.partialorder %v5368_v3, %v2061_v28 }
0x1698   :  { %v2115_v50 = vsel %vm2093_vm13, %v5243_v6, 8 }
0x169c   :  { %2281 = vperm.xlu1 %4325, %v5481_v20   ;;  %2141 = vperm.xlu0 %4327, %v2108_v41   ;;  %v5563_v41 = vadd.f32 %v2241_v21, %v5253_v18 }
0x169d   :  { %2123 = vperm.xlu2 %4326, %v2102_v35  }
0x16a4   :  { %2287 = vperm.xlu1 %4325, %v5491_v40   ;;  %2150 = vperm.xlu0 %4327, %v2111_v9  }
0x16a5   :  { %2126 = vperm.xlu2 %4326, %v2103_v11  }
0x16ac   :  { %2296 = vperm.xlu1 %4325, %v5501_v5   ;;  %2159 = vperm.xlu0 %4327, %v2114_v2  }
0x16ad   :  { %2135 = vperm.xlu2 %4326, %v2106_v14  }
0x16b4   :  { %2147 = vperm.xlu1 %4325, %v2110_v13   ;;  %2305 = vperm.xlu0 %4327, %v5512_v55  }
0x16b5   :  { %2138 = vperm.xlu2 %4326, %v2107_v57  }
0x16bc   :  { %2156 = vperm.xlu1 %4325, %v2113_v26   ;;  %2314 = vperm.xlu0 %4327, %v5520_v48  }
0x16bd   :  { %2278 = vperm.xlu2 %4326, %v5525_v15  }
0x16c4   :  { %2302 = vperm.xlu1 %4325, %v5530_v25  }
0x16c5   :  { %2284 = vperm.xlu2 %4326, %v5534_v12  }
0x16cc   :  { %2311 = vperm.xlu1 %4325, %v5539_v47  }
0x16cd   :  { %2293 = vperm.xlu2 %4326, %v5543_v22  }
0x16d4   :  { %2320 = vperm.xlu1 %4325, %v5550_v44  }
0x16d5   :  { %2144 = vperm.xlu2 %4326, %v2109_v60  }
0x16dd   :  { %2153 = vperm.xlu2 %4326, %v2112_v19  }
0x16e5   :  { %2162 = vperm.xlu2 %4326, %v2115_v50  }
0x16e7   :  { %v2118_v4 = vpop.permute.xlu2 %2117 }
0x16e8   :  { %v2164_v58 = vperm.slane %v2118_v4, %v4706_v7 }
0x16ed   :  { %2299 = vperm.xlu2 %4326, %v5563_v41  }
0x16ef   :  { %v2121_v35 = vpop.permute.xlu2 %2120 }
0x16f0   :  { %v2165_v9 = vperm.slane %v2121_v35, %v4706_v7 }
0x16f2   :  { %v2180_v24 = vsel %vm2015_vm12, %v2165_v9, %v2164_v58 }
0x16f5   :  { %2308 = vperm.xlu2 %4326, %v5567_v10  }
0x16f7   :  { %v2124_v46 = vpop.permute.xlu2 %2123 }
0x16f8   :  { %v2166_v11 = vperm.slane %v2124_v46, %v4706_v7 }
0x16fa   :  { %v2181_v21 = vsel %vm2017_vm2, %v2166_v11, %v2180_v24 }
0x16fd   :  { %2317 = vperm.xlu2 %4326, %v5571_v31  }
0x16fe   :  { %v2133_v3 = vpop.permute.xlu1 %2132  ;;  %v2130_v63 = vpop.permute.xlu0 %2129 }
0x16ff   :  { %v2127_v42 = vpop.permute.xlu2 %2126  ;;  %v2168_v13 = vperm.slane %v2130_v63, %v4706_v7  ;;  %v2169_v59 = vperm.slane %v2133_v3, %v4706_v7 }
0x1700   :  { %v2167_v2 = vperm.slane %v2127_v42, %v4706_v7 }
0x1702   :  { %v2182_v57 = vsel %vm2019_vm4, %v2167_v2, %v2181_v21 }
0x1703   :  { %v2183_v45 = vsel %vm2021_vm1, %v2168_v13, %v2182_v57 }
0x1704   :  { %v2184_v17 = vsel %vm2023_vm5, %v2169_v59, %v2183_v45 }
0x1706   :  { %v2276_v14 = vpop.permute.xlu1 %2275  ;;  %v2291_v21 = vpop.permute.xlu0 %2290 }
0x1707   :  { %v2136_v38 = vpop.permute.xlu2 %2135  ;;  %v2322_v58 = vperm.slane %v2276_v14, %v4706_v7 }
0x1708   :  { %v2170_v26 = vperm.slane %v2136_v38, %v4706_v7 }
0x170a   :  { %v2185_v50 = vsel %vm2025_vm7, %v2170_v26, %v2184_v17 }
0x170e   :  { %v2282_v19 = vpop.permute.xlu1 %2281 }
0x170f   :  { %v2139_v60 = vpop.permute.xlu2 %2138  ;;  %v2324_v38 = vperm.slane %v2282_v19, %v4706_v7 }
0x1710   :  { %v2171_v28 = vperm.slane %v2139_v60, %v4706_v7  ;;  %v2327_v60 = vperm.slane %v2291_v21, %v4706_v7 }
0x1712   :  { %v2186_v4 = vsel %vm2027_vm8, %v2171_v28, %v2185_v50 }
0x1713   :  { %v5590_v35 = vsel %vm1794_vm11, %v2186_v4, 2147483647 }
0x1714   :  { %v2196_v46 = vshra.s32 %v5590_v35, 16 }
0x1716   :  { %v5593_v42 = vcvt.s32.f32 %v2196_v46  ;;  %v2288_v3 = vpop.permute.xlu1 %2287  ;;  %v2142_v46 = vpop.permute.xlu0 %2141 }
0x1717   :  { %v2279_v9 = vpop.permute.xlu2 %2278  ;;  %v2326_v45 = vperm.slane %v2288_v3, %v4706_v7 }
0x1718   :  { %2199 = vmin.xlane.f32.xlu1 %v5593_v42  ;;  %v2323_v11 = vperm.slane %v2279_v9, %v4706_v7 }
0x171a   :  { %v2338_v63 = vsel %vm2015_vm12, %v2323_v11, %v2322_v58 }
0x171b   :  { %v2339_v13 = vsel %vm2017_vm2, %v2324_v38, %v2338_v63 }
0x171e   :  { %v2297_v26 = vpop.permute.xlu1 %2296  ;;  %v2151_v58 = vpop.permute.xlu0 %2150 }
0x171f   :  { %v2285_v2 = vpop.permute.xlu2 %2284  ;;  %v2329_v28 = vperm.slane %v2297_v26, %v4706_v7 }
0x1720   :  { %v2325_v24 = vperm.slane %v2285_v2, %v4706_v7 }
0x1722   :  { %v2340_v57 = vsel %vm2019_vm4, %v2325_v24, %v2339_v13 }
0x1723   :  { %v2341_v59 = vsel %vm2021_vm1, %v2326_v45, %v2340_v57  ;;  %v2172_v45 = vperm.slane %v2142_v46, %v4706_v7 }
0x1724   :  { %v2342_v19 = vsel %vm2023_vm5, %v2327_v60, %v2341_v59 }
0x1726   :  { %v2148_v3 = vpop.permute.xlu1 %2147  ;;  %v2160_v24 = vpop.permute.xlu0 %2159 }
0x1727   :  { %v2294_v14 = vpop.permute.xlu2 %2293 }
0x1728   :  { %v2328_v17 = vperm.slane %v2294_v14, %v4706_v7  ;;  %v2174_v14 = vperm.slane %v2148_v3, %v4706_v7 }
0x172a   :  { %v2343_v50 = vsel %vm2025_vm7, %v2328_v17, %v2342_v19 }
0x172b   :  { %v2344_v4 = vsel %vm2027_vm8, %v2329_v28, %v2343_v50 }
0x172c   :  { %v2354_v9 = vsel %vm1794_vm11, %v2344_v4, -inf  ;;  %v2175_v4 = vperm.slane %v2151_v58, %v4706_v7 }
0x172d   :  { %2355 = vmax.xlane.f32.xlu0 %v2354_v9 }
0x172e   :  { %v2157_v2 = vpop.permute.xlu1 %2156  ;;  %v2306_v26 = vpop.permute.xlu0 %2305 }
0x172f   :  { %v2145_v11 = vpop.permute.xlu2 %2144  ;;  %v2332_v46 = vperm.slane %v2306_v26, %v4706_v7  ;;  %v2178_v26 = vperm.slane %v2160_v24, %v4706_v7 }
0x1730   :  { %v2173_v13 = vperm.slane %v2145_v11, %v4706_v7 }
0x1732   :  { %v2187_v59 = vsel %vm2015_vm12, %v2173_v13, %v2172_v45 }
0x1733   :  { %v2188_v19 = vsel %vm2017_vm2, %v2174_v14, %v2187_v59 }
0x1736   :  { %v2303_v21 = vpop.permute.xlu1 %2302 }
0x1737   :  { %v2154_v63 = vpop.permute.xlu2 %2153  ;;  %v2331_v28 = vperm.slane %v2303_v21, %v4706_v7  ;;  %v2177_v21 = vperm.slane %v2157_v2, %v4706_v7 }
0x1738   :  { %v2176_v50 = vperm.slane %v2154_v63, %v4706_v7  ;;  %v2315_v63 = vpop.permute.xlu0 %2314 }
0x173e   :  { %v2312_v17 = vpop.permute.xlu1 %2311 }
0x173f   :  { %v2163_v38 = vpop.permute.xlu2 %2162  ;;  %v2334_v58 = vperm.slane %v2312_v17, %v4706_v7 }
0x1740   :  { %v2179_v14 = vperm.slane %v2163_v38, %v4706_v7 }
0x1747   :  { %v2300_v57 = vpop.permute.xlu2 %2299 }
0x1748   :  { %v2330_v60 = vperm.slane %v2300_v57, %v4706_v7  ;;  %v2189_v57 = vsel %vm2019_vm4, %v2175_v4, %v2188_v19 }
0x1749   :  { %v2190_v3 = vsel %vm2021_vm1, %v2176_v50, %v2189_v57  ;;  %v2335_v50 = vperm.slane %v2315_v63, %v4706_v7 }
0x174a   :  { %v2345_v9 = vsel %vm2015_vm12, %v2331_v28, %v2330_v60  ;;  %v2191_v60 = vsel %vm2023_vm5, %v2177_v21, %v2190_v3  ;;  %v2321_v28 = vpop.permute.xlu1 %2320 }
0x174b   :  { %v2346_v45 = vsel %vm2017_vm2, %v2332_v46, %v2345_v9  ;;  %v2192_v9 = vsel %vm2025_vm7, %v2178_v26, %v2191_v60  ;;  %v2337_v17 = vperm.slane %v2321_v28, %v4706_v7 }
0x174f   :  { %v2309_v11 = vpop.permute.xlu2 %2308 }
0x1750   :  { %v2333_v13 = vperm.slane %v2309_v11, %v4706_v7  ;;  %v2193_v11 = vsel %vm2027_vm8, %v2179_v14, %v2192_v9 }
0x1751   :  { %v5644_v57 = vsel %vm1794_vm11, %v2193_v11, 2147483647 }
0x1752   :  { %v2347_v59 = vsel %vm2019_vm4, %v2333_v13, %v2346_v45  ;;  %v2211_v3 = vshra.s32 %v5644_v57, 16 }
0x1753   :  { %v2348_v19 = vsel %vm2021_vm1, %v2334_v58, %v2347_v59 }
0x1754   :  { %v2349_v46 = vsel %vm2023_vm5, %v2335_v50, %v2348_v19  ;;  %v5647_v45 = vcvt.s32.f32 %v2211_v3 }
0x1757   :  { %v2318_v4 = vpop.permute.xlu2 %2317 }
0x1758   :  { %v2336_v2 = vperm.slane %v2318_v4, %v4706_v7 }
0x175a   :  { %v2350_v38 = vsel %vm2025_vm7, %v2336_v2, %v2349_v46 }
0x175b   :  { %v2351_v24 = vsel %vm2027_vm8, %v2337_v17, %v2350_v38 }
0x175c   :  { %v2357_v13 = vsel %vm1794_vm11, %v2351_v24, -inf  ;;  %v2195_v24 = vand.u32 65535, %v5590_v35 }
0x175d   :  { %2358 = vmax.xlane.f32.xlu2 %v2357_v13 }
0x1765   :  { %2214 = vmin.xlane.f32.xlu2 %v5647_v45 }
0x17a0   :  { %v2356_v21 = vpop.xlane.xlu0 %2355 }
0x17a1   :  { %v2368_v59 = vperm.slane %v2356_v21, 6  ;;  %v2362_v63 = vperm.slane %v2356_v21, 0  ;;  %v2367_v58 = vperm.slane %v2356_v21, 5  ;;  %v2363_v28 = vperm.slane %v2356_v21, 1 }
0x17a2   :  { %v2550_v19 = vadd.f32 %v5305_v49, %v2356_v21  ;;  %v2364_v50 = vperm.slane %v2356_v21, 2  ;;  %v2365_v4 = vperm.slane %v2356_v21, 3  ;;  %v2366_v11 = vperm.slane %v2356_v21, 4 }
0x17a3   :  { %vm2400_vm3 = vcmp.eq.f32.partialorder %v5543_v22, %v2368_v59  ;;  %vm2394_vm14 = vcmp.eq.f32.partialorder %v5467_v0, %v2362_v63  ;;  %vm2399_vm15 = vcmp.eq.f32.partialorder %v5471_v53, %v2367_v58  ;;  %vm2395_vm6 = vcmp.eq.f32.partialorder %v5525_v15, %v2363_v28 }
0x17a4   :  { %v2416_v60 = vsel %vm2400_vm3, %v5243_v6, 8  ;;  %v2410_v14 = vsel %vm2394_vm14, %v5243_v6, 8  ;;  %v2415_v26 = vsel %vm2399_vm15, %v5243_v6, 8  ;;  %v5659_v22 = vadd.f32 %v2550_v19, %v5239_v43 }
0x17a5   :  { %2445 = vperm.xlu0 %4327, %v2416_v60   ;;  %2427 = vperm.xlu1 %4325, %v2410_v14   ;;  %v2411_v0 = vsel %vm2395_vm6, %v5243_v6, 8  ;;  %v5663_v53 = vadd.f32 %v2550_v19, %v5241_v54  ;;  %vm2396_vm9 = vcmp.eq.f32.partialorder %v5481_v20, %v2364_v50  ;;  %v5670_v15 = vadd.f32 %v2550_v19, %v5245_v32 }
0x17a6   :  { %2442 = vperm.xlu2 %4326, %v2415_v26   ;;  %v2412_v49 = vsel %vm2396_vm9, %v5243_v6, 8  ;;  %vm2397_vm0 = vcmp.eq.f32.partialorder %v5534_v12, %v2365_v4  ;;  %v5676_v2 = vadd.f32 %v2550_v19, %v5249_v8  ;;  %vm2398_vm10 = vcmp.eq.f32.partialorder %v5491_v40, %v2366_v11  ;;  %v5683_v12 = vpop.xlane.xlu1 %2199 }
0x17a7   :  { %v2413_v9 = vsel %vm2397_vm0, %v5243_v6, 8  ;;  %v2414_v20 = vsel %vm2398_vm10, %v5243_v6, 8  ;;  %v2369_v17 = vperm.slane %v2356_v21, 7  ;;  %6627 = vst [vmem:[#allocation16_spill] sm:$0xff] %v5683_v12  ;;  %v5687_v3 = vadd.f32 %v2550_v19, %v5253_v18 }
0x17a8   :  { %vm2201_vm14 = vcmp.eq.f32.partialorder %v5593_v42, %v5683_v12  ;;  %v5696_v35 = vadd.f32 %v2550_v19, %v5235_v30  ;;  %v5702_v42 = vadd.f32 %v2550_v19, %v5237_v34  ;;  %v5712_v14 = vadd.f32 %v2550_v19, %v5255_v27 }
0x17a9   :  { %vm2401_vm13 = vcmp.eq.f32.partialorder %v5501_v5, %v2369_v17  ;;  %v2197_v5 = vcvt.s32.f32 %v2195_v24 }
0x17aa   :  { %v2417_v46 = vsel %vm2401_vm13, %v5243_v6, 8 }
0x17ab   :  { %v2202_v59 = vsel %vm2201_vm14, %v2197_v5, inf }
0x17ad   :  { %2603 = vperm.xlu0 %4327, %v5659_v22   ;;  %2430 = vperm.xlu1 %4325, %v2411_v0  }
0x17ae   :  { %2588 = vperm.xlu2 %4326, %v5663_v53  }
0x17b5   :  { %2433 = vperm.xlu1 %4325, %v2412_v49  }
0x17b6   :  { %2594 = vperm.xlu2 %4326, %v5670_v15  }
0x17bd   :  { %2436 = vperm.xlu1 %4325, %v2413_v9  }
0x17be   :  { %2600 = vperm.xlu2 %4326, %v5676_v2  }
0x17c5   :  { %2439 = vperm.xlu1 %4325, %v2414_v20  }
0x17cd   :  { %2448 = vperm.xlu1 %4325, %v2417_v46  }
0x17d0   :  { %v2359_v38 = vpop.xlane.xlu2 %2358 }
0x17d1   :  { %v2373_v13 = vperm.slane %v2359_v38, 3  ;;  %v2376_v21 = vperm.slane %v2359_v38, 6  ;;  %v2371_v60 = vperm.slane %v2359_v38, 1  ;;  %v2374_v26 = vperm.slane %v2359_v38, 4 }
0x17d2   :  { %v2370_v28 = vperm.slane %v2359_v38, 0  ;;  %v2377_v19 = vperm.slane %v2359_v38, 7  ;;  %v2372_v49 = vperm.slane %v2359_v38, 2  ;;  %v2375_v4 = vperm.slane %v2359_v38, 5 }
0x17d3   :  { %vm2405_vm3 = vcmp.eq.f32.partialorder %v5567_v10, %v2373_v13  ;;  %vm2408_vm15 = vcmp.eq.f32.partialorder %v5571_v31, %v2376_v21  ;;  %v2551_v10 = vadd.f32 %v5318_v1, %v2359_v38  ;;  %vm2403_vm6 = vcmp.eq.f32.partialorder %v5530_v25, %v2371_v60 }
0x17d4   :  { %v2421_v40 = vsel %vm2405_vm3, %v5243_v6, 8  ;;  %v2424_v63 = vsel %vm2408_vm15, %v5243_v6, 8  ;;  %v2419_v31 = vsel %vm2403_vm6, %v5243_v6, 8  ;;  %vm2406_vm9 = vcmp.eq.f32.partialorder %v5539_v47, %v2374_v26 }
0x17d5   :  { %2585 = vperm.xlu1 %4325, %v5687_v3   ;;  %2460 = vperm.xlu2 %4326, %v2421_v40   ;;  %v5705_v58 = vadd.f32 %v2551_v10, %v5253_v18  ;;  %v5715_v1 = vadd.f32 %v2551_v10, %v5235_v30  ;;  %vm2402_vm0 = vcmp.eq.f32.partialorder %v5563_v41, %v2370_v28  ;;  %v2422_v25 = vsel %vm2406_vm9, %v5243_v6, 8 }
0x17d6   :  { %v5723_v0 = vadd.f32 %v2551_v10, %v5249_v8  ;;  %v2418_v50 = vsel %vm2402_vm0, %v5243_v6, 8  ;;  %vm2409_vm10 = vcmp.eq.f32.partialorder %v5550_v44, %v2377_v19  ;;  %vm2404_vm13 = vcmp.eq.f32.partialorder %v5512_v55, %v2372_v49 }
0x17d7   :  { %2203 = vmin.xlane.f32.xlu0 %v2202_v59  ;;  %v2425_v47 = vsel %vm2409_vm10, %v5243_v6, 8  ;;  %v2420_v41 = vsel %vm2404_vm13, %v5243_v6, 8  ;;  %v5732_v9 = vadd.f32 %v2551_v10, %v5245_v32  ;;  %vm2407_vm3 = vcmp.eq.f32.partialorder %v5520_v48, %v2375_v4 }
0x17d8   :  { %v2423_v11 = vsel %vm2407_vm3, %v5243_v6, 8  ;;  %v5738_v44 = vadd.f32 %v2551_v10, %v5239_v43  ;;  %v5742_v55 = vadd.f32 %v2551_v10, %v5241_v54  ;;  %v5746_v20 = vadd.f32 %v2551_v10, %v5237_v34  ;;  %v5753_v13 = vpop.xlane.xlu2 %2214 }
0x17d9   :  { %v5750_v17 = vadd.f32 %v2551_v10, %v5255_v27  ;;  %6628 = vst [vmem:[#allocation17_spill] sm:$0xff] %v5753_v13  ;;  %vm2216_vm14 = vcmp.eq.f32.partialorder %v5647_v45, %v5753_v13 }
0x17dd   :  { %2591 = vperm.xlu1 %4325, %v5696_v35   ;;  %2469 = vperm.xlu2 %4326, %v2424_v63  }
0x17e5   :  { %2597 = vperm.xlu1 %4325, %v5702_v42   ;;  %2609 = vperm.xlu2 %4326, %v5705_v58  }
0x17eb   :  { %2454 = vperm.xlu0 %4327, %v2419_v31  }
0x17ed   :  { %2606 = vperm.xlu1 %4325, %v5712_v14   ;;  %2615 = vperm.xlu2 %4326, %v5715_v1  }
0x17f3   :  { %2463 = vperm.xlu0 %4327, %v2422_v25  }
0x17f5   :  { %2624 = vperm.xlu2 %4326, %v5723_v0   ;;  %2451 = vperm.xlu1 %4325, %v2418_v50  }
0x17fb   :  { %2472 = vperm.xlu0 %4327, %v2425_v47  }
0x17fd   :  { %2457 = vperm.xlu1 %4325, %v2420_v41  }
0x1800   :  { %v2443_v31 = vpop.permute.xlu2 %2442 }
0x1801   :  { %v2479_v19 = vperm.slane %v2443_v31, %v4706_v7 }
0x1803   :  { %2618 = vperm.xlu0 %4327, %v5732_v9  }
0x1805   :  { %2466 = vperm.xlu1 %4325, %v2423_v11   ;;  %v2210_v11 = vand.u32 65535, %v5644_v57 }
0x180b   :  { %2627 = vperm.xlu0 %4327, %v5738_v44  }
0x180d   :  { %2612 = vperm.xlu1 %4325, %v5742_v55  }
0x1815   :  { %2621 = vperm.xlu1 %4325, %v5746_v20  }
0x1817   :  { %v2428_v48 = vpop.permute.xlu1 %2427  ;;  %v2446_v50 = vpop.permute.xlu0 %2445 }
0x1818   :  { %v2474_v21 = vperm.slane %v2428_v48, %v4706_v7  ;;  %v2480_v41 = vperm.slane %v2446_v50, %v4706_v7 }
0x181d   :  { %2630 = vperm.xlu1 %4325, %v5750_v17  }
0x181f   :  { %v2431_v46 = vpop.permute.xlu1 %2430 }
0x1820   :  { %v2475_v40 = vperm.slane %v2431_v46, %v4706_v7 }
0x1822   :  { %v2490_v10 = vsel %vm2015_vm12, %v2475_v40, %v2474_v21 }
0x1827   :  { %v2434_v38 = vpop.permute.xlu1 %2433 }
0x1828   :  { %v2476_v5 = vperm.slane %v2434_v38, %v4706_v7  ;;  %v2212_v38 = vcvt.s32.f32 %v2210_v11 }
0x182a   :  { %v2491_v26 = vsel %vm2017_vm2, %v2476_v5, %v2490_v10  ;;  %v2217_v40 = vsel %vm2216_vm14, %v2212_v38, inf }
0x182f   :  { %v2437_v24 = vpop.permute.xlu1 %2436 }
0x1830   :  { %v2477_v59 = vperm.slane %v2437_v24, %v4706_v7  ;;  %v2589_v24 = vpop.permute.xlu2 %2588 }
0x1831   :  { %v2633_v31 = vperm.slane %v2589_v24, %v4706_v7 }
0x1832   :  { %v2492_v28 = vsel %vm2019_vm4, %v2477_v59, %v2491_v26  ;;  %v2604_v26 = vpop.permute.xlu0 %2603 }
0x1833   :  { %v2638_v38 = vperm.slane %v2604_v26, %v4706_v7 }
0x1837   :  { %v2440_v63 = vpop.permute.xlu1 %2439 }
0x1838   :  { %v2478_v60 = vperm.slane %v2440_v63, %v4706_v7  ;;  %v2595_v57 = vpop.permute.xlu2 %2594 }
0x1839   :  { %v2635_v50 = vperm.slane %v2595_v57, %v4706_v7 }
0x183a   :  { %v2493_v25 = vsel %vm2021_vm1, %v2478_v60, %v2492_v28 }
0x183b   :  { %v2494_v49 = vsel %vm2023_vm5, %v2479_v19, %v2493_v25 }
0x183c   :  { %v2495_v48 = vsel %vm2025_vm7, %v2480_v41, %v2494_v49 }
0x183f   :  { %v2449_v47 = vpop.permute.xlu1 %2448 }
0x1840   :  { %v2481_v4 = vperm.slane %v2449_v47, %v4706_v7  ;;  %v2601_v47 = vpop.permute.xlu2 %2600 }
0x1841   :  { %v2637_v11 = vperm.slane %v2601_v47, %v4706_v7 }
0x1842   :  { %v2496_v46 = vsel %vm2027_vm8, %v2481_v4, %v2495_v48 }
0x1843   :  { %v5774_v5 = vsel %vm1794_vm11, %v2496_v46, 2147483647 }
0x1844   :  { %v2506_v59 = vshra.s32 %v5774_v5, 16 }
0x1846   :  { %v5777_v63 = vcvt.s32.f32 %v2506_v59 }
0x1847   :  { %v2586_v21 = vpop.permute.xlu1 %2585  ;;  %2218 = vmin.xlane.f32.xlu1 %v2217_v40 }
0x1848   :  { %v2632_v10 = vperm.slane %v2586_v21, %v4706_v7  ;;  %v2461_v21 = vpop.permute.xlu2 %2460 }
0x184a   :  { %v2648_v28 = vsel %vm2015_vm12, %v2633_v31, %v2632_v10  ;;  %v5790_v48 = vpop.xlane.xlu0 %2203 }
0x184b   :  { %6629 = vst [vmem:[#allocation18_spill] sm:$0xff] %v5790_v48 }
0x184f   :  { %v2592_v60 = vpop.permute.xlu1 %2591  ;;  %2509 = vmin.xlane.f32.xlu1 %v5777_v63 }
0x1850   :  { %v2634_v45 = vperm.slane %v2592_v60, %v4706_v7  ;;  %v2470_v31 = vpop.permute.xlu2 %2469 }
0x1852   :  { %v2649_v25 = vsel %vm2017_vm2, %v2634_v45, %v2648_v28 }
0x1853   :  { %v2650_v41 = vsel %vm2019_vm4, %v2635_v50, %v2649_v25 }
0x1857   :  { %v2598_v19 = vpop.permute.xlu1 %2597 }
0x1858   :  { %v2636_v49 = vperm.slane %v2598_v19, %v4706_v7  ;;  %v2610_v19 = vpop.permute.xlu2 %2609 }
0x185a   :  { %v2651_v4 = vsel %vm2021_vm1, %v2636_v49, %v2650_v41 }
0x185b   :  { %v2652_v46 = vsel %vm2023_vm5, %v2637_v11, %v2651_v4 }
0x185c   :  { %v2653_v59 = vsel %vm2025_vm7, %v2638_v38, %v2652_v46  ;;  %v2640_v38 = vperm.slane %v2610_v19, %v4706_v7 }
0x185d   :  { %v2455_v10 = vpop.permute.xlu0 %2454 }
0x185e   :  { %v2483_v11 = vperm.slane %v2455_v10, %v4706_v7 }
0x185f   :  { %v2607_v24 = vpop.permute.xlu1 %2606 }
0x1860   :  { %v2639_v40 = vperm.slane %v2607_v24, %v4706_v7  ;;  %v2616_v47 = vpop.permute.xlu2 %2615 }
0x1862   :  { %v2654_v57 = vsel %vm2027_vm8, %v2639_v40, %v2653_v59 }
0x1863   :  { %v2664_v60 = vsel %vm1794_vm11, %v2654_v57, -inf  ;;  %v2485_v57 = vperm.slane %v2461_v21, %v4706_v7 }
0x1864   :  { %2665 = vmax.xlane.f32.xlu2 %v2664_v60 }
0x1865   :  { %v2464_v28 = vpop.permute.xlu0 %2463 }
0x1866   :  { %v2486_v10 = vperm.slane %v2464_v28, %v4706_v7 }
0x1867   :  { %v2452_v45 = vpop.permute.xlu1 %2451 }
0x1868   :  { %v2482_v26 = vperm.slane %v2452_v45, %v4706_v7  ;;  %v2642_v45 = vperm.slane %v2616_v47, %v4706_v7 }
0x186a   :  { %v2497_v24 = vsel %vm2015_vm12, %v2483_v11, %v2482_v26 }
0x186d   :  { %v2473_v49 = vpop.permute.xlu0 %2472 }
0x186f   :  { %v2458_v25 = vpop.permute.xlu1 %2457 }
0x1870   :  { %v2484_v41 = vperm.slane %v2458_v25, %v4706_v7 }
0x1872   :  { %v2498_v59 = vsel %vm2017_vm2, %v2484_v41, %v2497_v24  ;;  %v2625_v41 = vpop.permute.xlu2 %2624 }
0x1873   :  { %v2499_v25 = vsel %vm2019_vm4, %v2485_v57, %v2498_v59  ;;  %v2645_v28 = vperm.slane %v2625_v41, %v4706_v7 }
0x1874   :  { %v2500_v21 = vsel %vm2021_vm1, %v2486_v10, %v2499_v25 }
0x1875   :  { %v2619_v40 = vpop.permute.xlu0 %2618 }
0x1876   :  { %v2643_v26 = vperm.slane %v2619_v40, %v4706_v7  ;;  %v2489_v40 = vperm.slane %v2473_v49, %v4706_v7 }
0x1877   :  { %v2467_v50 = vpop.permute.xlu1 %2466 }
0x1878   :  { %v2487_v56 = vperm.slane %v2467_v50, %v4706_v7 }
0x187d   :  { %v2628_v24 = vpop.permute.xlu0 %2627 }
0x187f   :  { %v2613_v4 = vpop.permute.xlu1 %2612 }
0x1880   :  { %v2641_v46 = vperm.slane %v2613_v4, %v4706_v7 }
0x1882   :  { %v2655_v60 = vsel %vm2015_vm12, %v2641_v46, %v2640_v38  ;;  %v2501_v46 = vsel %vm2023_vm5, %v2487_v56, %v2500_v21  ;;  %v2488_v38 = vperm.slane %v2470_v31, %v4706_v7 }
0x1883   :  { %v2656_v4 = vsel %vm2017_vm2, %v2642_v45, %v2655_v60  ;;  %v2646_v60 = vperm.slane %v2628_v24, %v4706_v7 }
0x1884   :  { %v2657_v47 = vsel %vm2019_vm4, %v2643_v26, %v2656_v4  ;;  %v2502_v59 = vsel %vm2025_vm7, %v2488_v38, %v2501_v46 }
0x1885   :  { %v2503_v25 = vsel %vm2027_vm8, %v2489_v40, %v2502_v59 }
0x1887   :  { %v2622_v19 = vpop.permute.xlu1 %2621 }
0x1888   :  { %v2644_v11 = vperm.slane %v2622_v19, %v4706_v7  ;;  %v5830_v19 = vsel %vm1794_vm11, %v2503_v25, 2147483647 }
0x1889   :  { %v2521_v49 = vshra.s32 %v5830_v19, 16 }
0x188a   :  { %v2658_v50 = vsel %vm2021_vm1, %v2644_v11, %v2657_v47 }
0x188b   :  { %v2659_v57 = vsel %vm2023_vm5, %v2645_v28, %v2658_v50  ;;  %v5833_v26 = vcvt.s32.f32 %v2521_v49 }
0x188c   :  { %v2660_v31 = vsel %vm2025_vm7, %v2646_v60, %v2659_v57 }
0x188f   :  { %v2631_v45 = vpop.permute.xlu1 %2630 }
0x1890   :  { %v2647_v56 = vperm.slane %v2631_v45, %v4706_v7 }
0x1892   :  { %v2661_v10 = vsel %vm2027_vm8, %v2647_v56, %v2660_v31 }
0x1893   :  { %v2667_v4 = vsel %vm1794_vm11, %v2661_v10, -inf }
0x1894   :  { %2668 = vmax.xlane.f32.xlu0 %v2667_v4 }
0x189c   :  { %2524 = vmin.xlane.f32.xlu0 %v5833_v26 }
0x18ba   :  { %v5879_v10 = vpop.xlane.xlu1 %2218 }
0x18bb   :  { %6631 = vst [vmem:[#allocation20_spill] sm:$0xff] %v5879_v10 }
0x18d7   :  { %v2666_v11 = vpop.xlane.xlu2 %2665 }
0x18d8   :  { %v2678_v41 = vperm.slane %v2666_v11, 6  ;;  %v2677_v21 = vperm.slane %v2666_v11, 5  ;;  %v2672_v46 = vperm.slane %v2666_v11, 0  ;;  %v2673_v28 = vperm.slane %v2666_v11, 1 }
0x18d9   :  { %v2861_v24 = vadd.f32 %v5401_v29, %v2666_v11  ;;  %v2674_v59 = vperm.slane %v2666_v11, 2  ;;  %v2675_v57 = vperm.slane %v2666_v11, 3  ;;  %v2676_v45 = vperm.slane %v2666_v11, 4 }
0x18da   :  { %vm2710_vm15 = vcmp.eq.f32.partialorder %v5659_v22, %v2678_v41  ;;  %vm2709_vm6 = vcmp.eq.f32.partialorder %v5676_v2, %v2677_v21  ;;  %vm2704_vm9 = vcmp.eq.f32.partialorder %v5687_v3, %v2672_v46  ;;  %vm2705_vm0 = vcmp.eq.f32.partialorder %v5663_v53, %v2673_v28  ;;  %v5889_v46 = vpop.xlane.xlu1 %2509 }
0x18db   :  { %v2726_v47 = vsel %vm2710_vm15, %v5243_v6, 8  ;;  %v2725_v38 = vsel %vm2709_vm6, %v5243_v6, 8  ;;  %v2720_v50 = vsel %vm2704_vm9, %v5243_v6, 8  ;;  %v5845_v22 = vadd.f32 %v2861_v24, %v5253_v18  ;;  %6632 = vst [vmem:[#allocation21_spill] sm:$0xff] %v5889_v46 }
0x18dc   :  { %2755 = vperm.xlu0 %4327, %v2726_v47   ;;  %2752 = vperm.xlu2 %4326, %v2725_v38   ;;  %v5848_v2 = vadd.f32 %v2861_v24, %v5241_v54  ;;  %v2721_v3 = vsel %vm2705_vm0, %v5243_v6, 8  ;;  %vm2706_vm10 = vcmp.eq.f32.partialorder %v5696_v35, %v2674_v59  ;;  %v5855_v29 = vadd.f32 %v2861_v24, %v5235_v30 }
0x18dd   :  { %2737 = vperm.xlu1 %4325, %v2720_v50   ;;  %v5858_v53 = vadd.f32 %v2861_v24, %v5239_v43  ;;  %v2722_v40 = vsel %vm2706_vm10, %v5243_v6, 8  ;;  %vm2707_vm13 = vcmp.eq.f32.partialorder %v5670_v15, %v2675_v57  ;;  %v5865_v60 = vadd.f32 %v2861_v24, %v5245_v32 }
0x18de   :  { %v2723_v35 = vsel %vm2707_vm13, %v5243_v6, 8  ;;  %vm2708_vm3 = vcmp.eq.f32.partialorder %v5702_v42, %v2676_v45  ;;  %v5871_v56 = vadd.f32 %v2861_v24, %v5237_v34  ;;  %v2679_v15 = vperm.slane %v2666_v11, 7 }
0x18df   :  { %v2724_v25 = vsel %vm2708_vm3, %v5243_v6, 8  ;;  %v5877_v31 = vadd.f32 %v2861_v24, %v5255_v27  ;;  %v5886_v11 = vadd.f32 %v2861_v24, %v5249_v8  ;;  %v2505_v47 = vand.u32 65535, %v5774_v5 }
0x18e0   :  { %vm2711_vm14 = vcmp.eq.f32.partialorder %v5712_v14, %v2679_v15  ;;  %vm2511_vm0 = vcmp.eq.f32.partialorder %v5777_v63, %v5889_v46 }
0x18e1   :  { %6630 = vst [vmem:[#allocation19_spill] sm:$0xff] %v5877_v31  ;;  %v2727_v42 = vsel %vm2711_vm14, %v5243_v6, 8 }
0x18e4   :  { %2896 = vperm.xlu0 %4327, %v5845_v22   ;;  %2899 = vperm.xlu2 %4326, %v5848_v2  }
0x18e5   :  { %2740 = vperm.xlu1 %4325, %v2721_v3  }
0x18ec   :  { %2902 = vperm.xlu0 %4327, %v5855_v29   ;;  %2914 = vperm.xlu2 %4326, %v5858_v53  }
0x18ed   :  { %2743 = vperm.xlu1 %4325, %v2722_v40  }
0x18f4   :  { %2905 = vperm.xlu0 %4327, %v5865_v60  }
0x18f5   :  { %2746 = vperm.xlu1 %4325, %v2723_v35  }
0x18fc   :  { %2908 = vperm.xlu0 %4327, %v5871_v56  }
0x18fd   :  { %2749 = vperm.xlu1 %4325, %v2724_v25  }
0x1904   :  { %2917 = vperm.xlu0 %4327, %v5877_v31  }
0x1905   :  { %2758 = vperm.xlu1 %4325, %v2727_v42  }
0x1907   :  { %v2669_v4 = vpop.xlane.xlu0 %2668 }
0x1908   :  { %v2683_v49 = vperm.slane %v2669_v4, 3  ;;  %v2686_v14 = vperm.slane %v2669_v4, 6  ;;  %v2680_v21 = vperm.slane %v2669_v4, 0  ;;  %v2681_v24 = vperm.slane %v2669_v4, 1 }
0x1909   :  { %v2862_v3 = vadd.f32 %v5405_v36, %v2669_v4  ;;  %v2684_v5 = vperm.slane %v2669_v4, 4  ;;  %v2682_v59 = vperm.slane %v2669_v4, 2 }
0x190a   :  { %vm2715_vm15 = vcmp.eq.f32.partialorder %v5732_v9, %v2683_v49  ;;  %vm2718_vm6 = vcmp.eq.f32.partialorder %v5738_v44, %v2686_v14  ;;  %vm2712_vm9 = vcmp.eq.f32.partialorder %v5705_v58, %v2680_v21  ;;  %v2507_v9 = vcvt.s32.f32 %v2505_v47 }
0x190b   :  { %v2731_v41 = vsel %vm2715_vm15, %v5243_v6, 8  ;;  %v2734_v38 = vsel %vm2718_vm6, %v5243_v6, 8  ;;  %v2728_v50 = vsel %vm2712_vm9, %v5243_v6, 8  ;;  %vm2713_vm10 = vcmp.eq.f32.partialorder %v5742_v55, %v2681_v24 }
0x190c   :  { %2770 = vperm.xlu0 %4327, %v2731_v41   ;;  %v2512_v28 = vsel %vm2511_vm0, %v2507_v9, inf  ;;  %v5901_v44 = vadd.f32 %v2862_v3, %v5253_v18  ;;  %v2729_v58 = vsel %vm2713_vm10, %v5243_v6, 8  ;;  %vm2716_vm13 = vcmp.eq.f32.partialorder %v5746_v20, %v2684_v5 }
0x190d   :  { %2911 = vperm.xlu1 %4325, %v5886_v11   ;;  %v5907_v63 = vadd.f32 %v2862_v3, %v5249_v8  ;;  %v2732_v36 = vsel %vm2716_vm13, %v5243_v6, 8  ;;  %v2687_v55 = vperm.slane %v2669_v4, 7  ;;  %vm2714_vm14 = vcmp.eq.f32.partialorder %v5715_v1, %v2682_v59 }
0x190e   :  { %v2730_v57 = vsel %vm2714_vm14, %v5243_v6, 8  ;;  %v2685_v20 = vperm.slane %v2669_v4, 5  ;;  %v5917_v35 = vadd.f32 %v2862_v3, %v5241_v54  ;;  %v5925_v1 = vadd.f32 %v2862_v3, %v5235_v30 }
0x190f   :  { %6633 = vst [vmem:[#allocation22_spill] sm:$0xff] %v5907_v63  ;;  %vm2719_vm3 = vcmp.eq.f32.partialorder %v5750_v17, %v2687_v55  ;;  %v5922_v17 = vadd.f32 %v2862_v3, %v5239_v43  ;;  %v5933_v25 = vpop.xlane.xlu0 %2524  ;;  %v5936_v15 = vadd.f32 %v2862_v3, %v5237_v34  ;;  %v5940_v49 = vadd.f32 %v2862_v3, %v5255_v27 }
0x1910   :  { %v2735_v40 = vsel %vm2719_vm3, %v5243_v6, 8  ;;  %vm2717_vm15 = vcmp.eq.f32.partialorder %v5723_v0, %v2685_v20  ;;  %v5930_v0 = vadd.f32 %v2862_v3, %v5245_v32  ;;  %6634 = vst [vmem:[#allocation23_spill] sm:$0xff] %v5933_v25  ;;  %v2520_v47 = vand.u32 65535, %v5830_v19 }
0x1911   :  { %v2733_v45 = vsel %vm2717_vm15, %v5243_v6, 8  ;;  %6635 = vst [vmem:[#allocation24_spill] sm:$0xff] %v5940_v49  ;;  %vm2526_vm6 = vcmp.eq.f32.partialorder %v5833_v26, %v5933_v25 }
0x1914   :  { %2779 = vperm.xlu0 %4327, %v2734_v38   ;;  %v2522_v38 = vcvt.s32.f32 %v2520_v47 }
0x1915   :  { %2761 = vperm.xlu1 %4325, %v2728_v50   ;;  %2513 = vmin.xlane.f32.xlu2 %v2512_v28 }
0x1916   :  { %v2527_v50 = vsel %vm2526_vm6, %v2522_v38, inf }
0x191c   :  { %2920 = vperm.xlu0 %4327, %v5901_v44  }
0x191d   :  { %2764 = vperm.xlu1 %4325, %v2729_v58  }
0x1924   :  { %2935 = vperm.xlu0 %4327, %v5907_v63  }
0x1925   :  { %2773 = vperm.xlu1 %4325, %v2732_v36  }
0x192d   :  { %2782 = vperm.xlu1 %4325, %v2735_v40   ;;  %2767 = vperm.xlu2 %4326, %v2730_v57  }
0x1935   :  { %2923 = vperm.xlu1 %4325, %v5917_v35   ;;  %2776 = vperm.xlu2 %4326, %v2733_v45  }
0x1936   :  { %v2753_v24 = vpop.permute.xlu2 %2752 }
0x1937   :  { %v2789_v45 = vperm.slane %v2753_v24, %v4706_v7 }
0x193d   :  { %2938 = vperm.xlu1 %4325, %v5922_v17   ;;  %2926 = vperm.xlu2 %4326, %v5925_v1  }
0x1945   :  { %2929 = vperm.xlu2 %4326, %v5930_v0  }
0x194d   :  { %2932 = vperm.xlu2 %4326, %v5936_v15  }
0x194e   :  { %v2756_v42 = vpop.permute.xlu0 %2755 }
0x194f   :  { %v2738_v4 = vpop.permute.xlu1 %2737 }
0x1950   :  { %v2784_v36 = vperm.slane %v2738_v4, %v4706_v7  ;;  %v2790_v4 = vperm.slane %v2756_v42, %v4706_v7 }
0x1955   :  { %2941 = vperm.xlu2 %4326, %v5940_v49  }
0x1956   :  { %v2897_v41 = vpop.permute.xlu0 %2896 }
0x1957   :  { %v2741_v14 = vpop.permute.xlu1 %2740 }
0x1958   :  { %v2785_v3 = vperm.slane %v2741_v14, %v4706_v7  ;;  %v2900_v14 = vpop.permute.xlu2 %2899 }
0x1959   :  { %v2944_v24 = vperm.slane %v2900_v14, %v4706_v7 }
0x195a   :  { %v2800_v19 = vsel %vm2015_vm12, %v2785_v3, %v2784_v36  ;;  %v2943_v3 = vperm.slane %v2897_v41, %v4706_v7 }
0x195e   :  { %v2903_v9 = vpop.permute.xlu0 %2902 }
0x195f   :  { %v2744_v21 = vpop.permute.xlu1 %2743  ;;  %v2945_v36 = vperm.slane %v2903_v9, %v4706_v7 }
0x1960   :  { %v2786_v5 = vperm.slane %v2744_v21, %v4706_v7 }
0x1962   :  { %v2801_v26 = vsel %vm2017_vm2, %v2786_v5, %v2800_v19 }
0x1966   :  { %v2906_v58 = vpop.permute.xlu0 %2905 }
0x1967   :  { %2528 = vmin.xlane.f32.xlu1 %v2527_v50  ;;  %v2747_v28 = vpop.permute.xlu1 %2746 }
0x1968   :  { %v2787_v55 = vperm.slane %v2747_v28, %v4706_v7 }
0x196a   :  { %v2802_v57 = vsel %vm2019_vm4, %v2787_v55, %v2801_v26  ;;  %v2959_v26 = vsel %vm2015_vm12, %v2944_v24, %v2943_v3 }
0x196b   :  { %v2960_v41 = vsel %vm2017_vm2, %v2945_v36, %v2959_v26 }
0x196e   :  { %v2909_v47 = vpop.permute.xlu0 %2908 }
0x196f   :  { %v2750_v59 = vpop.permute.xlu1 %2749  ;;  %v2947_v19 = vperm.slane %v2909_v47, %v4706_v7 }
0x1970   :  { %v2788_v40 = vperm.slane %v2750_v59, %v4706_v7  ;;  %v2946_v59 = vperm.slane %v2906_v58, %v4706_v7 }
0x1972   :  { %v2803_v20 = vsel %vm2021_vm1, %v2788_v40, %v2802_v57  ;;  %v2915_v40 = vpop.permute.xlu2 %2914 }
0x1973   :  { %v2804_v21 = vsel %vm2023_vm5, %v2789_v45, %v2803_v20  ;;  %v2961_v45 = vsel %vm2019_vm4, %v2946_v59, %v2960_v41  ;;  %v2949_v58 = vperm.slane %v2915_v40, %v4706_v7 }
0x1974   :  { %v2805_v28 = vsel %vm2025_vm7, %v2790_v4, %v2804_v21  ;;  %v2962_v14 = vsel %vm2021_vm1, %v2947_v19, %v2961_v45 }
0x1976   :  { %v2918_v20 = vpop.permute.xlu0 %2917 }
0x1977   :  { %v2759_v38 = vpop.permute.xlu1 %2758  ;;  %v2950_v47 = vperm.slane %v2918_v20, %v4706_v7 }
0x1978   :  { %v2791_v50 = vperm.slane %v2759_v38, %v4706_v7 }
0x197a   :  { %v2806_v5 = vsel %vm2027_vm8, %v2791_v50, %v2805_v28 }
0x197b   :  { %v5964_v55 = vsel %vm1794_vm11, %v2806_v5, 2147483647 }
0x197c   :  { %v2816_v42 = vshra.s32 %v5964_v55, 16 }
0x197e   :  { %v5971_v57 = vcvt.s32.f32 %v2816_v42  ;;  %v2771_v42 = vpop.permute.xlu0 %2770 }
0x197f   :  { %v2912_v9 = vpop.permute.xlu1 %2911 }
0x1980   :  { %v2948_v21 = vperm.slane %v2912_v9, %v4706_v7  ;;  %2819 = vmin.xlane.f32.xlu2 %v5971_v57  ;;  %v2795_v9 = vperm.slane %v2771_v42, %v4706_v7 }
0x1982   :  { %v2963_v4 = vsel %vm2023_vm5, %v2948_v21, %v2962_v14 }
0x1983   :  { %v2964_v38 = vsel %vm2025_vm7, %v2949_v58, %v2963_v4 }
0x1984   :  { %v2965_v50 = vsel %vm2027_vm8, %v2950_v47, %v2964_v38 }
0x1985   :  { %v2975_v28 = vsel %vm1794_vm11, %v2965_v50, -inf }
0x1986   :  { %2976 = vmax.xlane.f32.xlu1 %v2975_v28  ;;  %v2780_v4 = vpop.permute.xlu0 %2779 }
0x1987   :  { %v2762_v3 = vpop.permute.xlu1 %2761  ;;  %v2798_v50 = vperm.slane %v2780_v4, %v4706_v7 }
0x1988   :  { %v5984_v5 = vpop.xlane.xlu2 %2513  ;;  %v2792_v19 = vperm.slane %v2762_v3, %v4706_v7 }
0x1989   :  { %6636 = vst [vmem:[#allocation25_spill] sm:$0xff] %v5984_v5 }
0x198f   :  { %v2765_v36 = vpop.permute.xlu1 %2764 }
0x1990   :  { %v2793_v24 = vperm.slane %v2765_v36, %v4706_v7  ;;  %v2768_v59 = vpop.permute.xlu2 %2767 }
0x1991   :  { %v2794_v40 = vperm.slane %v2768_v59, %v4706_v7 }
0x1992   :  { %v2807_v26 = vsel %vm2015_vm12, %v2793_v24, %v2792_v19 }
0x1993   :  { %v2808_v41 = vsel %vm2017_vm2, %v2794_v40, %v2807_v26 }
0x1994   :  { %v2809_v58 = vsel %vm2019_vm4, %v2795_v9, %v2808_v41  ;;  %v2921_v41 = vpop.permute.xlu0 %2920 }
0x1997   :  { %v2774_v20 = vpop.permute.xlu1 %2773 }
0x1998   :  { %v2796_v45 = vperm.slane %v2774_v20, %v4706_v7  ;;  %v2777_v21 = vpop.permute.xlu2 %2776 }
0x1999   :  { %v2797_v14 = vperm.slane %v2777_v21, %v4706_v7 }
0x199a   :  { %v2810_v47 = vsel %vm2021_vm1, %v2796_v45, %v2809_v58  ;;  %v2951_v45 = vperm.slane %v2921_v41, %v4706_v7 }
0x199b   :  { %v2811_v38 = vsel %vm2023_vm5, %v2797_v14, %v2810_v47 }
0x199c   :  { %v2812_v24 = vsel %vm2025_vm7, %v2798_v50, %v2811_v38  ;;  %v2936_v50 = vpop.permute.xlu0 %2935 }
0x199f   :  { %v2783_v28 = vpop.permute.xlu1 %2782 }
0x19a0   :  { %v2799_v3 = vperm.slane %v2783_v28, %v4706_v7  ;;  %v2927_v36 = vpop.permute.xlu2 %2926 }
0x19a1   :  { %v2953_v58 = vperm.slane %v2927_v36, %v4706_v7 }
0x19a2   :  { %v2813_v59 = vsel %vm2027_vm8, %v2799_v3, %v2812_v24  ;;  %v2956_v24 = vperm.slane %v2936_v50, %v4706_v7 }
0x19a3   :  { %v6002_v42 = vsel %vm1794_vm11, %v2813_v59, 2147483647 }
0x19a4   :  { %v2831_v19 = vshra.s32 %v6002_v42, 16  ;;  %v2830_v62 = vand.u32 65535, %v6002_v42 }
0x19a6   :  { %v6005_v40 = vcvt.s32.f32 %v2831_v19  ;;  %v2832_v10 = vcvt.s32.f32 %v2830_v62 }
0x19a7   :  { %v2924_v26 = vpop.permute.xlu1 %2923 }
0x19a8   :  { %2834 = vmin.xlane.f32.xlu1 %v6005_v40  ;;  %v2930_v20 = vpop.permute.xlu2 %2929  ;;  %v2952_v9 = vperm.slane %v2924_v26, %v4706_v7 }
0x19a9   :  { %v2954_v14 = vperm.slane %v2930_v20, %v4706_v7 }
0x19aa   :  { %v2966_v21 = vsel %vm2015_vm12, %v2952_v9, %v2951_v45 }
0x19ab   :  { %v2967_v47 = vsel %vm2017_vm2, %v2953_v58, %v2966_v21 }
0x19ac   :  { %v2968_v28 = vsel %vm2019_vm4, %v2954_v14, %v2967_v47 }
0x19af   :  { %v2939_v59 = vpop.permute.xlu1 %2938 }
0x19b0   :  { %v2933_v4 = vpop.permute.xlu2 %2932  ;;  %v2957_v26 = vperm.slane %v2939_v59, %v4706_v7 }
0x19b1   :  { %v2955_v38 = vperm.slane %v2933_v4, %v4706_v7 }
0x19b3   :  { %v2969_v3 = vsel %vm2021_vm1, %v2955_v38, %v2968_v28 }
0x19b4   :  { %v2970_v19 = vsel %vm2023_vm5, %v2956_v24, %v2969_v3 }
0x19b5   :  { %v2971_v20 = vsel %vm2025_vm7, %v2957_v26, %v2970_v19  ;;  %v2815_v19 = vand.u32 65535, %v5964_v55 }
0x19b7   :  { %v2817_v26 = vcvt.s32.f32 %v2815_v19 }
0x19b8   :  { %v2942_v36 = vpop.permute.xlu2 %2941 }
0x19b9   :  { %v2958_v41 = vperm.slane %v2942_v36, %v4706_v7 }
0x19bb   :  { %v2972_v9 = vsel %vm2027_vm8, %v2958_v41, %v2971_v20 }
0x19bc   :  { %v2978_v45 = vsel %vm1794_vm11, %v2972_v9, -inf }
0x19bd   :  { %2979 = vmax.xlane.f32.xlu0 %v2978_v45 }
0x19da   :  { %v6024_v21 = vpop.xlane.xlu1 %2528 }
0x19db   :  { %6637 = vst [vmem:[#allocation26_spill] sm:$0xff] %v6024_v21 }
0x19f3   :  { %v6062_v59 = vpop.xlane.xlu2 %2819 }
0x19f4   :  { %vm2821_vm9 = vcmp.eq.f32.partialorder %v5971_v57, %v6062_v59 }
0x19f5   :  { %v2822_v36 = vsel %vm2821_vm9, %v2817_v26, inf }
0x19f9   :  { %v6026_v58 = vpop.xlane.xlu1 %2976 }
0x19fa   :  { %v3171_v14 = vadd.f32 %v5375_v52, %v6026_v58 }
0x19fc   :  { %v6031_v47 = vadd.f32 %v3171_v14, %v5239_v43  ;;  %v6034_v4 = vadd.f32 %v3171_v14, %v5237_v34  ;;  %v6037_v38 = vadd.f32 %v3171_v14, %v5253_v18  ;;  %v6043_v50 = vadd.f32 %v3171_v14, %v5255_v27 }
0x19fd   :  { %v6046_v52 = vadd.f32 %v3171_v14, %v5241_v54  ;;  %v6051_v28 = vadd.f32 %v3171_v14, %v5235_v30  ;;  %v6055_v3 = vadd.f32 %v3171_v14, %v5245_v32  ;;  %v6059_v24 = vadd.f32 %v3171_v14, %v5249_v8 }
0x19fe   :  { %3224 = vperm.xlu0 %4327, %v6031_v47   ;;  %3218 = vperm.xlu1 %4325, %v6034_v4  }
0x19ff   :  { %3206 = vperm.xlu2 %4326, %v6037_v38  }
0x1a06   :  { %3227 = vperm.xlu1 %4325, %v6043_v50  }
0x1a07   :  { %3209 = vperm.xlu2 %4326, %v6046_v52  }
0x1a0f   :  { %3212 = vperm.xlu2 %4326, %v6051_v28  }
0x1a17   :  { %3215 = vperm.xlu2 %4326, %v6055_v3  }
0x1a1f   :  { %3221 = vperm.xlu2 %4326, %v6059_v24  }
0x1a28   :  { %2823 = vmin.xlane.f32.xlu0 %v2822_v36 }
0x1a30   :  { %v6067_v41 = vpop.xlane.xlu0 %2979 }
0x1a31   :  { %v3172_v20 = vadd.f32 %v5387_v16, %v6067_v41  ;;  %v2991_v16 = vperm.slane %v6067_v41, 0 }
0x1a33   :  { %v6072_v9 = vadd.f32 %v3172_v20, %v5241_v54  ;;  %v6075_v45 = vadd.f32 %v3172_v20, %v5253_v18  ;;  %v6080_v55 = vadd.f32 %v3172_v20, %v5235_v30  ;;  %v6083_v57 = vadd.f32 %v3172_v20, %v5249_v8 }
0x1a34   :  { %v6086_v14 = vadd.f32 %v3172_v20, %v5245_v32  ;;  %vm3023_vm0 = vcmp.eq.f32.partialorder %v5901_v44, %v2991_v16  ;;  %v6094_v19 = vadd.f32 %v3172_v20, %v5237_v34  ;;  %v6097_v26 = vadd.f32 %v3172_v20, %v5239_v43  ;;  %v2835_v16 = vpop.xlane.xlu1 %2834 }
0x1a35   :  { %3233 = vperm.xlu1 %4325, %v6072_v9   ;;  %3230 = vperm.xlu2 %4326, %v6075_v45   ;;  %v3039_v36 = vsel %vm3023_vm0, %v5243_v6, 8  ;;  %v6103_v23 = vadd.f32 %v3172_v20, %v5255_v27  ;;  %vm2836_vm10 = vcmp.eq.f32.partialorder %v6005_v40, %v2835_v16 }
0x1a36   :  { %v2837_v12 = vsel %vm2836_vm10, %v2832_v10, inf }
0x1a3c   :  { %3236 = vperm.xlu0 %4327, %v6080_v55  }
0x1a3d   :  { %3245 = vperm.xlu1 %4325, %v6083_v57   ;;  %3239 = vperm.xlu2 %4326, %v6086_v14  }
0x1a44   :  { %3242 = vperm.xlu0 %4327, %v6094_v19  }
0x1a45   :  { %3072 = vperm.xlu1 %4325, %v3039_v36   ;;  %3248 = vperm.xlu2 %4326, %v6097_v26  }
0x1a4c   :  { %3251 = vperm.xlu0 %4327, %v6103_v23  }
0x1a59   :  { %v3207_v39 = vpop.permute.xlu2 %3206 }
0x1a5a   :  { %v3253_v21 = vperm.slane %v3207_v39, %v4706_v7 }
0x1a61   :  { %v3210_v44 = vpop.permute.xlu2 %3209 }
0x1a62   :  { %v3254_v5 = vperm.slane %v3210_v44, %v4706_v7 }
0x1a64   :  { %v3269_v25 = vsel %vm2015_vm12, %v3254_v5, %v3253_v21 }
0x1a69   :  { %v3213_v48 = vpop.permute.xlu2 %3212 }
0x1a6a   :  { %v3255_v20 = vperm.slane %v3213_v48, %v4706_v7 }
0x1a6c   :  { %v3270_v42 = vsel %vm2017_vm2, %v3255_v20, %v3269_v25 }
0x1a6e   :  { %2838 = vmin.xlane.f32.xlu2 %v2837_v12 }
0x1a70   :  { %v3219_v13 = vpop.permute.xlu1 %3218  ;;  %v3225_v40 = vpop.permute.xlu0 %3224 }
0x1a71   :  { %v3216_v36 = vpop.permute.xlu2 %3215  ;;  %v3257_v31 = vperm.slane %v3219_v13, %v4706_v7  ;;  %v3259_v44 = vperm.slane %v3225_v40, %v4706_v7 }
0x1a72   :  { %v3256_v46 = vperm.slane %v3216_v36, %v4706_v7 }
0x1a74   :  { %v3271_v62 = vsel %vm2019_vm4, %v3256_v46, %v3270_v42 }
0x1a75   :  { %v3272_v48 = vsel %vm2021_vm1, %v3257_v31, %v3271_v62 }
0x1a78   :  { %v3228_v10 = vpop.permute.xlu1 %3227 }
0x1a79   :  { %v3222_v12 = vpop.permute.xlu2 %3221  ;;  %v3260_v36 = vperm.slane %v3228_v10, %v4706_v7 }
0x1a7a   :  { %v3258_v63 = vperm.slane %v3222_v12, %v4706_v7 }
0x1a7c   :  { %v3273_v39 = vsel %vm2023_vm5, %v3258_v63, %v3272_v48 }
0x1a7d   :  { %v3274_v5 = vsel %vm2025_vm7, %v3259_v44, %v3273_v39 }
0x1a7e   :  { %v3275_v25 = vsel %vm2027_vm8, %v3260_v36, %v3274_v5 }
0x1a7f   :  { %v3285_v13 = vsel %vm1794_vm11, %v3275_v25, -inf }
0x1a80   :  { %3286 = vmax.xlane.f32.xlu2 %v3285_v13 }
0x1a8f   :  { %v3231_v21 = vpop.permute.xlu2 %3230 }
0x1a90   :  { %v3261_v63 = vperm.slane %v3231_v21, %v4706_v7 }
0x1a97   :  { %v3240_v12 = vpop.permute.xlu2 %3239 }
0x1a98   :  { %v3264_v48 = vperm.slane %v3240_v12, %v4706_v7 }
0x1a9b   :  { %v2824_v46 = vpop.xlane.xlu0 %2823 }
0x1a9f   :  { %v3249_v13 = vpop.permute.xlu2 %3248 }
0x1aa0   :  { %v3267_v21 = vperm.slane %v3249_v13, %v4706_v7 }
0x1aa7   :  { %v3234_v20 = vpop.permute.xlu1 %3233 }
0x1aa8   :  { %v3262_v40 = vperm.slane %v3234_v20, %v4706_v7 }
0x1aaa   :  { %v3276_v62 = vsel %vm2015_vm12, %v3262_v40, %v3261_v63 }
0x1aae   :  { %v3237_v42 = vpop.permute.xlu0 %3236 }
0x1aaf   :  { %v3263_v31 = vperm.slane %v3237_v42, %v4706_v7  ;;  %v3246_v36 = vpop.permute.xlu1 %3245 }
0x1ab0   :  { %v3266_v20 = vperm.slane %v3246_v36, %v4706_v7 }
0x1ab1   :  { %v3277_v10 = vsel %vm2017_vm2, %v3263_v31, %v3276_v62 }
0x1ab2   :  { %v3278_v5 = vsel %vm2019_vm4, %v3264_v48, %v3277_v10  ;;  %v2826_v10 = vcvt.f32.s32 %v6062_v59  ;;  %v2825_v48 = vcvt.f32.s32 %v2824_v46 }
0x1ab6   :  { %v3243_v44 = vpop.permute.xlu0 %3242 }
0x1ab7   :  { %v3265_v39 = vperm.slane %v3243_v44, %v4706_v7  ;;  %v2841_v44 = vcvt.f32.s32 %v2835_v16 }
0x1ab9   :  { %v3279_v25 = vsel %vm2021_vm1, %v3265_v39, %v3278_v5  ;;  %v2827_v39 = vshll.u32 %v2826_v10, 16  ;;  %v2842_v5 = vshll.u32 %v2841_v44, 16 }
0x1aba   :  { %v3280_v42 = vsel %vm2023_vm5, %v3266_v20, %v3279_v25 }
0x1abb   :  { %v3281_v63 = vsel %vm2025_vm7, %v3267_v21, %v3280_v42  ;;  %v2828_v25 = vadd.s32 %v2827_v39, %v2825_v48 }
0x1abd   :  { %v3921_v49 = vperm.slane %v2828_v25, %v4706_v7 }
0x1abe   :  { %v3252_v40 = vpop.permute.xlu0 %3251 }
0x1abf   :  { %v3268_v31 = vperm.slane %v3252_v40, %v4706_v7 }
0x1ac1   :  { %v3282_v12 = vsel %vm2027_vm8, %v3268_v31, %v3281_v63 }
0x1ac2   :  { %v3288_v62 = vsel %vm1794_vm11, %v3282_v12, -inf }
0x1ac3   :  { %3289 = vmax.xlane.f32.xlu1 %v3288_v62 }
0x1ae1   :  { %v2839_v36 = vpop.xlane.xlu2 %2838 }
0x1ae2   :  { %v2840_v20 = vcvt.f32.s32 %v2839_v36 }
0x1ae4   :  { %v2843_v13 = vadd.s32 %v2842_v5, %v2840_v20 }
0x1ae6   :  { %v3922_v40 = vperm.slane %v2843_v13, %v4706_v7 }
0x1ae8   :  { %v6144_v42 = vsel %vm2015_vm12, %v3922_v40, %v3921_v49 }
0x1af3   :  { %v3287_v21 = vpop.xlane.xlu2 %3286 }
0x1af4   :  { %v3481_v31 = vadd.f32 %v5403_v33, %v3287_v21  ;;  %v3293_v12 = vperm.slane %v3287_v21, 0  ;;  %v3299_v48 = vperm.slane %v3287_v21, 6  ;;  %v3294_v39 = vperm.slane %v3287_v21, 1 }
0x1af5   :  { %v3295_v36 = vperm.slane %v3287_v21, 2  ;;  %v3300_v20 = vperm.slane %v3287_v21, 7  ;;  %v3297_v13 = vperm.slane %v3287_v21, 4  ;;  %v3296_v40 = vperm.slane %v3287_v21, 3 }
0x1af6   :  { %v6148_v59 = vadd.f32 %v3481_v31, %v5241_v54  ;;  %v6151_v16 = vadd.f32 %v3481_v31, %v5253_v18  ;;  %v6154_v46 = vadd.f32 %v3481_v31, %v5237_v34  ;;  %v6160_v49 = vadd.f32 %v3481_v31, %v5245_v32 }
0x1af7   :  { %v6163_v33 = vadd.f32 %v3481_v31, %v5235_v30  ;;  %v6166_v63 = vadd.f32 %v3481_v31, %v5255_v27  ;;  %vm3325_vm13 = vcmp.eq.f32.partialorder %v6037_v38, %v3293_v12  ;;  %v6173_v62 = vadd.f32 %v3481_v31, %v5239_v43 }
0x1af8   :  { %3519 = vperm.xlu2 %4326, %v6148_v59   ;;  %3516 = vperm.xlu0 %4327, %v6151_v16   ;;  %v6176_v10 = vadd.f32 %v3481_v31, %v5249_v8  ;;  %v3341_v44 = vsel %vm3325_vm13, %v5243_v6, 8  ;;  %vm3331_vm3 = vcmp.eq.f32.partialorder %v6031_v47, %v3299_v48  ;;  %vm3326_vm14 = vcmp.eq.f32.partialorder %v6046_v52, %v3294_v39 }
0x1af9   :  { %3528 = vperm.xlu1 %4325, %v6154_v46   ;;  %vm3327_vm15 = vcmp.eq.f32.partialorder %v6051_v28, %v3295_v36  ;;  %v3347_v38 = vsel %vm3331_vm3, %v5243_v6, 8  ;;  %v3342_v5 = vsel %vm3326_vm14, %v5243_v6, 8  ;;  %vm3332_vm6 = vcmp.eq.f32.partialorder %v6043_v50, %v3300_v20  ;;  %v6195_v50 = vpop.permute.xlu1 %3072 }
0x1afa   :  { %v3343_v25 = vsel %vm3327_vm15, %v5243_v6, 8  ;;  %vm3329_vm9 = vcmp.eq.f32.partialorder %v6034_v4, %v3297_v13  ;;  %vm3328_vm0 = vcmp.eq.f32.partialorder %v6055_v3, %v3296_v40  ;;  %v3348_v47 = vsel %vm3332_vm6, %v5243_v6, 8 }
0x1afb   :  { %v3345_v52 = vsel %vm3329_vm9, %v5243_v6, 8  ;;  %v3344_v28 = vsel %vm3328_vm0, %v5243_v6, 8  ;;  %v3298_v31 = vperm.slane %v3287_v21, 5 }
0x1afd   :  { %vm3330_vm10 = vcmp.eq.f32.partialorder %v6059_v24, %v3298_v31 }
0x1afe   :  { %v3346_v12 = vsel %vm3330_vm10, %v5243_v6, 8 }
0x1b00   :  { %3525 = vperm.xlu2 %4326, %v6160_v49   ;;  %3522 = vperm.xlu0 %4327, %v6163_v33  }
0x1b01   :  { %3537 = vperm.xlu1 %4325, %v6166_v63  }
0x1b08   :  { %3534 = vperm.xlu2 %4326, %v6173_v62   ;;  %3531 = vperm.xlu0 %4327, %v6176_v10  }
0x1b09   :  { %3358 = vperm.xlu1 %4325, %v3341_v44  }
0x1b10   :  { %3376 = vperm.xlu2 %4326, %v3347_v38   ;;  %3361 = vperm.xlu0 %4327, %v3342_v5  }
0x1b11   :  { %3364 = vperm.xlu1 %4325, %v3343_v25  }
0x1b18   :  { %3379 = vperm.xlu2 %4326, %v3348_v47   ;;  %3370 = vperm.xlu0 %4327, %v3345_v52  }
0x1b19   :  { %3367 = vperm.xlu1 %4325, %v3344_v28  }
0x1b20   :  { %3373 = vperm.xlu0 %4327, %v3346_v12  }
0x1b36   :  { %v3290_v4 = vpop.xlane.xlu1 %3289 }
0x1b37   :  { %v3482_v3 = vadd.f32 %v5407_v37, %v3290_v4  ;;  %v3303_v21 = vperm.slane %v3290_v4, 2  ;;  %v3305_v36 = vperm.slane %v3290_v4, 4  ;;  %v3304_v38 = vperm.slane %v3290_v4, 3 }
0x1b38   :  { %v3306_v5 = vperm.slane %v3290_v4, 5  ;;  %v3307_v25 = vperm.slane %v3290_v4, 6 }
0x1b39   :  { %v6199_v44 = vadd.f32 %v3482_v3, %v5237_v34  ;;  %v6202_v48 = vadd.f32 %v3482_v3, %v5241_v54  ;;  %v6205_v39 = vadd.f32 %v3482_v3, %v5253_v18  ;;  %v6211_v24 = vadd.f32 %v3482_v3, %v5255_v27 }
0x1b3a   :  { %v6214_v37 = vadd.f32 %v3482_v3, %v5249_v8  ;;  %v6217_v34 = vadd.f32 %v3482_v3, %v5235_v30  ;;  %v3302_v54 = vperm.slane %v3290_v4, 1  ;;  %v3301_v18 = vperm.slane %v3290_v4, 0 }
0x1b3b   :  { %3552 = vperm.xlu2 %4326, %v6199_v44   ;;  %3543 = vperm.xlu1 %4325, %v6202_v48   ;;  %v6225_v27 = vadd.f32 %v3482_v3, %v5245_v32  ;;  %vm3335_vm14 = vcmp.eq.f32.partialorder %v6080_v55, %v3303_v21  ;;  %vm3337_vm15 = vcmp.eq.f32.partialorder %v6094_v19, %v3305_v36 }
0x1b3c   :  { %3540 = vperm.xlu0 %4327, %v6205_v39   ;;  %vm3334_vm13 = vcmp.eq.f32.partialorder %v6072_v9, %v3302_v54  ;;  %vm3333_vm3 = vcmp.eq.f32.partialorder %v6075_v45, %v3301_v18  ;;  %v6233_v9 = vadd.f32 %v3482_v3, %v5239_v43  ;;  %v3351_v32 = vsel %vm3335_vm14, %v5243_v6, 8 }
0x1b3d   :  { %v3350_v8 = vsel %vm3334_vm13, %v5243_v6, 8  ;;  %v3349_v30 = vsel %vm3333_vm3, %v5243_v6, 8  ;;  %v3353_v45 = vsel %vm3337_vm15, %v5243_v6, 8  ;;  %vm3336_vm6 = vcmp.eq.f32.partialorder %v6086_v14, %v3304_v38 }
0x1b3e   :  { %vm3338_vm9 = vcmp.eq.f32.partialorder %v6083_v57, %v3306_v5  ;;  %v3352_v55 = vsel %vm3336_vm6, %v5243_v6, 8  ;;  %v3308_v43 = vperm.slane %v3290_v4, 7  ;;  %vm3339_vm10 = vcmp.eq.f32.partialorder %v6097_v26, %v3307_v25 }
0x1b3f   :  { %v3354_v19 = vsel %vm3338_vm9, %v5243_v6, 8  ;;  %v3355_v13 = vsel %vm3339_vm10, %v5243_v6, 8 }
0x1b40   :  { %vm3340_vm0 = vcmp.eq.f32.partialorder %v6103_v23, %v3308_v43 }
0x1b41   :  { %v3356_v20 = vsel %vm3340_vm0, %v5243_v6, 8 }
0x1b43   :  { %3561 = vperm.xlu2 %4326, %v6211_v24   ;;  %3555 = vperm.xlu1 %4325, %v6214_v37  }
0x1b44   :  { %3546 = vperm.xlu0 %4327, %v6217_v34  }
0x1b4b   :  { %3385 = vperm.xlu1 %4325, %v3350_v8   ;;  %3382 = vperm.xlu2 %4326, %v3349_v30  }
0x1b4c   :  { %3549 = vperm.xlu0 %4327, %v6225_v27  }
0x1b52   :  { %v3520_v14 = vpop.permute.xlu2 %3519 }
0x1b53   :  { %3388 = vperm.xlu1 %4325, %v3351_v32   ;;  %3394 = vperm.xlu2 %4326, %v3353_v45   ;;  %v3564_v23 = vperm.slane %v3520_v14, %v4706_v7 }
0x1b54   :  { %3558 = vperm.xlu0 %4327, %v6233_v9  }
0x1b5a   :  { %v3526_v28 = vpop.permute.xlu2 %3525 }
0x1b5b   :  { %3391 = vperm.xlu1 %4325, %v3352_v55   ;;  %v3566_v18 = vperm.slane %v3526_v28, %v4706_v7 }
0x1b5c   :  { %3397 = vperm.xlu0 %4327, %v3354_v19  }
0x1b62   :  { %v3535_v8 = vpop.permute.xlu2 %3534 }
0x1b63   :  { %3403 = vperm.xlu1 %4325, %v3356_v20   ;;  %v3569_v25 = vperm.slane %v3535_v8, %v4706_v7 }
0x1b64   :  { %3400 = vperm.xlu0 %4327, %v3355_v13  }
0x1b6a   :  { %v3517_v57 = vpop.permute.xlu0 %3516 }
0x1b6b   :  { %v3529_v40 = vpop.permute.xlu1 %3528  ;;  %v3563_v31 = vperm.slane %v3517_v57, %v4706_v7  ;;  %v3377_v57 = vpop.permute.xlu2 %3376 }
0x1b6c   :  { %v3567_v36 = vperm.slane %v3529_v40, %v4706_v7 }
0x1b6d   :  { %v3579_v3 = vsel %vm2015_vm12, %v3564_v23, %v3563_v31 }
0x1b72   :  { %v3523_v47 = vpop.permute.xlu0 %3522 }
0x1b73   :  { %v3538_v52 = vpop.permute.xlu1 %3537  ;;  %v3565_v12 = vperm.slane %v3523_v47, %v4706_v7 }
0x1b74   :  { %v3570_v40 = vperm.slane %v3538_v52, %v4706_v7  ;;  %v3411_v52 = vperm.slane %v3377_v57, %v4706_v7 }
0x1b75   :  { %v3580_v54 = vsel %vm2017_vm2, %v3565_v12, %v3579_v3 }
0x1b76   :  { %v3581_v30 = vsel %vm2019_vm4, %v3566_v18, %v3580_v54  ;;  %v3380_v54 = vpop.permute.xlu2 %3379 }
0x1b77   :  { %v3582_v45 = vsel %vm2021_vm1, %v3567_v36, %v3581_v30  ;;  %v3412_v30 = vperm.slane %v3380_v54, %v4706_v7 }
0x1b7a   :  { %v3532_v4 = vpop.permute.xlu0 %3531 }
0x1b7b   :  { %v3359_v26 = vpop.permute.xlu1 %3358  ;;  %v3568_v21 = vperm.slane %v3532_v4, %v4706_v7 }
0x1b7c   :  { %v3405_v38 = vperm.slane %v3359_v26, %v4706_v7 }
0x1b7d   :  { %v3583_v19 = vsel %vm2023_vm5, %v3568_v21, %v3582_v45 }
0x1b7e   :  { %v3584_v14 = vsel %vm2025_vm7, %v3569_v25, %v3583_v19 }
0x1b7f   :  { %v3585_v28 = vsel %vm2027_vm8, %v3570_v40, %v3584_v14 }
0x1b80   :  { %v3595_v4 = vsel %vm1794_vm11, %v3585_v28, -inf }
0x1b82   :  { %v3362_v32 = vpop.permute.xlu0 %3361 }
0x1b83   :  { %v3406_v5 = vperm.slane %v3362_v32, %v4706_v7  ;;  %v3365_v55 = vpop.permute.xlu1 %3364 }
0x1b84   :  { %v3407_v43 = vperm.slane %v3365_v55, %v4706_v7 }
0x1b85   :  { %v3421_v20 = vsel %vm2015_vm12, %v3406_v5, %v3405_v38 }
0x1b86   :  { %v3422_v13 = vsel %vm2017_vm2, %v3407_v43, %v3421_v20 }
0x1b8a   :  { %v3371_v47 = vpop.permute.xlu0 %3370 }
0x1b8b   :  { %v3409_v31 = vperm.slane %v3371_v47, %v4706_v7  ;;  %v3368_v12 = vpop.permute.xlu1 %3367 }
0x1b8c   :  { %v3408_v23 = vperm.slane %v3368_v12, %v4706_v7 }
0x1b8e   :  { %v3423_v26 = vsel %vm2019_vm4, %v3408_v23, %v3422_v13  ;;  %3596 = vmax.xlane.f32.xlu0 %v3595_v4 }
0x1b8f   :  { %v3424_v3 = vsel %vm2021_vm1, %v3409_v31, %v3423_v26 }
0x1b92   :  { %v3374_v18 = vpop.permute.xlu0 %3373 }
0x1b93   :  { %v3410_v8 = vperm.slane %v3374_v18, %v4706_v7 }
0x1b95   :  { %v3425_v21 = vsel %vm2023_vm5, %v3410_v8, %v3424_v3  ;;  %v3553_v45 = vpop.permute.xlu2 %3552 }
0x1b96   :  { %v3426_v36 = vsel %vm2025_vm7, %v3411_v52, %v3425_v21  ;;  %v3575_v3 = vperm.slane %v3553_v45, %v4706_v7 }
0x1b97   :  { %v6277_v32 = vsel %vm2027_vm8, %v3412_v30, %v3426_v36 }
0x1b9d   :  { %v3562_v55 = vpop.permute.xlu2 %3561 }
0x1b9e   :  { %v3578_v36 = vperm.slane %v3562_v55, %v4706_v7 }
0x1ba5   :  { %v3383_v25 = vpop.permute.xlu2 %3382 }
0x1ba6   :  { %v3413_v40 = vperm.slane %v3383_v25, %v4706_v7 }
0x1bad   :  { %v3544_v38 = vpop.permute.xlu1 %3543 }
0x1bae   :  { %v3541_v5 = vpop.permute.xlu0 %3540  ;;  %v3572_v13 = vperm.slane %v3544_v38, %v4706_v7 }
0x1baf   :  { %v3571_v20 = vperm.slane %v3541_v5, %v4706_v7 }
0x1bb1   :  { %v3586_v12 = vsel %vm2015_vm12, %v3572_v13, %v3571_v20  ;;  %v3395_v20 = vpop.permute.xlu2 %3394 }
0x1bb5   :  { %v3556_v19 = vpop.permute.xlu1 %3555 }
0x1bb6   :  { %v3547_v43 = vpop.permute.xlu0 %3546  ;;  %v3576_v8 = vperm.slane %v3556_v19, %v4706_v7 }
0x1bb7   :  { %v3573_v14 = vperm.slane %v3547_v43, %v4706_v7 }
0x1bb9   :  { %v3587_v4 = vsel %vm2017_vm2, %v3573_v14, %v3586_v12 }
0x1bbd   :  { %v3386_v57 = vpop.permute.xlu1 %3385 }
0x1bbe   :  { %v3550_v47 = vpop.permute.xlu0 %3549  ;;  %v3414_v28 = vperm.slane %v3386_v57, %v4706_v7  ;;  %v3417_v57 = vperm.slane %v3395_v20, %v4706_v7 }
0x1bbf   :  { %v3574_v31 = vperm.slane %v3550_v47, %v4706_v7 }
0x1bc0   :  { %v3428_v23 = vsel %vm2015_vm12, %v3414_v28, %v3413_v40 }
0x1bc1   :  { %v3588_v26 = vsel %vm2019_vm4, %v3574_v31, %v3587_v4 }
0x1bc2   :  { %v3589_v54 = vsel %vm2021_vm1, %v3575_v3, %v3588_v26 }
0x1bc3   :  { %v3590_v5 = vsel %vm2023_vm5, %v3576_v8, %v3589_v54 }
0x1bc5   :  { %v3389_v18 = vpop.permute.xlu1 %3388 }
0x1bc6   :  { %v3559_v52 = vpop.permute.xlu0 %3558  ;;  %v3415_v30 = vperm.slane %v3389_v18, %v4706_v7 }
0x1bc7   :  { %v3577_v21 = vperm.slane %v3559_v52, %v4706_v7 }
0x1bc8   :  { %v3429_v38 = vsel %vm2017_vm2, %v3415_v30, %v3428_v23 }
0x1bc9   :  { %v3591_v43 = vsel %vm2025_vm7, %v3577_v21, %v3590_v5 }
0x1bca   :  { %v3592_v45 = vsel %vm2027_vm8, %v3578_v36, %v3591_v43 }
0x1bcb   :  { %v3598_v25 = vsel %vm1794_vm11, %v3592_v45, -inf }
0x1bcc   :  { %3599 = vmax.xlane.f32.xlu1 %v3598_v25  ;;  %v6638_v25 = vld [vmem:[#allocation11_spill] sm:$0xff] }
0x1bcd   :  { %v3392_v19 = vpop.permute.xlu1 %3391 }
0x1bce   :  { %v3398_v13 = vpop.permute.xlu0 %3397  ;;  %v3416_v14 = vperm.slane %v3392_v19, %v4706_v7 }
0x1bcf   :  { %v3418_v55 = vperm.slane %v3398_v13, %v4706_v7 }
0x1bd0   :  { %v3430_v40 = vsel %vm2019_vm4, %v3416_v14, %v3429_v38 }
0x1bd1   :  { %v3431_v47 = vsel %vm2021_vm1, %v3417_v57, %v3430_v40 }
0x1bd2   :  { %v3432_v28 = vsel %vm2023_vm5, %v3418_v55, %v3431_v47  ;;  %v2985_v47 = vperm.slane %v6026_v58, 2 }
0x1bd6   :  { %v3401_v31 = vpop.permute.xlu0 %3400 }
0x1bd7   :  { %v3419_v12 = vperm.slane %v3401_v31, %v4706_v7 }
0x1bd9   :  { %v6308_v23 = vsel %vm2025_vm7, %v3419_v12, %v3432_v28  ;;  %v2993_v12 = vperm.slane %v6067_v41, 2 }
0x1c01   :  { %v3597_v4 = vpop.xlane.xlu0 %3596 }
0x1c02   :  { %v3791_v26 = vadd.f32 %v5397_v61, %v3597_v4  ;;  %v3608_v3 = vperm.slane %v3597_v4, 5  ;;  %v3603_v54 = vperm.slane %v3597_v4, 0  ;;  %v3604_v30 = vperm.slane %v3597_v4, 1 }
0x1c03   :  { %v3606_v21 = vperm.slane %v3597_v4, 3  ;;  %v3609_v36 = vperm.slane %v3597_v4, 6  ;;  %v3610_v43 = vperm.slane %v3597_v4, 7 }
0x1c04   :  { %v6312_v18 = vadd.f32 %v5247_v51, %v3791_v26  ;;  %vm3640_vm13 = vcmp.eq.f32.partialorder %v6176_v10, %v3608_v3  ;;  %vm3635_vm3 = vcmp.eq.f32.partialorder %v6151_v16, %v3603_v54  ;;  %vm3636_vm14 = vcmp.eq.f32.partialorder %v6148_v59, %v3604_v30 }
0x1c05   :  { %v3656_v8 = vsel %vm3640_vm13, %v5243_v6, 8  ;;  %v3651_v52 = vsel %vm3635_vm3, %v5243_v6, 8  ;;  %vm3638_vm15 = vcmp.eq.f32.partialorder %v6160_v49, %v3606_v21  ;;  %v3652_v61 = vsel %vm3636_vm14, %v5243_v6, 8 }
0x1c06   :  { %3808 = vperm.xlu2 %4326, %v6312_v18   ;;  %3683 = vperm.xlu0 %4327, %v3656_v8   ;;  %v3654_v10 = vsel %vm3638_vm15, %v5243_v6, 8  ;;  %v3605_v16 = vperm.slane %v3597_v4, 2  ;;  %vm3641_vm9 = vcmp.eq.f32.partialorder %v6173_v62, %v3609_v36  ;;  %v3607_v59 = vperm.slane %v3597_v4, 4 }
0x1c07   :  { %3668 = vperm.xlu1 %4325, %v3651_v52   ;;  %v3657_v5 = vsel %vm3641_vm9, %v5243_v6, 8  ;;  %vm3642_vm10 = vcmp.eq.f32.partialorder %v6166_v63, %v3610_v43  ;;  %vm3017_vm9 = vcmp.eq.f32.partialorder %v5855_v29, %v2985_v47  ;;  %v2987_v3 = vperm.slane %v6026_v58, 4 }
0x1c08   :  { %vm3637_vm6 = vcmp.eq.f32.partialorder %v6163_v33, %v3605_v16  ;;  %vm3639_vm0 = vcmp.eq.f32.partialorder %v6154_v46, %v3607_v59  ;;  %v3658_v45 = vsel %vm3642_vm10, %v5243_v6, 8  ;;  %v6331_v33 = vpop.permute.xlu1 %3403 }
0x1c09   :  { %v3653_v38 = vsel %vm3637_vm6, %v5243_v6, 8  ;;  %v3655_v49 = vsel %vm3639_vm0, %v5243_v6, 8 }
0x1c0e   :  { %3671 = vperm.xlu2 %4326, %v3652_v61  }
0x1c0f   :  { %3677 = vperm.xlu1 %4325, %v3654_v10  }
0x1c16   :  { %3674 = vperm.xlu2 %4326, %v3653_v38  }
0x1c17   :  { %3686 = vperm.xlu1 %4325, %v3657_v5  }
0x1c1e   :  { %3680 = vperm.xlu2 %4326, %v3655_v49  }
0x1c26   :  { %3689 = vperm.xlu2 %4326, %v3658_v45  }
0x1c3f   :  { %v3600_v62 = vpop.xlane.xlu1 %3599 }
0x1c40   :  { %v3792_v20 = vadd.f32 %v6638_v25, %v3600_v62  ;;  %v3615_v19 = vperm.slane %v3600_v62, 4  ;;  %v3611_v13 = vperm.slane %v3600_v62, 0  ;;  %v3618_v57 = vperm.slane %v3600_v62, 7 }
0x1c41   :  { %v3612_v55 = vperm.slane %v3600_v62, 1  ;;  %v3614_v40 = vperm.slane %v3600_v62, 3  ;;  %v3613_v28 = vperm.slane %v3600_v62, 2  ;;  %v3617_v31 = vperm.slane %v3600_v62, 6 }
0x1c42   :  { %v6335_v14 = vadd.f32 %v5247_v51, %v3792_v20  ;;  %vm3647_vm13 = vcmp.eq.f32.partialorder %v6199_v44, %v3615_v19  ;;  %vm3643_vm3 = vcmp.eq.f32.partialorder %v6205_v39, %v3611_v13  ;;  %vm3650_vm14 = vcmp.eq.f32.partialorder %v6211_v24, %v3618_v57 }
0x1c43   :  { %v3663_v46 = vsel %vm3647_vm13, %v5243_v6, 8  ;;  %v3659_v63 = vsel %vm3643_vm3, %v5243_v6, 8  ;;  %vm3644_vm15 = vcmp.eq.f32.partialorder %v6202_v48, %v3612_v55  ;;  %vm3646_vm6 = vcmp.eq.f32.partialorder %v6225_v27, %v3614_v40 }
0x1c44   :  { %3811 = vperm.xlu2 %4326, %v6335_v14   ;;  %3704 = vperm.xlu1 %4325, %v3663_v46   ;;  %v3666_v51 = vsel %vm3650_vm14, %v5243_v6, 8  ;;  %v3660_v44 = vsel %vm3644_vm15, %v5243_v6, 8  ;;  %v3662_v39 = vsel %vm3646_vm6, %v5243_v6, 8  ;;  %vm3645_vm0 = vcmp.eq.f32.partialorder %v6217_v34, %v3613_v28 }
0x1c45   :  { %3692 = vperm.xlu0 %4327, %v3659_v63   ;;  %vm3649_vm10 = vcmp.eq.f32.partialorder %v6233_v9, %v3617_v31  ;;  %v3033_v48 = vsel %vm3017_vm9, %v5243_v6, 8  ;;  %v3661_v24 = vsel %vm3645_vm0, %v5243_v6, 8  ;;  %v3616_v4 = vperm.slane %v3600_v62, 5 }
0x1c46   :  { %v3665_v27 = vsel %vm3649_vm10, %v5243_v6, 8  ;;  %vm3025_vm13 = vcmp.eq.f32.partialorder %v5925_v1, %v2993_v12  ;;  %v2986_v9 = vperm.slane %v6026_v58, 3  ;;  %vm3019_vm15 = vcmp.eq.f32.partialorder %v5871_v56, %v2987_v3 }
0x1c47   :  { %vm3648_vm3 = vcmp.eq.f32.partialorder %v6214_v37, %v3616_v4  ;;  %v3041_v29 = vsel %vm3025_vm13, %v5243_v6, 8  ;;  %v3035_v1 = vsel %vm3019_vm15, %v5243_v6, 8  ;;  %v2988_v37 = vperm.slane %v6026_v58, 5 }
0x1c48   :  { %v3664_v34 = vsel %vm3648_vm3, %v5243_v6, 8  ;;  %vm3018_vm14 = vcmp.eq.f32.partialorder %v5865_v60, %v2986_v9  ;;  %vm3817_vm9 = vcmask 58368  }
0x1c49   :  { %v3034_v26 = vsel %vm3018_vm14, %v5243_v6, 8  ;;  %vm3020_vm6 = vcmp.eq.f32.partialorder %v5886_v11, %v2988_v37 }
0x1c4a   :  { %v3036_v8 = vsel %vm3020_vm6, %v5243_v6, 8 }
0x1c4c   :  { %3713 = vperm.xlu1 %4325, %v3666_v51   ;;  %3695 = vperm.xlu2 %4326, %v3660_v44  }
0x1c4d   :  { %3701 = vperm.xlu0 %4327, %v3662_v39  }
0x1c54   :  { %3054 = vperm.xlu1 %4325, %v3033_v48   ;;  %3698 = vperm.xlu2 %4326, %v3661_v24  }
0x1c55   :  { %3710 = vperm.xlu0 %4327, %v3665_v27  }
0x1c5c   :  { %3078 = vperm.xlu1 %4325, %v3041_v29   ;;  %3707 = vperm.xlu2 %4326, %v3664_v34  }
0x1c60   :  { %v3809_v54 = vpop.permute.xlu2 %3808 }
0x1c61   :  { %v3813_v57 = vperm.slane %v3809_v54, %v4706_v7 }
0x1c64   :  { %3057 = vperm.xlu1 %4325, %v3034_v26  }
0x1c68   :  { %v3672_v52 = vpop.permute.xlu2 %3671 }
0x1c69   :  { %v3716_v56 = vperm.slane %v3672_v52, %v4706_v7 }
0x1c6c   :  { %3060 = vperm.xlu1 %4325, %v3035_v1  }
0x1c70   :  { %v3675_v30 = vpop.permute.xlu2 %3674 }
0x1c71   :  { %v3717_v38 = vperm.slane %v3675_v30, %v4706_v7 }
0x1c74   :  { %3063 = vperm.xlu1 %4325, %v3036_v8  }
0x1c78   :  { %v3681_v61 = vpop.permute.xlu2 %3680  ;;  %v3684_v49 = vpop.permute.xlu0 %3683 }
0x1c79   :  { %v3669_v60 = vpop.permute.xlu1 %3668  ;;  %v3719_v43 = vperm.slane %v3681_v61, %v4706_v7  ;;  %v3720_v20 = vperm.slane %v3684_v49, %v4706_v7 }
0x1c7a   :  { %v3715_v10 = vperm.slane %v3669_v60, %v4706_v7 }
0x1c7c   :  { %v3731_v16 = vsel %vm2015_vm12, %v3716_v56, %v3715_v10 }
0x1c7d   :  { %v3732_v11 = vsel %vm2017_vm2, %v3717_v38, %v3731_v16 }
0x1c80   :  { %v3690_v45 = vpop.permute.xlu2 %3689 }
0x1c81   :  { %v3678_v21 = vpop.permute.xlu1 %3677  ;;  %v3722_v46 = vperm.slane %v3690_v45, %v4706_v7 }
0x1c82   :  { %v3718_v36 = vperm.slane %v3678_v21, %v4706_v7 }
0x1c84   :  { %v3733_v5 = vsel %vm2019_vm4, %v3718_v36, %v3732_v11 }
0x1c85   :  { %v3734_v62 = vsel %vm2021_vm1, %v3719_v43, %v3733_v5 }
0x1c86   :  { %v3735_v19 = vsel %vm2023_vm5, %v3720_v20, %v3734_v62  ;;  %v3420_v62 = vperm.slane %v6331_v33, %v4706_v7  ;;  %v6421_v20 = vsel %vm1794_vm11, %v6277_v32, 2147483647  ;;  %v2983_v32 = vperm.slane %v6026_v58, 0 }
0x1c88   :  { %vm3015_vm3 = vcmp.eq.f32.partialorder %v5845_v22, %v2983_v32 }
0x1c89   :  { %v3687_v59 = vpop.permute.xlu1 %3686 }
0x1c8a   :  { %v3721_v25 = vperm.slane %v3687_v59, %v4706_v7 }
0x1c8c   :  { %v3736_v13 = vsel %vm2025_vm7, %v3721_v25, %v3735_v19  ;;  %v3434_v25 = vsel %vm2027_vm8, %v3420_v62, %v6308_v23  ;;  %v2984_v23 = vperm.slane %v6026_v58, 1 }
0x1c8d   :  { %v3737_v40 = vsel %vm2027_vm8, %v3722_v46, %v3736_v13 }
0x1c8e   :  { %v6389_v39 = vsel %vm1794_vm11, %v3737_v40, 2147483647  ;;  %vm3016_vm13 = vcmp.eq.f32.partialorder %v5848_v2, %v2984_v23  ;;  %v2995_v2 = vperm.slane %v6067_v41, 4 }
0x1c8f   :  { %v3747_v47 = vshra.s32 %v6389_v39, 16  ;;  %v3032_v33 = vsel %vm3016_vm13, %v5243_v6, 8 }
0x1c90   :  { %vm3027_vm6 = vcmp.eq.f32.partialorder %v5936_v15, %v2995_v2 }
0x1c91   :  { %v6392_v28 = vcvt.s32.f32 %v3747_v47  ;;  %v3043_v22 = vsel %vm3027_vm6, %v5243_v6, 8 }
0x1c9e   :  { %v3812_v63 = vpop.permute.xlu2 %3811 }
0x1c9f   :  { %v3814_v55 = vperm.slane %v3812_v63, %v4706_v7  ;;  %v2992_v63 = vperm.slane %v6067_v41, 1 }
0x1ca1   :  { %v3815_v51 = vsel %vm2015_vm12, %v3814_v55, %v3813_v57  ;;  %v3031_v57 = vsel %vm3015_vm3, %v5243_v6, 8  ;;  %v2994_v55 = vperm.slane %v6067_v41, 3  ;;  %vm3024_vm14 = vcmp.eq.f32.partialorder %v5917_v35, %v2992_v63 }
0x1ca2   :  { %v3818_v44 = vsel %vm3817_vm9, %v3815_v51, -inf  ;;  %v3040_v40 = vsel %vm3024_vm14, %v5243_v6, 8 }
0x1ca3   :  { %3819 = vmax.xlane.f32.xlu0 %v3818_v44  ;;  %vm3026_vm15 = vcmp.eq.f32.partialorder %v5930_v0, %v2994_v55  ;;  %v6641_v55 = vld [vmem:[#allocation19_spill] sm:$0xff] }
0x1ca4   :  { %v3042_v51 = vsel %vm3026_vm15, %v5243_v6, 8 }
0x1ca6   :  { %v3696_v31 = vpop.permute.xlu2 %3695 }
0x1ca7   :  { %v3724_v4 = vperm.slane %v3696_v31, %v4706_v7 }
0x1cab   :  { %3750 = vmin.xlane.f32.xlu0 %v6392_v28 }
0x1cae   :  { %v3699_v24 = vpop.permute.xlu2 %3698 }
0x1caf   :  { %v3725_v9 = vperm.slane %v3699_v24, %v4706_v7  ;;  %v3746_v24 = vand.u32 65535, %v6389_v39  ;;  %v2989_v39 = vperm.slane %v6026_v58, 6 }
0x1cb1   :  { %vm3021_vm13 = vcmp.eq.f32.partialorder %v5858_v53, %v2989_v39 }
0x1cb6   :  { %v3705_v12 = vpop.permute.xlu1 %3704  ;;  %v3708_v37 = vpop.permute.xlu2 %3707 }
0x1cb7   :  { %v3693_v48 = vpop.permute.xlu0 %3692  ;;  %v3727_v54 = vperm.slane %v3705_v12, %v4706_v7  ;;  %v3728_v60 = vperm.slane %v3708_v37, %v4706_v7  ;;  %v2998_v37 = vperm.slane %v6067_v41, 7 }
0x1cb8   :  { %v3723_v27 = vperm.slane %v3693_v48, %v4706_v7 }
0x1cba   :  { %v3738_v29 = vsel %vm2015_vm12, %v3724_v4, %v3723_v27 }
0x1cbb   :  { %v3739_v3 = vsel %vm2017_vm2, %v3725_v9, %v3738_v29  ;;  %v3748_v29 = vcvt.s32.f32 %v3746_v24 }
0x1cbe   :  { %v3714_v52 = vpop.permute.xlu1 %3713 }
0x1cbf   :  { %v3702_v34 = vpop.permute.xlu0 %3701  ;;  %v3730_v61 = vperm.slane %v3714_v52, %v4706_v7  ;;  %v6639_v52 = vld [vmem:[#allocation24_spill] sm:$0xff] }
0x1cc0   :  { %v3726_v26 = vperm.slane %v3702_v34, %v4706_v7  ;;  %vm3030_vm14 = vcmp.eq.f32.partialorder %v6639_v52, %v2998_v37 }
0x1cc2   :  { %v3740_v1 = vsel %vm2019_vm4, %v3726_v26, %v3739_v3 }
0x1cc3   :  { %v3741_v8 = vsel %vm2021_vm1, %v3727_v54, %v3740_v1  ;;  %v2997_v1 = vperm.slane %v6067_v41, 6 }
0x1cc4   :  { %v3742_v10 = vsel %vm2023_vm5, %v3728_v60, %v3741_v8  ;;  %v2996_v8 = vperm.slane %v6067_v41, 5  ;;  %v6640_v60 = vld [vmem:[#allocation22_spill] sm:$0xff]  ;;  %v3436_v41 = vand.u32 65535, %v6421_v20 }
0x1cc5   :  { %vm3029_vm3 = vcmp.eq.f32.partialorder %v5922_v17, %v2997_v1 }
0x1cc6   :  { %v3045_v54 = vsel %vm3029_vm3, %v5243_v6, 8  ;;  %vm3028_vm15 = vcmp.eq.f32.partialorder %v6640_v60, %v2996_v8  ;;  %v3055_v53 = vpop.permute.xlu1 %3054 }
0x1cc7   :  { %v3711_v30 = vpop.permute.xlu0 %3710  ;;  %v3044_v17 = vsel %vm3028_vm15, %v5243_v6, 8 }
0x1cc8   :  { %v3729_v21 = vperm.slane %v3711_v30, %v4706_v7  ;;  %v3046_v30 = vsel %vm3030_vm14, %v5243_v6, 8  ;;  %vm3917_vm14 = vcmp.eq.s32.totalorder %v4706_v7, 4 }
0x1cca   :  { %v3743_v56 = vsel %vm2025_vm7, %v3729_v21, %v3742_v10 }
0x1ccb   :  { %v3744_v16 = vsel %vm2027_vm8, %v3730_v61, %v3743_v56 }
0x1ccc   :  { %v3760_v36 = vsel %vm1794_vm11, %v3744_v16, 2147483647 }
0x1ccd   :  { %v3762_v38 = vshra.s32 %v3760_v36, 16  ;;  %v3761_v35 = vand.u32 65535, %v3760_v36 }
0x1cce   :  { %v3079_v21 = vpop.permute.xlu1 %3078 }
0x1ccf   :  { %v3764_v11 = vcvt.s32.f32 %v3762_v38  ;;  %v3763_v31 = vcvt.s32.f32 %v3761_v35 }
0x1cd1   :  { %3765 = vmin.xlane.f32.xlu2 %v3764_v11 }
0x1cd6   :  { %v3058_v10 = vpop.permute.xlu1 %3057 }
0x1cde   :  { %v3061_v38 = vpop.permute.xlu1 %3060 }
0x1cdf   :  { %v3099_v62 = vperm.slane %v3061_v38, %v4706_v7 }
0x1ce6   :  { %v6491_v23 = vpop.permute.xlu1 %3063 }
0x1d16   :  { %v3820_v5 = vpop.xlane.xlu0 %3819 }
0x1d17   :  { %v3822_v59 = vperm.slane %v3820_v5, 0  ;;  %v3823_v49 = vperm.slane %v3820_v5, 1 }
0x1d19   :  { %vm3826_vm0 = vcmp.eq.f32.partialorder %v6312_v18, %v3822_v59  ;;  %vm3827_vm10 = vcmp.eq.f32.partialorder %v6335_v14, %v3823_v49  ;;  %v6424_v18 = vsel %vm1794_vm11, %v3434_v25, 2147483647  ;;  %v3437_v14 = vshra.s32 %v6421_v20, 16 }
0x1d1a   :  { %v3828_v43 = vsel %vm3826_vm0, %v5243_v6, 8  ;;  %v3829_v45 = vsel %vm3827_vm10, %v5243_v6, 8  ;;  %v3452_v19 = vshra.s32 %v6424_v18, 16  ;;  %v3097_v59 = vperm.slane %v3055_v53, %v4706_v7 }
0x1d1b   :  { %3831 = vperm.xlu0 %4327, %v3828_v43   ;;  %3834 = vperm.xlu2 %4326, %v3829_v45   ;;  %v6428_v13 = vcvt.s32.f32 %v3437_v14  ;;  %v3098_v49 = vperm.slane %v3058_v10, %v4706_v7  ;;  %v3438_v45 = vcvt.s32.f32 %v3436_v41  ;;  %v3451_v2 = vand.u32 65535, %v6424_v18 }
0x1d1c   :  { %v6430_v46 = vcvt.s32.f32 %v3452_v19 }
0x1d1e   :  { %v6451_v47 = vpop.xlane.xlu0 %3750 }
0x1d1f   :  { %vm3752_vm10 = vcmp.eq.f32.partialorder %v6392_v28, %v6451_v47  ;;  %v3037_v28 = vsel %vm3021_vm13, %v5243_v6, 8 }
0x1d20   :  { %v3753_v9 = vsel %vm3752_vm10, %v3748_v29, inf  ;;  %v3105_v29 = vperm.slane %v3079_v21, %v4706_v7 }
0x1d44   :  { %3440 = vmin.xlane.f32.xlu2 %v6428_v13  ;;  %v6449_v44 = vpop.xlane.xlu2 %3765 }
0x1d45   :  { %3455 = vmin.xlane.f32.xlu0 %v6430_v46  ;;  %vm3767_vm0 = vcmp.eq.f32.partialorder %v3764_v11, %v6449_v44  ;;  %v3772_v18 = vcvt.f32.s32 %v6449_v44 }
0x1d46   :  { %v3768_v48 = vsel %vm3767_vm0, %v3763_v31, inf }
0x1d59   :  { %3051 = vperm.xlu0 %4327, %v3032_v33  }
0x1d5c   :  { %3048 = vperm.xlu2 %4326, %v3031_v57   ;;  %v2990_v57 = vperm.slane %v6026_v58, 7 }
0x1d5e   :  { %vm3022_vm10 = vcmp.eq.f32.partialorder %v6641_v55, %v2990_v57 }
0x1d61   :  { %3075 = vperm.xlu0 %4327, %v3040_v40   ;;  %v3038_v40 = vsel %vm3022_vm10, %v5243_v6, 8  ;;  %v3103_v6 = vperm.slane %v6195_v50, %v4706_v7  ;;  %vm3959_vm10 = vcmp.eq.s32.totalorder %v4706_v7, 2 }
0x1d64   :  { %3081 = vperm.xlu2 %4326, %v3042_v51   ;;  %v3453_v51 = vcvt.s32.f32 %v3451_v2 }
0x1d69   :  { %3084 = vperm.xlu0 %4327, %v3043_v22  }
0x1d75   :  { %v3835_v0 = vpop.permute.xlu2 %3834 }
0x1d76   :  { %v3837_v12 = vperm.slane %v3835_v0, %v4706_v7 }
0x1d8d   :  { %v3832_v27 = vpop.permute.xlu0 %3831  ;;  %3769 = vmin.xlane.f32.xlu2 %v3768_v48 }
0x1d8e   :  { %v3836_v15 = vperm.slane %v3832_v27, %v4706_v7  ;;  %v3757_v27 = vcvt.f32.s32 %v6451_v47 }
0x1d90   :  { %v3838_v4 = vsel %vm2015_vm12, %v3837_v12, %v3836_v15 }
0x1d91   :  { %v3839_v34 = vsel %vm3817_vm9, %v3838_v4, 2147483647 }
0x1d92   :  { %v3841_v26 = vshra.s32 %v3839_v34, 16  ;;  %v3840_v32 = vand.u32 65535, %v3839_v34  ;;  %v3758_v34 = vshll.u32 %v3757_v27, 16 }
0x1d93   :  { %3754 = vmin.xlane.f32.xlu0 %v3753_v9 }
0x1d94   :  { %v3843_v3 = vcvt.s32.f32 %v3841_v26  ;;  %v3842_v33 = vcvt.s32.f32 %v3840_v32  ;;  %v3773_v26 = vshll.u32 %v3772_v18, 16 }
0x1d96   :  { %3844 = vmin.xlane.f32.xlu1 %v3843_v3 }
0x1da5   :  { %3066 = vperm.xlu2 %4326, %v3037_v28  }
0x1da7   :  { %3090 = vperm.xlu0 %4327, %v3045_v54  }
0x1dad   :  { %3093 = vperm.xlu2 %4326, %v3046_v30  }
0x1daf   :  { %3087 = vperm.xlu1 %4325, %v3044_v17  }
0x1db7   :  { %v6473_v61 = vpop.xlane.xlu2 %3440 }
0x1db8   :  { %v6475_v56 = vpop.xlane.xlu0 %3455  ;;  %vm3442_vm6 = vcmp.eq.f32.partialorder %v6428_v13, %v6473_v61 }
0x1db9   :  { %v3443_v14 = vsel %vm3442_vm6, %v3438_v45, inf  ;;  %vm3457_vm13 = vcmp.eq.f32.partialorder %v6430_v46, %v6475_v56  ;;  %vm3938_vm6 = vcmp.eq.s32.totalorder %v4706_v7, 3 }
0x1dba   :  { %v3458_v22 = vsel %vm3457_vm13, %v3453_v51, inf }
0x1dbf   :  { %v3049_v16 = vpop.permute.xlu2 %3048 }
0x1dc0   :  { %v3095_v11 = vperm.slane %v3049_v16, %v4706_v7 }
0x1dc7   :  { %v3082_v31 = vpop.permute.xlu2 %3081 }
0x1dc8   :  { %v3106_v50 = vperm.slane %v3082_v31, %v4706_v7 }
0x1dcb   :  { %v3052_v36 = vpop.permute.xlu0 %3051 }
0x1dcc   :  { %v3096_v5 = vperm.slane %v3052_v36, %v4706_v7 }
0x1dce   :  { %v3111_v43 = vsel %vm2015_vm12, %v3096_v5, %v3095_v11 }
0x1dcf   :  { %v3112_v25 = vsel %vm2017_vm2, %v3097_v59, %v3111_v43 }
0x1dd0   :  { %v3113_v20 = vsel %vm2019_vm4, %v3098_v49, %v3112_v25 }
0x1dd1   :  { %3444 = vmin.xlane.f32.xlu0 %v3443_v14  ;;  %v6489_v19 = vsel %vm2021_vm1, %v3099_v62, %v3113_v20 }
0x1dd3   :  { %v3076_v35 = vpop.permute.xlu0 %3075 }
0x1dd4   :  { %v3104_v24 = vperm.slane %v3076_v35, %v4706_v7 }
0x1dd6   :  { %v3118_v4 = vsel %vm2015_vm12, %v3104_v24, %v3103_v6 }
0x1ddb   :  { %v3085_v0 = vpop.permute.xlu0 %3084 }
0x1ddc   :  { %v3107_v39 = vperm.slane %v3085_v0, %v4706_v7  ;;  %v3447_v0 = vcvt.f32.s32 %v6473_v61 }
0x1dde   :  { %v3448_v24 = vshll.u32 %v3447_v0, 16 }
0x1e00   :  { %v3770_v48 = vpop.xlane.xlu2 %3769 }
0x1e01   :  { %v3771_v9 = vcvt.f32.s32 %v3770_v48 }
0x1e03   :  { %v3774_v28 = vadd.s32 %v3773_v26, %v3771_v9 }
0x1e05   :  { %v3859_v21 = vperm.slane %v3774_v28, %v4706_v7 }
0x1e06   :  { %v3755_v58 = vpop.xlane.xlu0 %3754 }
0x1e07   :  { %v3756_v15 = vcvt.f32.s32 %v3755_v58 }
0x1e08   :  { %v3067_v46 = vpop.permute.xlu2 %3066 }
0x1e09   :  { %v3845_v13 = vpop.xlane.xlu1 %3844  ;;  %v3759_v47 = vadd.s32 %v3758_v34, %v3756_v15 }
0x1e0a   :  { %vm3846_vm0 = vcmp.eq.f32.partialorder %v3843_v3, %v3845_v13  ;;  %v3119_v3 = vsel %vm2017_vm2, %v3105_v29, %v3118_v4  ;;  %v3851_v1 = vcvt.f32.s32 %v3845_v13  ;;  %v3101_v13 = vperm.slane %v3067_v46, %v4706_v7 }
0x1e0b   :  { %v3847_v63 = vsel %vm3846_vm0, %v3842_v33, inf  ;;  %v3120_v37 = vsel %vm2019_vm4, %v3106_v50, %v3119_v3  ;;  %v3858_v60 = vperm.slane %v3759_v47, %v4706_v7  ;;  %v3100_v33 = vperm.slane %v6491_v23, %v4706_v7 }
0x1e0c   :  { %3848 = vmin.xlane.f32.xlu1 %v3847_v63  ;;  %v3121_v52 = vsel %vm2021_vm1, %v3107_v39, %v3120_v37  ;;  %v3852_v30 = vshll.u32 %v3851_v1, 16  ;;  %v3462_v23 = vcvt.f32.s32 %v6475_v56  ;;  %vm3875_vm4 = vcmp.eq.s32.totalorder %v4706_v7, 6 }
0x1e0d   :  { %v3860_v38 = vsel %vm2015_vm12, %v3859_v21, %v3858_v60  ;;  %v3115_v57 = vsel %vm2023_vm5, %v3100_v33, %v6489_v19 }
0x1e0e   :  { %v3463_v19 = vshll.u32 %v3462_v23, 16 }
0x1e10   :  { %v3094_v10 = vpop.permute.xlu2 %3093 }
0x1e11   :  { %v3110_v11 = vperm.slane %v3094_v10, %v4706_v7 }
0x1e19   :  { %v3091_v54 = vpop.permute.xlu0 %3090 }
0x1e1a   :  { %v3109_v16 = vperm.slane %v3091_v54, %v4706_v7 }
0x1e21   :  { %v3088_v12 = vpop.permute.xlu1 %3087 }
0x1e22   :  { %v3108_v44 = vperm.slane %v3088_v12, %v4706_v7 }
0x1e24   :  { %v3122_v17 = vsel %vm2023_vm5, %v3108_v44, %v3121_v52 }
0x1e25   :  { %3069 = vperm.xlu1 %4325, %v3038_v40   ;;  %v3123_v36 = vsel %vm2025_vm7, %v3109_v16, %v3122_v17  ;;  %v3116_v40 = vsel %vm2025_vm7, %v3101_v13, %v3115_v57 }
0x1e26   :  { %v3124_v45 = vsel %vm2027_vm8, %v3110_v11, %v3123_v36 }
0x1e27   :  { %v3140_v20 = vsel %vm1794_vm11, %v3124_v45, 2147483647 }
0x1e28   :  { %v3142_v14 = vshra.s32 %v3140_v20, 16  ;;  %v3141_v56 = vand.u32 65535, %v3140_v20 }
0x1e2a   :  { %v3144_v32 = vcvt.s32.f32 %v3142_v14  ;;  %v3143_v44 = vcvt.s32.f32 %v3141_v56 }
0x1e44   :  { %v3445_v31 = vpop.xlane.xlu0 %3444 }
0x1e45   :  { %v3446_v48 = vcvt.f32.s32 %v3445_v31 }
0x1e47   :  { %v3449_v27 = vadd.s32 %v3448_v24, %v3446_v48 }
0x1e49   :  { %v3879_v12 = vperm.slane %v3449_v27, %v4706_v7 }
0x1e4f   :  { %3459 = vmin.xlane.f32.xlu1 %v3458_v22 }
0x1e7f   :  { %v3849_v8 = vpop.xlane.xlu1 %3848 }
0x1e80   :  { %v3850_v53 = vcvt.f32.s32 %v3849_v8 }
0x1e82   :  { %v3853_v41 = vadd.s32 %v3852_v30, %v3850_v53 }
0x1e84   :  { %vm3857_vm2 = vcmp.eq.s32.totalorder %v4706_v7, %v3853_v41  ;;  %v3855_v26 = vcvt.s32.f32 %v3853_v41 }
0x1e85   :  { %v3861_v5 = vsel %vm3857_vm2, %v3860_v38, 0  ;;  %vm3980_vm2 = vcmp.eq.s32.totalorder %v4706_v7, 1 }
0x1e86   :  { %v3862_v59 = vsel %vm3817_vm9, %v3861_v5, 0 }
0x1e87   :  { %v3864_v49 = vshrl.u32 %v3862_v59, 16  ;;  %v3863_v43 = vand.u32 65535, %v3862_v59 }
0x1e89   :  { %v3866_v62 = vcvt.s32.f32 %v3864_v49  ;;  %v3865_v25 = vcvt.s32.f32 %v3863_v43 }
0x1e8b   :  { %3869 = vadd.xlane.f32.xlu2 %v3866_v62  ;;  %3867 = vadd.xlane.f32.xlu0 %v3865_v25 }
0x1e93   :  { %3145 = vmin.xlane.f32.xlu2 %v3144_v32 }
0x1e97   :  { %v3070_v63 = vpop.permute.xlu1 %3069 }
0x1e98   :  { %v3102_v55 = vperm.slane %v3070_v63, %v4706_v7 }
0x1e9a   :  { %v3117_v2 = vsel %vm2027_vm8, %v3102_v55, %v3116_v40  ;;  %vm3896_vm8 = vcmp.eq.s32.totalorder %v4706_v7, 5 }
0x1e9b   :  { %v3125_v51 = vsel %vm1794_vm11, %v3117_v2, 2147483647  ;;  %vm3854_vm11 = vcmp.eq.s32.totalorder %v4706_v7, 7 }
0x1e9c   :  { %v3127_v22 = vshra.s32 %v3125_v51, 16  ;;  %v3856_v47 = vsel %vm3854_vm11, %v3855_v26, 0.0  ;;  %v3126_v60 = vand.u32 65535, %v3125_v51  ;;  %v6643_v26 = vld [vmem:[#allocation21_spill] sm:$0xff] }
0x1e9d   :  { %v2516_v56 = vcvt.f32.s32 %v6643_v26 }
0x1e9e   :  { %v3129_v35 = vcvt.s32.f32 %v3127_v22  ;;  %v3128_v53 = vcvt.s32.f32 %v3126_v60 }
0x1ea0   :  { %3130 = vmin.xlane.f32.xlu1 %v3129_v35 }
0x1ec2   :  { %v3460_v58 = vpop.xlane.xlu1 %3459 }
0x1ec3   :  { %v3461_v6 = vcvt.f32.s32 %v3460_v58 }
0x1ec5   :  { %v3464_v18 = vadd.s32 %v3463_v19, %v3461_v6 }
0x1ec7   :  { %v3880_v15 = vperm.slane %v3464_v18, %v4706_v7 }
0x1ec9   :  { %v3881_v46 = vsel %vm2015_vm12, %v3880_v15, %v3879_v12 }
0x1efe   :  { %v3870_v4 = vpop.xlane.xlu2 %3869  ;;  %v3868_v29 = vpop.xlane.xlu0 %3867 }
0x1eff   :  { %v3872_v34 = vcvt.f32.s32 %v3870_v4  ;;  %v3871_v61 = vcvt.f32.s32 %v3868_v29 }
0x1f01   :  { %v3873_v9 = vshll.u32 %v3872_v34, 16 }
0x1f03   :  { %v3874_v3 = vadd.s32 %v3873_v9, %v3871_v61  ;;  %v6642_v9 = vld [vmem:[#allocation23_spill] sm:$0xff] }
0x1f04   :  { %v2531_v61 = vcvt.f32.s32 %v6642_v9 }
0x1f05   :  { %v3876_v39 = vcvt.s32.f32 %v3874_v3  ;;  %vm3878_vm1 = vcmp.eq.s32.totalorder %v4706_v7, %v3874_v3  ;;  %v6644_v3 = vld [vmem:[#allocation26_spill] sm:$0xff] }
0x1f06   :  { %v3882_v1 = vsel %vm3878_vm1, %v3881_v46, 0  ;;  %v3146_v50 = vpop.xlane.xlu2 %3145 }
0x1f07   :  { %v3877_v28 = vsel %vm3875_vm4, %v3876_v39, %v3856_v47  ;;  %vm3147_vm5 = vcmp.eq.f32.partialorder %v3144_v32, %v3146_v50  ;;  %v3883_v37 = vsel %vm3817_vm9, %v3882_v1, 0  ;;  %v3152_v38 = vcvt.f32.s32 %v3146_v50  ;;  %v6645_v1 = vld [vmem:[#allocation25_spill] sm:$0xff] }
0x1f08   :  { %v3148_v54 = vsel %vm3147_vm5, %v3143_v44, inf  ;;  %v3885_v8 = vshrl.u32 %v3883_v37, 16  ;;  %v3884_v21 = vand.u32 65535, %v3883_v37  ;;  %v2530_v39 = vcvt.f32.s32 %v6644_v3 }
0x1f09   :  { %3149 = vmin.xlane.f32.xlu1 %v3148_v54  ;;  %v3153_v43 = vshll.u32 %v3152_v38, 16  ;;  %v2532_v47 = vshll.u32 %v2531_v61, 16  ;;  %v2515_v50 = vcvt.f32.s32 %v6645_v1  ;;  %v2517_v44 = vshll.u32 %v2516_v56, 16  ;;  %v6653_v61 = vld [vmem:[#allocation15_spill] sm:$0xff] }
0x1f0a   :  { %v3887_v52 = vcvt.s32.f32 %v3885_v8  ;;  %v3886_v10 = vcvt.s32.f32 %v3884_v21  ;;  %v1816_v26 = vcvt.f32.s32 %v6653_v61 }
0x1f0b   :  { %v2518_v54 = vadd.s32 %v2517_v44, %v2515_v50 }
0x1f0c   :  { %3890 = vadd.xlane.f32.xlu2 %v3887_v52 }
0x1f13   :  { %v3131_v30 = vpop.xlane.xlu1 %3130 }
0x1f14   :  { %vm3132_vm7 = vcmp.eq.f32.partialorder %v3129_v35, %v3131_v30  ;;  %v3137_v16 = vcvt.f32.s32 %v3131_v30 }
0x1f15   :  { %v3133_v17 = vsel %vm3132_vm7, %v3128_v53, inf  ;;  %v3942_v53 = vperm.slane %v2518_v54, %v4706_v7 }
0x1f16   :  { %3134 = vmin.xlane.f32.xlu0 %v3133_v17  ;;  %v3138_v59 = vshll.u32 %v3137_v16, 16 }
0x1f1e   :  { %3888 = vadd.xlane.f32.xlu0 %v3886_v10 }
0x1f7c   :  { %v3150_v41 = vpop.xlane.xlu1 %3149 }
0x1f7d   :  { %v3151_v49 = vcvt.f32.s32 %v3150_v41 }
0x1f7f   :  { %v3891_v5 = vpop.xlane.xlu2 %3890  ;;  %v3154_v25 = vadd.s32 %v3153_v43, %v3151_v49  ;;  %v6646_v49 = vld [vmem:[#allocation17_spill] sm:$0xff] }
0x1f80   :  { %v3893_v45 = vcvt.f32.s32 %v3891_v5  ;;  %v2221_v43 = vcvt.f32.s32 %v6646_v49 }
0x1f81   :  { %v3901_v33 = vperm.slane %v3154_v25, %v4706_v7  ;;  %v6648_v25 = vld [vmem:[#allocation20_spill] sm:$0xff] }
0x1f82   :  { %v3894_v14 = vshll.u32 %v3893_v45, 16  ;;  %v6647_v45 = vld [vmem:[#allocation16_spill] sm:$0xff] }
0x1f89   :  { %v3135_v36 = vpop.xlane.xlu0 %3134 }
0x1f8a   :  { %v3136_v11 = vcvt.f32.s32 %v3135_v36 }
0x1f8c   :  { %v3139_v62 = vadd.s32 %v3138_v59, %v3136_v11 }
0x1f8e   :  { %v3900_v32 = vperm.slane %v3139_v62, %v4706_v7  ;;  %v2206_v62 = vcvt.f32.s32 %v6647_v45 }
0x1f90   :  { %v3902_v55 = vsel %vm2015_vm12, %v3901_v33, %v3900_v32  ;;  %v6649_v32 = vld [vmem:[#allocation18_spill] sm:$0xff]  ;;  %v2207_v33 = vshll.u32 %v2206_v62, 16 }
0x1f91   :  { %v3889_v20 = vpop.xlane.xlu0 %3888 }
0x1f92   :  { %v3892_v13 = vcvt.f32.s32 %v3889_v20  ;;  %v2220_v20 = vcvt.f32.s32 %v6648_v25 }
0x1f94   :  { %v3895_v63 = vadd.s32 %v3894_v14, %v3892_v13  ;;  %v2222_v14 = vshll.u32 %v2221_v43, 16  ;;  %v2205_v13 = vcvt.f32.s32 %v6649_v32 }
0x1f96   :  { %v3897_v57 = vcvt.s32.f32 %v3895_v63  ;;  %vm3899_vm3 = vcmp.eq.s32.totalorder %v4706_v7, %v3895_v63  ;;  %v2223_v63 = vadd.s32 %v2222_v14, %v2220_v20 }
0x1f97   :  { %v3903_v40 = vsel %vm3899_vm3, %v3902_v55, 0 }
0x1f98   :  { %v3898_v2 = vsel %vm3896_vm8, %v3897_v57, %v3877_v28  ;;  %v3904_v51 = vsel %vm3817_vm9, %v3903_v40, 0  ;;  %v2208_v40 = vadd.s32 %v2207_v33, %v2205_v13 }
0x1f99   :  { %v3906_v22 = vshrl.u32 %v3904_v51, 16  ;;  %v3905_v35 = vand.u32 65535, %v3904_v51  ;;  %v3964_v51 = vperm.slane %v2223_v63, %v4706_v7 }
0x1f9b   :  { %v3908_v31 = vcvt.s32.f32 %v3906_v22  ;;  %v3907_v0 = vcvt.s32.f32 %v3905_v35 }
0x1f9d   :  { %3911 = vadd.xlane.f32.xlu1 %v3908_v31  ;;  %3909 = vadd.xlane.f32.xlu2 %v3907_v0  ;;  %v3963_v31 = vperm.slane %v2208_v40, %v4706_v7 }
0x2010   :  { %v3912_v23 = vpop.xlane.xlu1 %3911  ;;  %v3910_v48 = vpop.xlane.xlu2 %3909 }
0x2011   :  { %v3914_v24 = vcvt.f32.s32 %v3912_v23  ;;  %v3913_v19 = vcvt.f32.s32 %v3910_v48  ;;  %v3965_v23 = vsel %vm2015_vm12, %v3964_v51, %v3963_v31 }
0x2013   :  { %v3915_v58 = vshll.u32 %v3914_v24, 16 }
0x2015   :  { %v3916_v27 = vadd.s32 %v3915_v58, %v3913_v19 }
0x2017   :  { %v3918_v6 = vcvt.s32.f32 %v3916_v27  ;;  %vm3920_vm15 = vcmp.eq.s32.totalorder %v4706_v7, %v3916_v27 }
0x2018   :  { %v3924_v18 = vsel %vm3920_vm15, %v6144_v42, 0  ;;  %v2533_v42 = vadd.s32 %v2532_v47, %v2530_v39 }
0x2019   :  { %v3919_v12 = vsel %vm3917_vm14, %v3918_v6, %v3898_v2  ;;  %v3925_v15 = vsel %vm3817_vm9, %v3924_v18, 0 }
0x201a   :  { %v3927_v46 = vshrl.u32 %v3925_v15, 16  ;;  %v3926_v4 = vand.u32 65535, %v3925_v15  ;;  %v3943_v52 = vperm.slane %v2533_v42, %v4706_v7  ;;  %v6650_v15 = vld [vmem:[#allocation12_spill] sm:$0xff] }
0x201c   :  { %v3929_v29 = vcvt.s32.f32 %v3927_v46  ;;  %v3928_v34 = vcvt.s32.f32 %v3926_v4  ;;  %v3944_v21 = vsel %vm2015_vm12, %v3943_v52, %v3942_v53  ;;  %v1832_v46 = vcvt.f32.s32 %v6650_v15  ;;  %v6651_v4 = vld [vmem:[#allocation13_spill] sm:$0xff] }
0x201e   :  { %3932 = vadd.xlane.f32.xlu0 %v3929_v29  ;;  %3930 = vadd.xlane.f32.xlu1 %v3928_v34  ;;  %v1817_v29 = vcvt.f32.s32 %v6651_v4  ;;  %v6652_v34 = vld [vmem:[#allocation14_spill] sm:$0xff]  ;;  %v1833_v56 = vshll.u32 %v1832_v46, 16 }
0x201f   :  { %v1831_v9 = vcvt.f32.s32 %v6652_v34 }
0x2020   :  { %v1818_v3 = vshll.u32 %v1817_v29, 16 }
0x2021   :  { %v1834_v39 = vadd.s32 %v1833_v56, %v1831_v9 }
0x2022   :  { %v1819_v47 = vadd.s32 %v1818_v3, %v1816_v26 }
0x2023   :  { %v3985_v42 = vperm.slane %v1834_v39, %v4706_v7 }
0x2091   :  { %v3933_v28 = vpop.xlane.xlu0 %3932  ;;  %v3931_v37 = vpop.xlane.xlu1 %3930 }
0x2092   :  { %v3935_v8 = vcvt.f32.s32 %v3933_v28  ;;  %v3934_v30 = vcvt.f32.s32 %v3931_v37  ;;  %v3984_v28 = vperm.slane %v1819_v47, %v4706_v7 }
0x2094   :  { %v3936_v60 = vshll.u32 %v3935_v8, 16  ;;  %v3986_v52 = vsel %vm2015_vm12, %v3985_v42, %v3984_v28  ;;  %vm4001_vm12 = vcmp.eq.s32.totalorder %v4706_v7, 0 }
0x2096   :  { %v3937_v17 = vadd.s32 %v3936_v60, %v3934_v30 }
0x2098   :  { %v3939_v10 = vcvt.s32.f32 %v3937_v17  ;;  %vm3941_vm0 = vcmp.eq.s32.totalorder %v4706_v7, %v3937_v17 }
0x2099   :  { %v3945_v16 = vsel %vm3941_vm0, %v3944_v21, 0 }
0x209a   :  { %v3940_v41 = vsel %vm3938_vm6, %v3939_v10, %v3919_v12  ;;  %v3946_v36 = vsel %vm3817_vm9, %v3945_v16, 0 }
0x209b   :  { %v3948_v38 = vshrl.u32 %v3946_v36, 16  ;;  %v3947_v11 = vand.u32 65535, %v3946_v36 }
0x209d   :  { %v3950_v5 = vcvt.s32.f32 %v3948_v38  ;;  %v3949_v59 = vcvt.s32.f32 %v3947_v11 }
0x209f   :  { %3953 = vadd.xlane.f32.xlu2 %v3950_v5  ;;  %3951 = vadd.xlane.f32.xlu0 %v3949_v59 }
0x2112   :  { %v3954_v57 = vpop.xlane.xlu2 %3953  ;;  %v3952_v55 = vpop.xlane.xlu0 %3951 }
0x2113   :  { %v3956_v2 = vcvt.f32.s32 %v3954_v57  ;;  %v3955_v35 = vcvt.f32.s32 %v3952_v55 }
0x2115   :  { %v3957_v22 = vshll.u32 %v3956_v2, 16 }
0x2117   :  { %v3958_v0 = vadd.s32 %v3957_v22, %v3955_v35 }
0x2119   :  { %v3960_v48 = vcvt.s32.f32 %v3958_v0  ;;  %vm3962_vm13 = vcmp.eq.s32.totalorder %v4706_v7, %v3958_v0 }
0x211a   :  { %v3966_v24 = vsel %vm3962_vm13, %v3965_v23, 0 }
0x211b   :  { %v3961_v58 = vsel %vm3959_vm10, %v3960_v48, %v3940_v41  ;;  %v3967_v19 = vsel %vm3817_vm9, %v3966_v24, 0 }
0x211c   :  { %v3969_v27 = vshrl.u32 %v3967_v19, 16  ;;  %v3968_v6 = vand.u32 65535, %v3967_v19 }
0x211e   :  { %v3971_v18 = vcvt.s32.f32 %v3969_v27  ;;  %v3970_v12 = vcvt.s32.f32 %v3968_v6 }
0x2120   :  { %3974 = vadd.xlane.f32.xlu1 %v3971_v18  ;;  %3972 = vadd.xlane.f32.xlu2 %v3970_v12 }
0x2193   :  { %v3975_v1 = vpop.xlane.xlu1 %3974  ;;  %v3973_v50 = vpop.xlane.xlu2 %3972 }
0x2194   :  { %v3977_v44 = vcvt.f32.s32 %v3975_v1  ;;  %v3976_v54 = vcvt.f32.s32 %v3973_v50 }
0x2196   :  { %v3978_v37 = vshll.u32 %v3977_v44, 16 }
0x2198   :  { %v3979_v8 = vadd.s32 %v3978_v37, %v3976_v54 }
0x219a   :  { %v3981_v60 = vcvt.s32.f32 %v3979_v8  ;;  %vm3983_vm11 = vcmp.eq.s32.totalorder %v4706_v7, %v3979_v8 }
0x219b   :  { %v3987_v30 = vsel %vm3983_vm11, %v3986_v52, 0 }
0x219c   :  { %v3988_v53 = vsel %vm3817_vm9, %v3987_v30, 0  ;;  %v3982_v17 = vsel %vm3980_vm2, %v3981_v60, %v3961_v58 }
0x219d   :  { %v3990_v21 = vshrl.u32 %v3988_v53, 16  ;;  %v3989_v10 = vand.u32 65535, %v3988_v53 }
0x219f   :  { %v3992_v16 = vcvt.s32.f32 %v3990_v21  ;;  %v3991_v41 = vcvt.s32.f32 %v3989_v10 }
0x21a1   :  { %3995 = vadd.xlane.f32.xlu0 %v3992_v16  ;;  %3993 = vadd.xlane.f32.xlu1 %v3991_v41 }
0x2214   :  { %v3996_v36 = vpop.xlane.xlu0 %3995  ;;  %v3994_v38 = vpop.xlane.xlu1 %3993 }
0x2215   :  { %v3998_v11 = vcvt.f32.s32 %v3996_v36  ;;  %v3997_v59 = vcvt.f32.s32 %v3994_v38 }
0x2217   :  { %v3999_v5 = vshll.u32 %v3998_v11, 16 }
0x2219   :  { %v4000_v49 = vadd.s32 %v3999_v5, %v3997_v59 }
0x221b   :  { %v4002_v43 = vcvt.s32.f32 %v4000_v49 }
0x221d   :  { %v4003_v45 = vsel %vm4001_vm12, %v4002_v43, %v3982_v17 }
0x221e   :  { %4004 = vst.msk [vmem:[#allocation8] sm:$0x3] %vm3817_vm9, %v4003_v45 }
0x221f   :  { %4015 = dma.vmem_to_hbm [thread:$0]  %s4011_s22, 32, %s4013_s1, [#allocation7]  }
0x2220   :  { %4509 = dma.done.wait [#allocation7], 32  }
0x2221   :  { %4510 = vsyncadd [#allocation7], 4294967264 }
0x2222   :  { %4020 = vsyncpa [#allocation6], 1 }
0x2223   :  { %4021 = vsyncpa [#allocation7], 1 }

</bundles_post_ra>
